<compile_context>
chip_gen: v5e
topology: v5e:2x2
jax: 0.10.0
libtpu: 0.0.40
codegen_flags: <defaults>
</compile_context>

<pallas_src>
import jax
import jax.numpy as jnp
from jax.experimental import pallas as pl
from jax.experimental.pallas import tpu as pltpu


def _round_up(x, m):
    return ((x + m - 1) // m) * m


def _tensorcores_per_chip():
    """Crude generation sniff: v7x has 2 TensorCores/chip, v5e/v6e have 1."""
    try:
        kind = jax.devices()[0].device_kind.lower()
        if "v7" in kind or "7x" in kind:
            return 2
    except Exception:
        pass
    return 1


def _make_fused_mlp_kernel(n_layers, relu_flags):
    """Fused kernel body for an n-layer Linear(+ReLU) stack.

    Kernel signature: (x_ref, w_0, b_0, ..., w_{n-1}, b_{n-1}, o_ref).
    """

    def kernel(*refs):
        x_ref = refs[0]
        o_ref = refs[-1]
        h = x_ref[...]
        for l in range(n_layers):
            w_ref = refs[1 + 2 * l]
            b_ref = refs[2 + 2 * l]
            # MXU matmul with f32 accumulation.  The operand cast to the
            # weight dtype (bf16 on the fast path) happens HERE, in vregs —
            # never in the wrapper (no extra HBM pass over the activations).
            y = jnp.dot(h.astype(w_ref.dtype), w_ref[...],
                        preferred_element_type=jnp.float32)
            y = y + b_ref[...]            # f32 bias, VPU epilogue
            if relu_flags[l]:
                y = jnp.maximum(y, 0.0)
            h = y                          # intermediate stays on-chip
        o_ref[...] = h.astype(o_ref.dtype)

    return kernel


def prepare_params(params, compute_dtype=jnp.bfloat16):
    """One-time parameter prep (call ONCE, outside any jitted/per-step code):
    cast weights to the matmul-operand dtype (bf16 default -> native MXU rate,
    half the weight DMA bytes) and shape biases as (1, d_out) f32 rows."""
    prepared = []
    for kind, (w, b) in params:
        w = jnp.asarray(w)
        if compute_dtype is not None:
            w = w.astype(compute_dtype)
        b = jnp.asarray(b).reshape(1, -1).astype(jnp.float32)
        prepared.append((kind, (w, b)))
    return prepared


_VMEM_TILE_BUDGET = 48 << 20  # conservative; fits under v7x's 64 MiB VMEM


def _choose_tile_b(batch, dims, pinned_bytes, num_cores):
    """Batch-tile choice:
      * single-TC chips (v5e/v6e): one grid step when the whole batch fits —
        grid=(k,) is a serial loop there, so fewer steps = fewer ~600-cycle
        step overheads with nothing lost (weights are pinned anyway).
      * v7x (2 TCs): balanced >=2-way split so both cores get equal work.
      * large batches: cap the tile by a VMEM activation budget.
    """
    widest = max(dims)
    # Rough per-row VMEM cost: double-buffered f32 in/out tiles + one f32
    # intermediate of the widest layer.
    per_row = 4 * (2 * dims[0] + 2 * dims[-1] + widest)
    act_budget = max(_VMEM_TILE_BUDGET - pinned_bytes, 4 << 20)
    max_tile = max(16, min(1024, (act_budget // per_row) // 16 * 16))

    if num_cores <= 1 and batch <= max_tile:
        return batch                          # single full-extent tile, no pad
    target = -(-batch // num_cores)           # cdiv: balanced per-core share
    return min(max_tile, max(16, _round_up(target, 16)))


def _vmem_limit_bytes(pinned_bytes, tile_b, dims, weight_bufs):
    act = 4 * tile_b * (dims[0] + dims[-1]) * 2   # double-buffered in/out tiles
    inter = 4 * tile_b * max(dims) * 2            # f32 intermediates headroom
    total = pinned_bytes * weight_bufs + act + inter
    return int(min(max(2 * total + (4 << 20), 32 << 20), 64 << 20))


def sequential_forward(x, prepared_params, *, tile_b=None, out_dtype=None):
    """Mirrors Sequential.forward for a Linear/ReLU stack, fused into a single
    Pallas kernel.

    x               : (B, D_in) float32 activations (kept f32 into the kernel)
    prepared_params : output of prepare_params() — list of
                      ("linear_relu" | "linear", (w, b)) with w in the matmul
                      operand dtype and b as (1, d_out) f32.
    tile_b          : optional batch tile override (tuning knob).
    """
    orig_batch, d_in = x.shape
    out_dtype = out_dtype or x.dtype
    n_layers = len(prepared_params)
    relu_flags = tuple(kind == "linear_relu" for kind, _ in prepared_params)
    ws = [w for _, (w, _) in prepared_params]
    bs = [b for _, (_, b) in prepared_params]
    assert ws[0].shape[0] == d_in, "first weight in_features must match x"
    dims = (d_in,) + tuple(w.shape[1] for w in ws)
    d_out = dims[-1]

    pinned_bytes = (sum(w.size * w.dtype.itemsize for w in ws)
                    + sum(b.size * 4 for b in bs))
    num_cores = _tensorcores_per_chip()
    if tile_b is None:
        tile_b = _choose_tile_b(orig_batch, dims, pinned_bytes, num_cores)

    if tile_b >= orig_batch:
        tile_b = orig_batch                # one full-extent tile, no padding
        batch = orig_batch
    else:
        batch = _round_up(orig_batch, tile_b)
    grid = (batch // tile_b,)

    x_in = x
    if batch != orig_batch:
        # Fallback only: the tile chooser tries to divide the batch exactly,
        # so this extra HBM pass over x is normally skipped.
        x_in = jnp.pad(x, ((0, batch - orig_batch), (0, 0)))

    kernel = _make_fused_mlp_kernel(n_layers, relu_flags)

    def build(single_buffer_weights):
        pinned_kwargs = {}
        if single_buffer_weights and hasattr(pl, "Buffered"):
            # Pinned operands never change block index: single-buffer them so
            # they don't cost 2x VMEM for zero overlap benefit.
            pinned_kwargs = dict(pipeline_mode=pl.Buffered(1))
        in_specs = [pl.BlockSpec((tile_b, d_in), lambda i: (i, 0))]
        flat_inputs = [x_in]
        for w, b in zip(ws, bs):
            in_specs.append(pl.BlockSpec(w.shape, lambda i: (0, 0),
                                         **pinned_kwargs))
            in_specs.append(pl.BlockSpec(b.shape, lambda i: (0, 0),
                                         **pinned_kwargs))
            flat_inputs += [w, b]
        weight_bufs = 1 if pinned_kwargs else 2
        limit = _vmem_limit_bytes(pinned_bytes, tile_b, dims, weight_bufs)
        call = pl.pallas_call(
            kernel,
            out_shape=jax.ShapeDtypeStruct((batch, d_out), out_dtype),
            grid_spec=pl.GridSpec(
                grid=grid,
                in_specs=in_specs,
                out_specs=pl.BlockSpec((tile_b, d_out), lambda i: (i, 0)),
            ),
            compiler_params=pltpu.CompilerParams(
                # Batch axis is embarrassingly parallel -> megacore on v7x.
                dimension_semantics=("parallel",),
                vmem_limit_bytes=limit,
            ),
        )
        return call, flat_inputs

    try:
        call, flat_inputs = build(single_buffer_weights=True)
        out = call(*flat_inputs)
    except Exception:
        # Fallback for jax versions where Buffered(1) pinned operands are not
        # supported: default double-buffering.
        call, flat_inputs = build(single_buffer_weights=False)
        out = call(*flat_inputs)

    return out[:orig_batch] if batch != orig_batch else out


def init_params(key, layer_dims):
    """Deterministic parameter init (shapes match nn.Linear in each module)."""
    params = []
    n_layers = len(layer_dims) - 1
    for idx, (d_in, d_out) in enumerate(zip(layer_dims[:-1], layer_dims[1:])):
        key, kw, kb = jax.random.split(key, 3)
        scale = 1.0 / jnp.sqrt(d_in)
        w = jax.random.uniform(kw, (d_in, d_out), jnp.float32, -scale, scale)
        b = jax.random.uniform(kb, (d_out,), jnp.float32, -scale, scale)
        kind = "linear_relu" if idx < n_layers - 1 else "linear"
        params.append((kind, (w, b)))
    return params


def reference_forward(x, params):
    """Plain-JAX reference (same semantics as the torch Sequential of
    Linear/ReLU modules)."""
    for kind, (w, b) in params:
        x = x @ w + b
        if kind == "linear_relu":
            x = jnp.maximum(x, 0.0)
    return x


if __name__ == "__main__":
    key = jax.random.PRNGKey(0)
    key, kx = jax.random.split(key)

    # Lane-dense (multiples of 128) feature widths; small overall footprint.
    # (On v6e/v7x, widths that are multiples of 256 would fully fill the MXU;
    # kept at 128/256 here to stay small for the demo.)
    batch = 256
    layer_dims = (128, 256, 256, 128)  # Linear->ReLU->Linear->ReLU->Linear

    x = jax.random.normal(kx, (batch, layer_dims[0]), jnp.float32)
    raw_params = init_params(key, layer_dims)
    ref = reference_forward(x, raw_params)

    # Default fast path: bf16 matmul operands (cast once here), f32 accumulate.
    params_bf16 = prepare_params(raw_params, compute_dtype=jnp.bfloat16)
    out = jax.block_until_ready(sequential_forward(x, params_bf16))
    assert out.shape == (batch, layer_dims[-1])
    assert jnp.allclose(out, ref, atol=5e-2, rtol=5e-2), "bf16 mismatch vs reference"

    # Full-f32 operand path for a tighter numerical check.
    params_f32 = prepare_params(raw_params, compute_dtype=None)
    out_f32 = jax.block_until_ready(sequential_forward(x, params_f32))
    assert out_f32.shape == (batch, layer_dims[-1])
    assert jnp.allclose(out_f32, ref, atol=1e-3, rtol=1e-3), "f32 mismatch vs reference"

    print("KERNEL_OK")
</pallas_src>

<mosaic_0001>
module attributes {stable_mosaic.version = 11 : i64} {
  func.func @kernel(%arg0: i32, %arg1: memref<256x128xf32, #tpu.memory_space<vmem>>, %arg2: memref<128x256xbf16, #tpu.memory_space<vmem>>, %arg3: memref<1x256xf32, #tpu.memory_space<vmem>>, %arg4: memref<256x256xbf16, #tpu.memory_space<vmem>>, %arg5: memref<1x256xf32, #tpu.memory_space<vmem>>, %arg6: memref<256x128xbf16, #tpu.memory_space<vmem>>, %arg7: memref<1x128xf32, #tpu.memory_space<vmem>>, %arg8: memref<256x128xf32, #tpu.memory_space<vmem>>) attributes {dimension_semantics = [#tpu.dimension_semantics<parallel>], iteration_bounds = array<i64: 1>, scalar_prefetch = 0 : i64, scratch_operands = 0 : i64, tpu.core_type = #tpu.core_type<tc>, window_params = [{transform_indices = @transform_0, window_bounds = array<i64: 256, 128>}, {pipeline_mode = #tpu.pipeline_mode<synchronous>, transform_indices = @transform_1, window_bounds = array<i64: 128, 256>}, {pipeline_mode = #tpu.pipeline_mode<synchronous>, transform_indices = @transform_2, window_bounds = array<i64: 1, 256>}, {pipeline_mode = #tpu.pipeline_mode<synchronous>, transform_indices = @transform_3, window_bounds = array<i64: 256, 256>}, {pipeline_mode = #tpu.pipeline_mode<synchronous>, transform_indices = @transform_4, window_bounds = array<i64: 1, 256>}, {pipeline_mode = #tpu.pipeline_mode<synchronous>, transform_indices = @transform_5, window_bounds = array<i64: 256, 128>}, {pipeline_mode = #tpu.pipeline_mode<synchronous>, transform_indices = @transform_6, window_bounds = array<i64: 1, 128>}, {transform_indices = @transform_7, window_bounds = array<i64: 256, 128>}]} {
    %c0 = arith.constant 0 : index
    %c0_0 = arith.constant 0 : index
    %0 = vector.load %arg1[%c0, %c0_0] : memref<256x128xf32, #tpu.memory_space<vmem>>, vector<256x128xf32>
    %1 = arith.truncf %0 : vector<256x128xf32> to vector<256x128xbf16>
    %c0_1 = arith.constant 0 : index
    %c0_2 = arith.constant 0 : index
    %2 = vector.load %arg2[%c0_1, %c0_2] : memref<128x256xbf16, #tpu.memory_space<vmem>>, vector<128x256xbf16>
    %cst = arith.constant dense<0.000000e+00> : vector<256x256xf32>
    %3 = tpu.matmul %1, %2, %cst {dimension_numbers = #tpu.dot_dimension_numbers<[1], [0], [0], [1], [0, 0, 1, 1], [], []>} : vector<256x128xbf16>, vector<128x256xbf16>, vector<256x256xf32> -> vector<256x256xf32>
    %c0_3 = arith.constant 0 : index
    %c0_4 = arith.constant 0 : index
    %4 = vector.load %arg3[%c0_3, %c0_4] : memref<1x256xf32, #tpu.memory_space<vmem>>, vector<1x256xf32>
    %5 = vector.broadcast %4 : vector<1x256xf32> to vector<256x256xf32>
    %6 = arith.addf %3, %5 : vector<256x256xf32>
    %cst_5 = arith.constant 0.000000e+00 : f32
    %7 = vector.broadcast %cst_5 : f32 to vector<256x256xf32>
    %8 = arith.maximumf %6, %7 : vector<256x256xf32>
    %9 = arith.truncf %8 : vector<256x256xf32> to vector<256x256xbf16>
    %c0_6 = arith.constant 0 : index
    %c0_7 = arith.constant 0 : index
    %10 = vector.load %arg4[%c0_6, %c0_7] : memref<256x256xbf16, #tpu.memory_space<vmem>>, vector<256x256xbf16>
    %cst_8 = arith.constant dense<0.000000e+00> : vector<256x256xf32>
    %11 = tpu.matmul %9, %10, %cst_8 {dimension_numbers = #tpu.dot_dimension_numbers<[1], [0], [0], [1], [0, 0, 1, 1], [], []>} : vector<256x256xbf16>, vector<256x256xbf16>, vector<256x256xf32> -> vector<256x256xf32>
    %c0_9 = arith.constant 0 : index
    %c0_10 = arith.constant 0 : index
    %12 = vector.load %arg5[%c0_9, %c0_10] : memref<1x256xf32, #tpu.memory_space<vmem>>, vector<1x256xf32>
    %13 = vector.broadcast %12 : vector<1x256xf32> to vector<256x256xf32>
    %14 = arith.addf %11, %13 : vector<256x256xf32>
    %cst_11 = arith.constant 0.000000e+00 : f32
    %15 = vector.broadcast %cst_11 : f32 to vector<256x256xf32>
    %16 = arith.maximumf %14, %15 : vector<256x256xf32>
    %17 = arith.truncf %16 : vector<256x256xf32> to vector<256x256xbf16>
    %c0_12 = arith.constant 0 : index
    %c0_13 = arith.constant 0 : index
    %18 = vector.load %arg6[%c0_12, %c0_13] : memref<256x128xbf16, #tpu.memory_space<vmem>>, vector<256x128xbf16>
    %cst_14 = arith.constant dense<0.000000e+00> : vector<256x128xf32>
    %19 = tpu.matmul %17, %18, %cst_14 {dimension_numbers = #tpu.dot_dimension_numbers<[1], [0], [0], [1], [0, 0, 1, 1], [], []>} : vector<256x256xbf16>, vector<256x128xbf16>, vector<256x128xf32> -> vector<256x128xf32>
    %c0_15 = arith.constant 0 : index
    %c0_16 = arith.constant 0 : index
    %20 = vector.load %arg7[%c0_15, %c0_16] : memref<1x128xf32, #tpu.memory_space<vmem>>, vector<1x128xf32>
    %21 = vector.broadcast %20 : vector<1x128xf32> to vector<256x128xf32>
    %22 = arith.addf %19, %21 : vector<256x128xf32>
    %c0_17 = arith.constant 0 : index
    %c0_18 = arith.constant 0 : index
    %23 = vector.load %arg8[%c0_17, %c0_18] : memref<256x128xf32, #tpu.memory_space<vmem>>, vector<256x128xf32>
    tpu.vector_store %arg8[%c0_17, %c0_18], %22 {strides = array<i32>} : memref<256x128xf32, #tpu.memory_space<vmem>>, vector<256x128xf32>,
    return
  }
  func.func @transform_0(%arg0: i32) -> (i32, i32) {
    %c0_i32 = arith.constant 0 : i32
    %c0_i32_0 = arith.constant 0 : i32
    return %arg0, %c0_i32 : i32, i32
  }
  func.func @transform_1(%arg0: i32) -> (i32, i32) {
    %c0_i32 = arith.constant 0 : i32
    %c0_i32_0 = arith.constant 0 : i32
    %c0_i32_1 = arith.constant 0 : i32
    return %c0_i32, %c0_i32_0 : i32, i32
  }
  func.func @transform_2(%arg0: i32) -> (i32, i32) {
    %c0_i32 = arith.constant 0 : i32
    %c0_i32_0 = arith.constant 0 : i32
    %c0_i32_1 = arith.constant 0 : i32
    return %c0_i32, %c0_i32_0 : i32, i32
  }
  func.func @transform_3(%arg0: i32) -> (i32, i32) {
    %c0_i32 = arith.constant 0 : i32
    %c0_i32_0 = arith.constant 0 : i32
    %c0_i32_1 = arith.constant 0 : i32
    return %c0_i32, %c0_i32_0 : i32, i32
  }
  func.func @transform_4(%arg0: i32) -> (i32, i32) {
    %c0_i32 = arith.constant 0 : i32
    %c0_i32_0 = arith.constant 0 : i32
    %c0_i32_1 = arith.constant 0 : i32
    return %c0_i32, %c0_i32_0 : i32, i32
  }
  func.func @transform_5(%arg0: i32) -> (i32, i32) {
    %c0_i32 = arith.constant 0 : i32
    %c0_i32_0 = arith.constant 0 : i32
    %c0_i32_1 = arith.constant 0 : i32
    return %c0_i32, %c0_i32_0 : i32, i32
  }
  func.func @transform_6(%arg0: i32) -> (i32, i32) {
    %c0_i32 = arith.constant 0 : i32
    %c0_i32_0 = arith.constant 0 : i32
    %c0_i32_1 = arith.constant 0 : i32
    return %c0_i32, %c0_i32_0 : i32, i32
  }
  func.func @transform_7(%arg0: i32) -> (i32, i32) {
    %c0_i32 = arith.constant 0 : i32
    %c0_i32_0 = arith.constant 0 : i32
    return %arg0, %c0_i32 : i32, i32
  }
}

module attributes {stable_mosaic.version = 11 : i64} {
  func.func @kernel(%arg0: i32, %arg1: memref<256x128xf32, #tpu.memory_space<vmem>>, %arg2: memref<128x256xbf16, #tpu.memory_space<vmem>>, %arg3: memref<1x256xf32, #tpu.memory_space<vmem>>, %arg4: memref<256x256xbf16, #tpu.memory_space<vmem>>, %arg5: memref<1x256xf32, #tpu.memory_space<vmem>>, %arg6: memref<256x128xbf16, #tpu.memory_space<vmem>>, %arg7: memref<1x128xf32, #tpu.memory_space<vmem>>, %arg8: memref<256x128xf32, #tpu.memory_space<vmem>>) attributes {dimension_semantics = [#tpu.dimension_semantics<parallel>], iteration_bounds = array<i64: 1>, scalar_prefetch = 0 : i64, scratch_operands = 0 : i64, tpu.core_type = #tpu.core_type<tc>, window_params = [{transform_indices = @transform_0, window_bounds = array<i64: 256, 128>}, {pipeline_mode = #tpu.pipeline_mode<synchronous>, transform_indices = @transform_1, window_bounds = array<i64: 128, 256>}, {pipeline_mode = #tpu.pipeline_mode<synchronous>, transform_indices = @transform_2, window_bounds = array<i64: 1, 256>}, {pipeline_mode = #tpu.pipeline_mode<synchronous>, transform_indices = @transform_3, window_bounds = array<i64: 256, 256>}, {pipeline_mode = #tpu.pipeline_mode<synchronous>, transform_indices = @transform_4, window_bounds = array<i64: 1, 256>}, {pipeline_mode = #tpu.pipeline_mode<synchronous>, transform_indices = @transform_5, window_bounds = array<i64: 256, 128>}, {pipeline_mode = #tpu.pipeline_mode<synchronous>, transform_indices = @transform_6, window_bounds = array<i64: 1, 128>}, {transform_indices = @transform_7, window_bounds = array<i64: 256, 128>}]} {
    %c0 = arith.constant 0 : index
    %c0_0 = arith.constant 0 : index
    %0 = vector.load %arg1[%c0, %c0_0] : memref<256x128xf32, #tpu.memory_space<vmem>>, vector<256x128xf32>
    %1 = arith.truncf %0 : vector<256x128xf32> to vector<256x128xbf16>
    %c0_1 = arith.constant 0 : index
    %c0_2 = arith.constant 0 : index
    %2 = vector.load %arg2[%c0_1, %c0_2] : memref<128x256xbf16, #tpu.memory_space<vmem>>, vector<128x256xbf16>
    %cst = arith.constant dense<0.000000e+00> : vector<256x256xf32>
    %3 = tpu.matmul %1, %2, %cst {dimension_numbers = #tpu.dot_dimension_numbers<[1], [0], [0], [1], [0, 0, 1, 1], [], []>} : vector<256x128xbf16>, vector<128x256xbf16>, vector<256x256xf32> -> vector<256x256xf32>
    %c0_3 = arith.constant 0 : index
    %c0_4 = arith.constant 0 : index
    %4 = vector.load %arg3[%c0_3, %c0_4] : memref<1x256xf32, #tpu.memory_space<vmem>>, vector<1x256xf32>
    %5 = vector.broadcast %4 : vector<1x256xf32> to vector<256x256xf32>
    %6 = arith.addf %3, %5 : vector<256x256xf32>
    %cst_5 = arith.constant 0.000000e+00 : f32
    %7 = vector.broadcast %cst_5 : f32 to vector<256x256xf32>
    %8 = arith.maximumf %6, %7 : vector<256x256xf32>
    %9 = arith.truncf %8 : vector<256x256xf32> to vector<256x256xbf16>
    %c0_6 = arith.constant 0 : index
    %c0_7 = arith.constant 0 : index
    %10 = vector.load %arg4[%c0_6, %c0_7] : memref<256x256xbf16, #tpu.memory_space<vmem>>, vector<256x256xbf16>
    %cst_8 = arith.constant dense<0.000000e+00> : vector<256x256xf32>
    %11 = tpu.matmul %9, %10, %cst_8 {dimension_numbers = #tpu.dot_dimension_numbers<[1], [0], [0], [1], [0, 0, 1, 1], [], []>} : vector<256x256xbf16>, vector<256x256xbf16>, vector<256x256xf32> -> vector<256x256xf32>
    %c0_9 = arith.constant 0 : index
    %c0_10 = arith.constant 0 : index
    %12 = vector.load %arg5[%c0_9, %c0_10] : memref<1x256xf32, #tpu.memory_space<vmem>>, vector<1x256xf32>
    %13 = vector.broadcast %12 : vector<1x256xf32> to vector<256x256xf32>
    %14 = arith.addf %11, %13 : vector<256x256xf32>
    %cst_11 = arith.constant 0.000000e+00 : f32
    %15 = vector.broadcast %cst_11 : f32 to vector<256x256xf32>
    %16 = arith.maximumf %14, %15 : vector<256x256xf32>
    %17 = arith.truncf %16 : vector<256x256xf32> to vector<256x256xbf16>
    %c0_12 = arith.constant 0 : index
    %c0_13 = arith.constant 0 : index
    %18 = vector.load %arg6[%c0_12, %c0_13] : memref<256x128xbf16, #tpu.memory_space<vmem>>, vector<256x128xbf16>
    %cst_14 = arith.constant dense<0.000000e+00> : vector<256x128xf32>
    %19 = tpu.matmul %17, %18, %cst_14 {dimension_numbers = #tpu.dot_dimension_numbers<[1], [0], [0], [1], [0, 0, 1, 1], [], []>} : vector<256x256xbf16>, vector<256x128xbf16>, vector<256x128xf32> -> vector<256x128xf32>
    %c0_15 = arith.constant 0 : index
    %c0_16 = arith.constant 0 : index
    %20 = vector.load %arg7[%c0_15, %c0_16] : memref<1x128xf32, #tpu.memory_space<vmem>>, vector<1x128xf32>
    %21 = vector.broadcast %20 : vector<1x128xf32> to vector<256x128xf32>
    %22 = arith.addf %19, %21 : vector<256x128xf32>
    %c0_17 = arith.constant 0 : index
    %c0_18 = arith.constant 0 : index
    %23 = vector.load %arg8[%c0_17, %c0_18] : memref<256x128xf32, #tpu.memory_space<vmem>>, vector<256x128xf32>
    tpu.vector_store %arg8[%c0_17, %c0_18], %22 {strides = array<i32>} : memref<256x128xf32, #tpu.memory_space<vmem>>, vector<256x128xf32>,
    return
  }
  func.func @transform_0(%arg0: i32) -> (i32, i32) {
    %c0_i32 = arith.constant 0 : i32
    %c0_i32_0 = arith.constant 0 : i32
    return %arg0, %c0_i32 : i32, i32
  }
  func.func @transform_1(%arg0: i32) -> (i32, i32) {
    %c0_i32 = arith.constant 0 : i32
    %c0_i32_0 = arith.constant 0 : i32
    %c0_i32_1 = arith.constant 0 : i32
    return %c0_i32, %c0_i32_0 : i32, i32
  }
  func.func @transform_2(%arg0: i32) -> (i32, i32) {
    %c0_i32 = arith.constant 0 : i32
    %c0_i32_0 = arith.constant 0 : i32
    %c0_i32_1 = arith.constant 0 : i32
    return %c0_i32, %c0_i32_0 : i32, i32
  }
  func.func @transform_3(%arg0: i32) -> (i32, i32) {
    %c0_i32 = arith.constant 0 : i32
    %c0_i32_0 = arith.constant 0 : i32
    %c0_i32_1 = arith.constant 0 : i32
    return %c0_i32, %c0_i32_0 : i32, i32
  }
  func.func @transform_4(%arg0: i32) -> (i32, i32) {
    %c0_i32 = arith.constant 0 : i32
    %c0_i32_0 = arith.constant 0 : i32
    %c0_i32_1 = arith.constant 0 : i32
    return %c0_i32, %c0_i32_0 : i32, i32
  }
  func.func @transform_5(%arg0: i32) -> (i32, i32) {
    %c0_i32 = arith.constant 0 : i32
    %c0_i32_0 = arith.constant 0 : i32
    %c0_i32_1 = arith.constant 0 : i32
    return %c0_i32, %c0_i32_0 : i32, i32
  }
  func.func @transform_6(%arg0: i32) -> (i32, i32) {
    %c0_i32 = arith.constant 0 : i32
    %c0_i32_0 = arith.constant 0 : i32
    %c0_i32_1 = arith.constant 0 : i32
    return %c0_i32, %c0_i32_0 : i32, i32
  }
  func.func @transform_7(%arg0: i32) -> (i32, i32) {
    %c0_i32 = arith.constant 0 : i32
    %c0_i32_0 = arith.constant 0 : i32
    return %arg0, %c0_i32 : i32, i32
  }
}

</mosaic_0001>

<bundles_post_ra>
// kernel: tpu_custom_call.1
= control target key start
LH: loop header
LB: loop body
LE: loop exit
PB: predicated region body
PF: predicated region fallthrough
CT: control target
= control target key end

     0   :  { %12 = vsyncpa [#allocation3], 0  ;;  %s2459_s0 = inlined_call_operand.hbm [shape: f32[256,128], index: 0, kind: input, shape index: {}]   ;;  %s2460_s1 = inlined_call_operand.hbm [shape: bf16[128,256], index: 1, kind: input, shape index: {}]   ;;  %s2461_s2 = inlined_call_operand.hbm [shape: f32[1,256], index: 2, kind: input, shape index: {}]   ;;  %s2462_s3 = inlined_call_operand.hbm [shape: bf16[256,256], index: 3, kind: input, shape index: {}]   ;;  %s2463_s4 = inlined_call_operand.vmem [shape: f32[1,256], index: 4, kind: input, shape index: {}]   ;;  %s2464_s5 = inlined_call_operand.hbm [shape: bf16[256,128], index: 5, kind: input, shape index: {}]   ;;  %s2465_s6 = inlined_call_operand.vmem [shape: f32[1,128], index: 6, kind: input, shape index: {}]   ;;  %s2466_s7 = inlined_call_operand.hbm [shape: f32[256,128], index: 7, kind: output, shape index: {}]  }
   0x1   :  { %13 = vsyncpa [#allocation6], 0 }
   0x2   :  { %14 = vsyncpa [#allocation9], 0 }
   0x3   :  { %15 = vsyncpa [#allocation4], 0  ;;  %s33_s26 = sshll.u32 %s2460_s1, 4  ;;  %s2023_s27 = smov [#allocation5]   ;;  %s34_s26 = int_to_ptr.hbm [resolvable:$true] %s33_s26 }
   0x4   :  { %s35_s28 = sshll.u32 %s2023_s27, 4  ;;  %s57_s8 = sshll.u32 %s2462_s3, 4  ;;  %s36_s28 = int_to_ptr.vmem [resolvable:$true] %s35_s28  ;;  %s58_s8 = int_to_ptr.hbm [resolvable:$true] %s57_s8 }
   0x5   :  { %s2024_s9 = smov 128   ;;  %s2025_s10 = smov 8  }
   0x6   :  { %41 = dma.hbm_to_vmem [thread:$0]  %s34_s26, 2048, %s36_s28, [#allocation6], %s2024_s9, %s2024_s9, %s2025_s10  }
   0x7   :  { %s2026_s11 = smov [#allocation8]   ;;  %s20_s1 = sshll.u32 %s2459_s0, 4  ;;  %s21_s1 = int_to_ptr.hbm [resolvable:$true] %s20_s1 }
   0x8   :  { %s59_s12 = sshll.u32 %s2026_s11, 4  ;;  %s47_s16 = sshll.u32 %s2461_s2, 4  ;;  %s60_s12 = int_to_ptr.vmem [resolvable:$true] %s59_s12  ;;  %s48_s16 = int_to_ptr.hbm [resolvable:$true] %s47_s16 }
   0x9   :  { %65 = dma.hbm_to_vmem [thread:$0]  %s58_s8, 4096, %s60_s12, [#allocation9], %s2024_s9, %s2024_s9, %s2025_s10  }
   0xa   :  { %s2027_s17 = smov [#allocation2]   ;;  %s2028_s19 = smov [#allocation7]  }
   0xb   :  { %s22_s18 = sshll.u32 %s2027_s17, 4  ;;  %s49_s0 = sshll.u32 %s2028_s19, 4  ;;  %s23_s18 = int_to_ptr.vmem [resolvable:$true] %s22_s18  ;;  %s50_s0 = int_to_ptr.vmem [resolvable:$true] %s49_s0 }
   0xc   :  { %28 = dma.hbm_to_vmem [thread:$0]  %s21_s1, 4096, %s23_s18, [#allocation3], %s2024_s9, %s2024_s9, %s2025_s10  }
   0xd   :  { %s72_s22 = sshll.u32 %s2464_s5, 4  ;;  %s2029_s23 = smov [#allocation10]   ;;  %s73_s22 = int_to_ptr.hbm [resolvable:$true] %s72_s22 }
   0xe   :  { %52 = dma.hbm_to_vmem [thread:$0]  %s48_s16, 32, %s50_s0, [#allocation6]  }
   0xf   :  { %s74_s24 = sshll.u32 %s2029_s23, 4  ;;  %s2030_s2 = smov 64   ;;  %s75_s24 = int_to_ptr.vmem [resolvable:$true] %s74_s24 }
  0x10   :  { %s2031_s25 = smov 4  }
  0x11   :  { %80 = dma.hbm_to_vmem [thread:$0]  %s73_s22, 2048, %s75_s24, [#allocation9], %s2030_s2, %s2030_s2, %s2031_s25  }
  0x12   :  { %2015 = dma.done.wait [#allocation3], 4096  }
  0x13   :  { %2016 = vsyncadd [#allocation3], 4294963200 }
  0x14   :  { %2017 = dma.done.wait [#allocation6], 2080  }
  0x15   :  { %2018 = vsyncadd [#allocation6], 4294965216 }
  0x16   :  { %2019 = dma.done.wait [#allocation9], 6144  }
  0x17   :  { %2020 = vsyncadd [#allocation9], 4294961152  ;;  %v1598_v0 = vld [vmem:[#allocation5 + $0x70] sm:$0xf]  ;;  %v1811_v1 = vld [vmem:[#allocation5 + $0x74] sm:$0xf0] }
  0x18   :  { %v1810_v2 = vld [vmem:[#allocation5 + $0x74] sm:$0xf]  ;;  %v1599_v3 = vor.u32 %v1811_v1, %v1598_v0  ;;  %v1600_v4 = vld [vmem:[#allocation5 + $0x78] sm:$0xf0]  ;;  %v1590_v5 = vld [vmem:[#allocation5 + $0x60] sm:$0xf] }
  0x19   :  { %v1809_v6 = vld [vmem:[#allocation5 + $0x64] sm:$0xf0]  ;;  %v1603_v7 = vor.u32 %v1810_v2, %v1600_v4  ;;  %v1808_v8 = vld [vmem:[#allocation5 + $0x64] sm:$0xf]  ;;  %v1592_v9 = vld [vmem:[#allocation5 + $0x68] sm:$0xf0] }
  0x1a   :  { %253 = vmatpush.bf16.msra.mxu0 %v1599_v3  ;;  %v1591_v10 = vor.u32 %v1809_v6, %v1590_v5  ;;  %v1595_v11 = vor.u32 %v1808_v8, %v1592_v9  ;;  %v1582_v12 = vld [vmem:[#allocation5 + $0x50] sm:$0xf]  ;;  %v1807_v13 = vld [vmem:[#allocation5 + $0x54] sm:$0xf0]  ;;  %v1806_v14 = vld [vmem:[#allocation5 + $0x54] sm:$0xf] }
  0x1b   :  { %342 = vmatpush.bf16.msra.mxu1 %v1603_v7  ;;  %v1584_v15 = vld [vmem:[#allocation5 + $0x58] sm:$0xf0]  ;;  %v1583_v16 = vor.u32 %v1807_v13, %v1582_v12  ;;  %v1574_v18 = vld [vmem:[#allocation5 + $0x40] sm:$0xf]  ;;  %v1805_v19 = vld [vmem:[#allocation5 + $0x44] sm:$0xf0] }
  0x1c   :  { %v1587_v17 = vor.u32 %v1806_v14, %v1584_v15  ;;  %v1804_v20 = vld [vmem:[#allocation5 + $0x44] sm:$0xf]  ;;  %v1576_v21 = vld [vmem:[#allocation5 + $0x48] sm:$0xf0]  ;;  %v1575_v22 = vor.u32 %v1805_v19, %v1574_v18  ;;  %v1566_v24 = vld [vmem:[#allocation5 + $0x30] sm:$0xf] }
  0x1d   :  { %v1579_v23 = vor.u32 %v1804_v20, %v1576_v21  ;;  %v1803_v25 = vld [vmem:[#allocation5 + $0x34] sm:$0xf0]  ;;  %v1802_v26 = vld [vmem:[#allocation5 + $0x34] sm:$0xf]  ;;  %v1568_v27 = vld [vmem:[#allocation5 + $0x38] sm:$0xf0] }
  0x1e   :  { %254 = vmatpush.bf16.msra.mxu0 %v1591_v10  ;;  %v1567_v28 = vor.u32 %v1803_v25, %v1566_v24  ;;  %v1571_v29 = vor.u32 %v1802_v26, %v1568_v27  ;;  %v1558_v30 = vld [vmem:[#allocation5 + $0x20] sm:$0xf]  ;;  %v1801_v31 = vld [vmem:[#allocation5 + $0x24] sm:$0xf0]  ;;  %v1800_v32 = vld [vmem:[#allocation5 + $0x24] sm:$0xf] }
  0x1f   :  { %343 = vmatpush.bf16.msra.mxu1 %v1595_v11  ;;  %v1560_v33 = vld [vmem:[#allocation5 + $0x28] sm:$0xf0]  ;;  %v1559_v34 = vor.u32 %v1801_v31, %v1558_v30  ;;  %v1550_v36 = vld [vmem:[#allocation5 + $0x10] sm:$0xf]  ;;  %v1799_v37 = vld [vmem:[#allocation5 + $0x14] sm:$0xf0] }
  0x20   :  { %v1563_v35 = vor.u32 %v1800_v32, %v1560_v33  ;;  %v1798_v38 = vld [vmem:[#allocation5 + $0x14] sm:$0xf]  ;;  %v1552_v39 = vld [vmem:[#allocation5 + $0x18] sm:$0xf0]  ;;  %v1551_v40 = vor.u32 %v1799_v37, %v1550_v36  ;;  %v1542_v42 = vld [vmem:[#allocation5] sm:$0xf] }
  0x21   :  { %v1555_v41 = vor.u32 %v1798_v38, %v1552_v39  ;;  %v1797_v43 = vld [vmem:[#allocation5 + $0x4] sm:$0xf0]  ;;  %v1796_v44 = vld [vmem:[#allocation5 + $0x4] sm:$0xf]  ;;  %v1544_v45 = vld [vmem:[#allocation5 + $0x8] sm:$0xf0] }
  0x22   :  { %255 = vmatpush.bf16.msra.mxu0 %v1583_v16  ;;  %v1826_v46 = vld [vmem:[#allocation8 + $0x74] sm:$0xf]  ;;  %v1664_v47 = vld [vmem:[#allocation8 + $0x78] sm:$0xf0]  ;;  %v1543_v50 = vor.u32 %v1797_v43, %v1542_v42  ;;  %v104_v52 = vld [vmem:[#allocation2 + $0x8] sm:$0xff]  ;;  %v1547_v53 = vor.u32 %v1796_v44, %v1544_v45  ;;  %s1525_s8 = sshll.u32 %s2466_s7, 4  ;;  %s1526_s8 = int_to_ptr.hbm [resolvable:$true] %s1525_s8 }
  0x23   :  { %344 = vmatpush.bf16.msra.mxu1 %v1587_v17  ;;  %v1842_v48 = vld [vmem:[#allocation8 + $0xf4] sm:$0xf]  ;;  %v1728_v49 = vld [vmem:[#allocation8 + $0xf8] sm:$0xf0]  ;;  %v1667_v54 = vor.u32 %v1826_v46, %v1664_v47  ;;  %v1824_v57 = vld [vmem:[#allocation8 + $0x64] sm:$0xf] }
  0x24   :  { %v103_v51 = vld [vmem:[#allocation2] sm:$0xff]  ;;  %v1731_v55 = vor.u32 %v1842_v48, %v1728_v49  ;;  %v1656_v58 = vld [vmem:[#allocation8 + $0x68] sm:$0xf0]  ;;  %v106_v0 = vld [vmem:[#allocation2 + $0x18] sm:$0xff] }
  0x25   :  { %v135_v56 = vpack.c.bf16 %v104_v52, %v103_v51  ;;  %v1840_v59 = vld [vmem:[#allocation8 + $0xe4] sm:$0xf]  ;;  %v1659_v60 = vor.u32 %v1824_v57, %v1656_v58  ;;  %v1720_v61 = vld [vmem:[#allocation8 + $0xe8] sm:$0xf0]  ;;  %v1822_v5 = vld [vmem:[#allocation8 + $0x54] sm:$0xf] }
  0x26   :  { %256 = vmatpush.bf16.msra.mxu0 %v1575_v22  ;;  %v1723_v62 = vor.u32 %v1840_v59, %v1720_v61  ;;  %v105_v63 = vld [vmem:[#allocation2 + $0x10] sm:$0xff]  ;;  %v107_v2 = vld [vmem:[#allocation2 + $0x20] sm:$0xff]  ;;  %v108_v3 = vld [vmem:[#allocation2 + $0x28] sm:$0xff] }
  0x27   :  { %345 = vmatpush.bf16.msra.mxu1 %v1579_v23  ;;  %v136_v1 = vpack.c.bf16 %v106_v0, %v105_v63  ;;  %v137_v4 = vpack.c.bf16 %v108_v3, %v107_v2  ;;  %v1648_v6 = vld [vmem:[#allocation8 + $0x58] sm:$0xf0]  ;;  %v1838_v7 = vld [vmem:[#allocation8 + $0xd4] sm:$0xf]  ;;  %v112_v15 = vld [vmem:[#allocation2 + $0x48] sm:$0xff] }
  0x28   :  { %v1651_v8 = vor.u32 %v1822_v5, %v1648_v6  ;;  %v1712_v9 = vld [vmem:[#allocation8 + $0xd8] sm:$0xf0]  ;;  %v109_v11 = vld [vmem:[#allocation2 + $0x30] sm:$0xff]  ;;  %v1820_v17 = vld [vmem:[#allocation8 + $0x44] sm:$0xf] }
  0x29   :  { %v1715_v10 = vor.u32 %v1838_v7, %v1712_v9  ;;  %v110_v12 = vld [vmem:[#allocation2 + $0x38] sm:$0xff]  ;;  %v111_v14 = vld [vmem:[#allocation2 + $0x40] sm:$0xff]  ;;  %v1640_v18 = vld [vmem:[#allocation8 + $0x48] sm:$0xf0] }
  0x2a   :  { %257 = vmatpush.bf16.msra.mxu0 %v1567_v28  ;;  %v138_v13 = vpack.c.bf16 %v110_v12, %v109_v11  ;;  %v139_v16 = vpack.c.bf16 %v112_v15, %v111_v14  ;;  %v1836_v19 = vld [vmem:[#allocation8 + $0xc4] sm:$0xf]  ;;  %v1643_v20 = vor.u32 %v1820_v17, %v1640_v18  ;;  %v1704_v21 = vld [vmem:[#allocation8 + $0xc8] sm:$0xf0]  ;;  %v1662_v22 = vld [vmem:[#allocation8 + $0x70] sm:$0xf] }
  0x2b   :  { %346 = vmatpush.bf16.msra.mxu1 %v1571_v29  ;;  %v1827_v23 = vld [vmem:[#allocation8 + $0x74] sm:$0xf0]  ;;  %v1707_v24 = vor.u32 %v1836_v19, %v1704_v21  ;;  %v1726_v26 = vld [vmem:[#allocation8 + $0xf0] sm:$0xf]  ;;  %v1654_v32 = vld [vmem:[#allocation8 + $0x60] sm:$0xf] }
  0x2c   :  { %v1663_v25 = vor.u32 %v1827_v23, %v1662_v22  ;;  %v1843_v27 = vld [vmem:[#allocation8 + $0xf4] sm:$0xf0]  ;;  %v113_v29 = vld [vmem:[#allocation2 + $0x50] sm:$0xff]  ;;  %v1825_v33 = vld [vmem:[#allocation8 + $0x64] sm:$0xf0] }
  0x2d   :  { %v1727_v28 = vor.u32 %v1843_v27, %v1726_v26  ;;  %v114_v30 = vld [vmem:[#allocation2 + $0x58] sm:$0xff]  ;;  %v1841_v36 = vld [vmem:[#allocation8 + $0xe4] sm:$0xf0]  ;;  %v1646_v38 = vld [vmem:[#allocation8 + $0x50] sm:$0xf] }
  0x2e   :  { %258 = vmatpush.bf16.msra.mxu0 %v1559_v34  ;;  %725 = vmatpush.bf16.msra.mxu2 %v1663_v25  ;;  %v140_v31 = vpack.c.bf16 %v114_v30, %v113_v29  ;;  %v1718_v34 = vld [vmem:[#allocation8 + $0xe0] sm:$0xf]  ;;  %v1823_v39 = vld [vmem:[#allocation8 + $0x54] sm:$0xf0]  ;;  %v1821_v45 = vld [vmem:[#allocation8 + $0x44] sm:$0xf0] }
  0x2f   :  { %347 = vmatpush.bf16.msra.mxu1 %v1563_v35  ;;  %814 = vmatpush.bf16.msra.mxu3 %v1727_v28  ;;  %v1655_v35 = vor.u32 %v1825_v33, %v1654_v32  ;;  %v1719_v37 = vor.u32 %v1841_v36, %v1718_v34  ;;  %v1839_v42 = vld [vmem:[#allocation8 + $0xd4] sm:$0xf0]  ;;  %v1638_v44 = vld [vmem:[#allocation8 + $0x40] sm:$0xf]  ;;  %v1837_v47 = vld [vmem:[#allocation8 + $0xc4] sm:$0xf0] }
  0x30   :  { %v1702_v46 = vld [vmem:[#allocation8 + $0xc0] sm:$0xf]  ;;  %v1639_v48 = vor.u32 %v1821_v45, %v1638_v44  ;;  %v116_v51 = vld [vmem:[#allocation2 + $0x68] sm:$0xff]  ;;  %v1630_v52 = vld [vmem:[#allocation8 + $0x30] sm:$0xf] }
  0x31   :  { %v1703_v49 = vor.u32 %v1837_v47, %v1702_v46  ;;  %v1835_v57 = vld [vmem:[#allocation8 + $0xb4] sm:$0xf0]  ;;  %v1622_v59 = vld [vmem:[#allocation8 + $0x20] sm:$0xf]  ;;  %v1833_v63 = vld [vmem:[#allocation8 + $0xa4] sm:$0xf0] }
  0x32   :  { %259 = vmatpush.bf16.msra.mxu0 %v1551_v40  ;;  %v1710_v40 = vld [vmem:[#allocation8 + $0xd0] sm:$0xf]  ;;  %726 = vmatpush.bf16.msra.mxu2 %v1655_v35  ;;  %v1818_v0 = vld [vmem:[#allocation8 + $0x34] sm:$0xf]  ;;  %v1696_v5 = vld [vmem:[#allocation8 + $0xb8] sm:$0xf0] }
  0x33   :  { %348 = vmatpush.bf16.msra.mxu1 %v1555_v41  ;;  %v1647_v41 = vor.u32 %v1823_v39, %v1646_v38  ;;  %815 = vmatpush.bf16.msra.mxu3 %v1719_v37  ;;  %v1711_v43 = vor.u32 %v1839_v42, %v1710_v40  ;;  %v1834_v3 = vld [vmem:[#allocation8 + $0xb4] sm:$0xf]  ;;  %v1614_v7 = vld [vmem:[#allocation8 + $0x10] sm:$0xf]  ;;  %v1831_v11 = vld [vmem:[#allocation8 + $0x94] sm:$0xf0] }
  0x34   :  { %v1699_v6 = vor.u32 %v1834_v3, %v1696_v5  ;;  %v1678_v9 = vld [vmem:[#allocation8 + $0x90] sm:$0xf]  ;;  %v1813_v14 = vld [vmem:[#allocation8 + $0x4] sm:$0xf0]  ;;  %v1670_v15 = vld [vmem:[#allocation8 + $0x80] sm:$0xf] }
  0x35   :  { %v1679_v12 = vor.u32 %v1831_v11, %v1678_v9  ;;  %v1829_v17 = vld [vmem:[#allocation8 + $0x84] sm:$0xf0]  ;;  %v117_v18 = vld [vmem:[#allocation2 + $0x70] sm:$0xff]  ;;  %v118_v19 = vld [vmem:[#allocation2 + $0x78] sm:$0xff] }
  0x36   :  { %260 = vmatpush.bf16.msra.mxu0 %v1543_v50  ;;  %727 = vmatpush.bf16.msra.mxu2 %v1647_v41  ;;  %v115_v50 = vld [vmem:[#allocation2 + $0x60] sm:$0xff]  ;;  %v142_v21 = vpack.c.bf16 %v118_v19, %v117_v18  ;;  %v120_v25 = vld [vmem:[#allocation2 + $0x88] sm:$0xff] }
  0x37   :  { %349 = vmatpush.bf16.msra.mxu1 %v1547_v53  ;;  %816 = vmatpush.bf16.msra.mxu3 %v1711_v43  ;;  %v1819_v53 = vld [vmem:[#allocation8 + $0x34] sm:$0xf0]  ;;  %v167_v27 = vld [vmem:[#allocation7] sm:$0x3]  ;;  %v1816_v32 = vld [vmem:[#allocation8 + $0x24] sm:$0xf] }
  0x38   :  { %v1851_v22 = vld [vmem:[#allocation10 + $0x38] sm:$0xff]  ;;  %v2097_v30 = vperm.slane %v167_v27, 0  ;;  %v1624_v33 = vld [vmem:[#allocation8 + $0x28] sm:$0xf0]  ;;  %v1832_v35 = vld [vmem:[#allocation8 + $0xa4] sm:$0xf] }
  0x39   :  { %261 = vmatmul.bf16.vlgmr.msra.gmra.mxu0 %v135_v56  ;;  %v1859_v23 = vld [vmem:[#allocation10 + $0x78] sm:$0xff]  ;;  %v1627_v34 = vor.u32 %v1816_v32, %v1624_v33  ;;  %v1688_v36 = vld [vmem:[#allocation8 + $0xa8] sm:$0xf0] }
  0x3a   :  { %903 = vmatpush.bf16.msrb.mxu0 %v1667_v54  ;;  %350 = vmatmul.bf16.vlgmr.msra.gmra.mxu1 %v135_v56  ;;  %v1694_v54 = vld [vmem:[#allocation8 + $0xb0] sm:$0xf]  ;;  %v1631_v56 = vor.u32 %v1819_v53, %v1630_v52  ;;  %v1691_v37 = vor.u32 %v1832_v35, %v1688_v36  ;;  %v123_v3 = vld [vmem:[#allocation2 + $0xa0] sm:$0xff]  ;;  %v1857_v36 = vld [vmem:[#allocation10 + $0x68] sm:$0xff] }
  0x3b   :  { %992 = vmatpush.bf16.msrb.mxu1 %v1731_v55  ;;  %728 = vmatpush.bf16.msra.mxu2 %v1639_v48  ;;  %v141_v55 = vpack.c.bf16 %v116_v51, %v115_v50  ;;  %v1695_v58 = vor.u32 %v1835_v57, %v1694_v54  ;;  %v121_v48 = vld [vmem:[#allocation2 + $0x90] sm:$0xff]  ;;  %v1616_v11 = vld [vmem:[#allocation8 + $0x18] sm:$0xf0] }
  0x3c   :  { %817 = vmatpush.bf16.msra.mxu3 %v1703_v49  ;;  %v122_v49 = vld [vmem:[#allocation2 + $0x98] sm:$0xff] }
  0x3d   :  { %v144_v52 = vpack.c.bf16 %v122_v49, %v121_v48  ;;  %v1850_v54 = vld [vmem:[#allocation10 + $0x30] sm:$0xff]  ;;  %v128_v48 = vld [vmem:[#allocation2 + $0xc8] sm:$0xff] }
  0x3e   :  { %904 = vmatpush.bf16.msrb.mxu0 %v1659_v60  ;;  %v1817_v60 = vld [vmem:[#allocation8 + $0x24] sm:$0xf0] }
  0x3f   :  { %993 = vmatpush.bf16.msrb.mxu1 %v1723_v62  ;;  %729 = vmatpush.bf16.msra.mxu2 %v1631_v56  ;;  %v1623_v61 = vor.u32 %v1817_v60, %v1622_v59  ;;  %v1686_v62 = vld [vmem:[#allocation8 + $0xa0] sm:$0xf]  ;;  %v1858_v56 = vld [vmem:[#allocation10 + $0x70] sm:$0xff] }
  0x40   :  { %818 = vmatpush.bf16.msra.mxu3 %v1695_v58  ;;  %v1687_v2 = vor.u32 %v1833_v63, %v1686_v62 }
  0x42   :  { %905 = vmatpush.bf16.msrb.mxu0 %v1651_v8  ;;  %v1815_v8 = vld [vmem:[#allocation8 + $0x14] sm:$0xf0] }
  0x43   :  { %994 = vmatpush.bf16.msrb.mxu1 %v1715_v10  ;;  %730 = vmatpush.bf16.msra.mxu2 %v1623_v61  ;;  %v1615_v10 = vor.u32 %v1815_v8, %v1614_v7 }
  0x44   :  { %819 = vmatpush.bf16.msra.mxu3 %v1687_v2 }
  0x46   :  { %906 = vmatpush.bf16.msrb.mxu0 %v1643_v20  ;;  %v1671_v20 = vor.u32 %v1829_v17, %v1670_v15 }
  0x47   :  { %995 = vmatpush.bf16.msrb.mxu1 %v1707_v24  ;;  %731 = vmatpush.bf16.msra.mxu2 %v1615_v10  ;;  %v119_v24 = vld [vmem:[#allocation2 + $0x80] sm:$0xff]  ;;  %v1814_v10 = vld [vmem:[#allocation8 + $0x14] sm:$0xf] }
  0x48   :  { %820 = vmatpush.bf16.msra.mxu3 %v1679_v12  ;;  %v143_v26 = vpack.c.bf16 %v120_v25, %v119_v24  ;;  %v1619_v12 = vor.u32 %v1814_v10, %v1616_v11  ;;  %v129_v10 = vld [vmem:[#allocation2 + $0xd0] sm:$0xff]  ;;  %v130_v11 = vld [vmem:[#allocation2 + $0xd8] sm:$0xff] }
  0x49   :  { %266 = vmatmul.bf16.gmra.mxu0 %v136_v1 }
  0x4a   :  { %355 = vmatmul.bf16.gmra.mxu1 %v136_v1  ;;  %v1632_v1 = vld [vmem:[#allocation8 + $0x38] sm:$0xf0] }
  0x4b   :  { %996 = vmatpush.bf16.msrb.mxu1 %v1699_v6 }
  0x4c   :  { %821 = vmatpush.bf16.msra.mxu3 %v1671_v20 }
  0x4f   :  { %997 = vmatpush.bf16.msrb.mxu1 %v1691_v37 }
  0x50   :  { %1398 = vmatpush.bf16.msrb.mxu3 %v1859_v23 }
  0x54   :  { %1399 = vmatpush.bf16.msrb.mxu3 %v1858_v56  ;;  %v1812_v56 = vld [vmem:[#allocation8 + $0x4] sm:$0xf] }
  0x58   :  { %1400 = vmatpush.bf16.msrb.mxu3 %v1857_v36 }
  0x59   :  { %271 = vmatmul.bf16.gmra.mxu0 %v137_v4 }
  0x5a   :  { %360 = vmatmul.bf16.gmra.mxu1 %v137_v4  ;;  %v1635_v4 = vor.u32 %v1818_v0, %v1632_v1 }
  0x5c   :  { %907 = vmatpush.bf16.msrb.mxu0 %v1635_v4  ;;  %v124_v4 = vld [vmem:[#allocation2 + $0xa8] sm:$0xff] }
  0x5d   :  { %v145_v7 = vpack.c.bf16 %v124_v4, %v123_v3 }
  0x60   :  { %908 = vmatpush.bf16.msrb.mxu0 %v1627_v34  ;;  %v1849_v34 = vld [vmem:[#allocation10 + $0x28] sm:$0xff] }
  0x64   :  { %909 = vmatpush.bf16.msrb.mxu0 %v1619_v12 }
  0x69   :  { %276 = vmatmul.bf16.gmra.mxu0 %v138_v13 }
  0x6a   :  { %365 = vmatmul.bf16.gmra.mxu1 %v138_v13  ;;  %v1606_v13 = vld [vmem:[#allocation8] sm:$0xf] }
  0x79   :  { %281 = vmatmul.bf16.gmra.mxu0 %v139_v16 }
  0x7a   :  { %370 = vmatmul.bf16.gmra.mxu1 %v139_v16  ;;  %v1607_v16 = vor.u32 %v1813_v14, %v1606_v13  ;;  %v1830_v13 = vld [vmem:[#allocation8 + $0x94] sm:$0xf]  ;;  %v1680_v14 = vld [vmem:[#allocation8 + $0x98] sm:$0xf0] }
  0x7b   :  { %v1683_v15 = vor.u32 %v1830_v13, %v1680_v14  ;;  %v148_v14 = vpack.c.bf16 %v130_v11, %v129_v10 }
  0x7c   :  { %732 = vmatpush.bf16.msra.mxu2 %v1607_v16 }
  0x7d   :  { %998 = vmatpush.bf16.msrb.mxu1 %v1683_v15 }
  0x80   :  { %1309 = vmatpush.bf16.msrb.mxu2 %v1851_v22 }
  0x84   :  { %1310 = vmatpush.bf16.msrb.mxu2 %v1850_v54 }
  0x88   :  { %1311 = vmatpush.bf16.msrb.mxu2 %v1849_v34  ;;  %v132_v34 = vld [vmem:[#allocation2 + $0xe8] sm:$0xff] }
  0x89   :  { %286 = vmatmul.bf16.gmra.mxu0 %v140_v31 }
  0x8a   :  { %375 = vmatmul.bf16.gmra.mxu1 %v140_v31  ;;  %v2099_v31 = vperm.slane %v167_v27, 1  ;;  %v126_v27 = vld [vmem:[#allocation2 + $0xb8] sm:$0xff] }
  0x99   :  { %291 = vmatmul.bf16.gmra.mxu0 %v141_v55 }
  0x9a   :  { %380 = vmatmul.bf16.gmra.mxu1 %v141_v55 }
  0xa9   :  { %296 = vmatmul.bf16.gmra.mxu0 %v142_v21 }
  0xaa   :  { %385 = vmatmul.bf16.gmra.mxu1 %v142_v21 }
  0xb6   :  { %v262_v28 = vpop.f32.mrf.mxu0 }
  0xb7   :  { %v351_v29 = vpop.f32.mrf.mxu1  ;;  %v263_v38 = vadd.f32 %v262_v28, %v2097_v30 }
  0xb8   :  { %v352_v39 = vadd.f32 %v351_v29, %v2099_v31 }
  0xb9   :  { %301 = vmatmul.bf16.gmra.mxu0 %v143_v26  ;;  %v431_v44 = vmax.f32 %v263_v38, 0.0 }
  0xba   :  { %390 = vmatmul.bf16.gmra.mxu1 %v143_v26  ;;  %v432_v46 = vmax.f32 %v352_v39, 0.0  ;;  %v125_v26 = vld [vmem:[#allocation2 + $0xb0] sm:$0xff] }
  0xbb   :  { %v146_v32 = vpack.c.bf16 %v126_v27, %v125_v26 }
  0xbe   :  { %v264_v40 = vpop.f32.mrf.mxu0 }
  0xbf   :  { %v265_v41 = vadd.f32 %v264_v40, %v2097_v30  ;;  %v353_v42 = vpop.f32.mrf.mxu1 }
  0xc0   :  { %v354_v43 = vadd.f32 %v353_v42, %v2099_v31 }
  0xc1   :  { %v433_v45 = vmax.f32 %v265_v41, 0.0 }
  0xc2   :  { %v434_v47 = vmax.f32 %v354_v43, 0.0 }
  0xc3   :  { %v2105_v50 = vpack.c.bf16 %v433_v45, %v431_v44 }
  0xc4   :  { %v2107_v51 = vpack.c.bf16 %v434_v47, %v432_v46  ;;  %v127_v47 = vld [vmem:[#allocation2 + $0xc0] sm:$0xff] }
  0xc5   :  { %733 = vmatmul.bf16.vlgmr.msra.gmra.mxu2 %v2105_v50 }
  0xc6   :  { %822 = vmatmul.bf16.vlgmr.msra.gmra.mxu3 %v2107_v51  ;;  %v267_v53 = vpop.f32.mrf.mxu0 }
  0xc7   :  { %v356_v55 = vpop.f32.mrf.mxu1  ;;  %v268_v57 = vadd.f32 %v267_v53, %v2097_v30  ;;  %v147_v53 = vpack.c.bf16 %v128_v48, %v127_v47 }
  0xc8   :  { %v357_v58 = vadd.f32 %v356_v55, %v2099_v31 }
  0xc9   :  { %306 = vmatmul.bf16.gmra.mxu0 %v144_v52  ;;  %v435_v63 = vmax.f32 %v268_v57, 0.0  ;;  %v1608_v57 = vld [vmem:[#allocation8 + $0x8] sm:$0xf0] }
  0xca   :  { %395 = vmatmul.bf16.gmra.mxu1 %v144_v52  ;;  %v436_v1 = vmax.f32 %v357_v58, 0.0  ;;  %v1611_v58 = vor.u32 %v1812_v56, %v1608_v57 }
  0xcc   :  { %910 = vmatpush.bf16.msrb.mxu0 %v1611_v58 }
  0xce   :  { %v269_v59 = vpop.f32.mrf.mxu0 }
  0xcf   :  { %v270_v60 = vadd.f32 %v269_v59, %v2097_v30  ;;  %v358_v61 = vpop.f32.mrf.mxu1  ;;  %v1828_v59 = vld [vmem:[#allocation8 + $0x84] sm:$0xf] }
  0xd0   :  { %v359_v62 = vadd.f32 %v358_v61, %v2099_v31 }
  0xd1   :  { %v437_v0 = vmax.f32 %v270_v60, 0.0  ;;  %v1672_v60 = vld [vmem:[#allocation8 + $0x88] sm:$0xf0] }
  0xd2   :  { %v438_v2 = vmax.f32 %v359_v62, 0.0  ;;  %v1675_v61 = vor.u32 %v1828_v59, %v1672_v60  ;;  %v1847_v60 = vld [vmem:[#allocation10 + $0x18] sm:$0xff] }
  0xd3   :  { %v2115_v5 = vpack.c.bf16 %v437_v0, %v435_v63 }
  0xd4   :  { %v2117_v6 = vpack.c.bf16 %v438_v2, %v436_v1  ;;  %999 = vmatpush.bf16.msrb.mxu1 %v1675_v61 }
  0xd5   :  { %738 = vmatmul.bf16.gmra.mxu2 %v2115_v5 }
  0xd6   :  { %827 = vmatmul.bf16.gmra.mxu3 %v2117_v6  ;;  %v272_v8 = vpop.f32.mrf.mxu0 }
  0xd7   :  { %v361_v9 = vpop.f32.mrf.mxu1  ;;  %v273_v16 = vadd.f32 %v272_v8, %v2097_v30 }
  0xd8   :  { %v362_v17 = vadd.f32 %v361_v9, %v2099_v31 }
  0xd9   :  { %311 = vmatmul.bf16.gmra.mxu0 %v145_v7  ;;  %v439_v22 = vmax.f32 %v273_v16, 0.0  ;;  %v1848_v16 = vld [vmem:[#allocation10 + $0x20] sm:$0xff] }
  0xda   :  { %400 = vmatmul.bf16.gmra.mxu1 %v145_v7  ;;  %v440_v24 = vmax.f32 %v362_v17, 0.0  ;;  %1312 = vmatpush.bf16.msrb.mxu2 %v1848_v16 }
  0xde   :  { %v274_v18 = vpop.f32.mrf.mxu0  ;;  %1313 = vmatpush.bf16.msrb.mxu2 %v1847_v60 }
  0xdf   :  { %v275_v19 = vadd.f32 %v274_v18, %v2097_v30  ;;  %v363_v20 = vpop.f32.mrf.mxu1  ;;  %v1856_v18 = vld [vmem:[#allocation10 + $0x60] sm:$0xff] }
  0xe0   :  { %v364_v21 = vadd.f32 %v363_v20, %v2099_v31  ;;  %1401 = vmatpush.bf16.msrb.mxu3 %v1856_v18 }
  0xe1   :  { %v441_v23 = vmax.f32 %v275_v19, 0.0 }
  0xe2   :  { %v442_v25 = vmax.f32 %v364_v21, 0.0 }
  0xe3   :  { %v2125_v28 = vpack.c.bf16 %v441_v23, %v439_v22 }
  0xe4   :  { %v2127_v29 = vpack.c.bf16 %v442_v25, %v440_v24 }
  0xe5   :  { %743 = vmatmul.bf16.gmra.mxu2 %v2125_v28 }
  0xe6   :  { %832 = vmatmul.bf16.gmra.mxu3 %v2127_v29  ;;  %v277_v33 = vpop.f32.mrf.mxu0 }
  0xe7   :  { %v366_v35 = vpop.f32.mrf.mxu1  ;;  %v278_v37 = vadd.f32 %v277_v33, %v2097_v30  ;;  %v131_v33 = vld [vmem:[#allocation2 + $0xe0] sm:$0xff] }
  0xe8   :  { %v367_v38 = vadd.f32 %v366_v35, %v2099_v31 }
  0xe9   :  { %316 = vmatmul.bf16.gmra.mxu0 %v146_v32  ;;  %v443_v43 = vmax.f32 %v278_v37, 0.0  ;;  %v149_v37 = vpack.c.bf16 %v132_v34, %v131_v33  ;;  %v1846_v34 = vld [vmem:[#allocation10 + $0x10] sm:$0xff] }
  0xea   :  { %405 = vmatmul.bf16.gmra.mxu1 %v146_v32  ;;  %v444_v45 = vmax.f32 %v367_v38, 0.0  ;;  %1314 = vmatpush.bf16.msrb.mxu2 %v1846_v34 }
  0xee   :  { %v279_v39 = vpop.f32.mrf.mxu0 }
  0xef   :  { %v280_v40 = vadd.f32 %v279_v39, %v2097_v30  ;;  %v368_v41 = vpop.f32.mrf.mxu1 }
  0xf0   :  { %v369_v42 = vadd.f32 %v368_v41, %v2099_v31 }
  0xf1   :  { %v445_v44 = vmax.f32 %v280_v40, 0.0 }
  0xf2   :  { %v446_v46 = vmax.f32 %v369_v42, 0.0 }
  0xf3   :  { %v2135_v49 = vpack.c.bf16 %v445_v44, %v443_v43 }
  0xf4   :  { %v2137_v52 = vpack.c.bf16 %v446_v46, %v444_v45 }
  0xf5   :  { %748 = vmatmul.bf16.gmra.mxu2 %v2135_v49 }
  0xf6   :  { %837 = vmatmul.bf16.gmra.mxu3 %v2137_v52  ;;  %v282_v54 = vpop.f32.mrf.mxu0 }
  0xf7   :  { %v371_v55 = vpop.f32.mrf.mxu1  ;;  %v283_v62 = vadd.f32 %v282_v54, %v2097_v30  ;;  %v133_v54 = vld [vmem:[#allocation2 + $0xf0] sm:$0xff] }
  0xf8   :  { %v372_v63 = vadd.f32 %v371_v55, %v2099_v31  ;;  %v134_v55 = vld [vmem:[#allocation2 + $0xf8] sm:$0xff] }
  0xf9   :  { %321 = vmatmul.bf16.gmra.mxu0 %v147_v53  ;;  %v447_v4 = vmax.f32 %v283_v62, 0.0  ;;  %v150_v58 = vpack.c.bf16 %v134_v55, %v133_v54  ;;  %v1855_v62 = vld [vmem:[#allocation10 + $0x58] sm:$0xff] }
  0xfa   :  { %410 = vmatmul.bf16.gmra.mxu1 %v147_v53  ;;  %v448_v8 = vmax.f32 %v372_v63, 0.0  ;;  %1402 = vmatpush.bf16.msrb.mxu3 %v1855_v62 }
  0xfe   :  { %v284_v0 = vpop.f32.mrf.mxu0 }
  0xff   :  { %v285_v1 = vadd.f32 %v284_v0, %v2097_v30  ;;  %v373_v2 = vpop.f32.mrf.mxu1 }
 0x100   :  { %v374_v3 = vadd.f32 %v373_v2, %v2099_v31 }
 0x101   :  { %v449_v7 = vmax.f32 %v285_v1, 0.0 }
 0x102   :  { %v450_v9 = vmax.f32 %v374_v3, 0.0 }
 0x103   :  { %v2145_v12 = vpack.c.bf16 %v449_v7, %v447_v4 }
 0x104   :  { %v2147_v13 = vpack.c.bf16 %v450_v9, %v448_v8 }
 0x105   :  { %753 = vmatmul.bf16.gmra.mxu2 %v2145_v12 }
 0x106   :  { %842 = vmatmul.bf16.gmra.mxu3 %v2147_v13  ;;  %v287_v15 = vpop.f32.mrf.mxu0 }
 0x107   :  { %v376_v17 = vpop.f32.mrf.mxu1  ;;  %v288_v19 = vadd.f32 %v287_v15, %v2097_v30 }
 0x108   :  { %v377_v20 = vadd.f32 %v376_v17, %v2099_v31 }
 0x109   :  { %326 = vmatmul.bf16.gmra.mxu0 %v148_v14  ;;  %v451_v25 = vmax.f32 %v288_v19, 0.0 }
 0x10a   :  { %415 = vmatmul.bf16.gmra.mxu1 %v148_v14  ;;  %v452_v27 = vmax.f32 %v377_v20, 0.0 }
 0x10e   :  { %v289_v21 = vpop.f32.mrf.mxu0 }
 0x10f   :  { %v290_v22 = vadd.f32 %v289_v21, %v2097_v30  ;;  %v378_v23 = vpop.f32.mrf.mxu1 }
 0x110   :  { %v379_v24 = vadd.f32 %v378_v23, %v2099_v31 }
 0x111   :  { %v453_v26 = vmax.f32 %v290_v22, 0.0 }
 0x112   :  { %v454_v32 = vmax.f32 %v379_v24, 0.0 }
 0x113   :  { %v2155_v35 = vpack.c.bf16 %v453_v26, %v451_v25 }
 0x114   :  { %v2157_v36 = vpack.c.bf16 %v454_v32, %v452_v27 }
 0x115   :  { %758 = vmatmul.bf16.gmra.mxu2 %v2155_v35 }
 0x116   :  { %847 = vmatmul.bf16.gmra.mxu3 %v2157_v36  ;;  %v292_v38 = vpop.f32.mrf.mxu0 }
 0x117   :  { %v381_v39 = vpop.f32.mrf.mxu1  ;;  %v293_v40 = vadd.f32 %v292_v38, %v2097_v30 }
 0x118   :  { %v382_v41 = vadd.f32 %v381_v39, %v2099_v31 }
 0x119   :  { %331 = vmatmul.bf16.gmra.mxu0 %v149_v37  ;;  %v455_v46 = vmax.f32 %v293_v40, 0.0 }
 0x11a   :  { %420 = vmatmul.bf16.gmra.mxu1 %v149_v37  ;;  %v456_v48 = vmax.f32 %v382_v41, 0.0  ;;  %v1854_v41 = vld [vmem:[#allocation10 + $0x50] sm:$0xff] }
 0x11b   :  { %1403 = vmatpush.bf16.msrb.mxu3 %v1854_v41 }
 0x11e   :  { %v294_v42 = vpop.f32.mrf.mxu0 }
 0x11f   :  { %v295_v43 = vadd.f32 %v294_v42, %v2097_v30  ;;  %v383_v44 = vpop.f32.mrf.mxu1 }
 0x120   :  { %v384_v45 = vadd.f32 %v383_v44, %v2099_v31 }
 0x121   :  { %v457_v47 = vmax.f32 %v295_v43, 0.0 }
 0x122   :  { %v458_v53 = vmax.f32 %v384_v45, 0.0 }
 0x123   :  { %v2165_v56 = vpack.c.bf16 %v457_v47, %v455_v46 }
 0x124   :  { %v2167_v57 = vpack.c.bf16 %v458_v53, %v456_v48 }
 0x125   :  { %763 = vmatmul.bf16.gmra.mxu2 %v2165_v56 }
 0x126   :  { %852 = vmatmul.bf16.gmra.mxu3 %v2167_v57  ;;  %v297_v59 = vpop.f32.mrf.mxu0 }
 0x127   :  { %v386_v61 = vpop.f32.mrf.mxu1  ;;  %v298_v63 = vadd.f32 %v297_v59, %v2097_v30 }
 0x128   :  { %v387_v0 = vadd.f32 %v386_v61, %v2099_v31 }
 0x129   :  { %336 = vmatmul.bf16.gmra.mxu0 %v150_v58  ;;  %v459_v7 = vmax.f32 %v298_v63, 0.0 }
 0x12a   :  { %425 = vmatmul.bf16.gmra.mxu1 %v150_v58  ;;  %v460_v9 = vmax.f32 %v387_v0, 0.0 }
 0x12e   :  { %v299_v1 = vpop.f32.mrf.mxu0 }
 0x12f   :  { %v300_v2 = vadd.f32 %v299_v1, %v2097_v30  ;;  %v388_v3 = vpop.f32.mrf.mxu1 }
 0x130   :  { %v389_v4 = vadd.f32 %v388_v3, %v2099_v31 }
 0x131   :  { %v461_v8 = vmax.f32 %v300_v2, 0.0 }
 0x132   :  { %v462_v10 = vmax.f32 %v389_v4, 0.0 }
 0x133   :  { %v2175_v11 = vpack.c.bf16 %v461_v8, %v459_v7 }
 0x134   :  { %v2177_v14 = vpack.c.bf16 %v462_v10, %v460_v9 }
 0x135   :  { %768 = vmatmul.bf16.gmra.mxu2 %v2175_v11 }
 0x136   :  { %857 = vmatmul.bf16.gmra.mxu3 %v2177_v14  ;;  %v302_v15 = vpop.f32.mrf.mxu0 }
 0x137   :  { %v391_v16 = vpop.f32.mrf.mxu1  ;;  %v303_v17 = vadd.f32 %v302_v15, %v2097_v30 }
 0x138   :  { %v392_v18 = vadd.f32 %v391_v16, %v2099_v31 }
 0x139   :  { %911 = vmatmul.bf16.vlgmr.msrb.gmra.mxu0 %v2105_v50  ;;  %v463_v23 = vmax.f32 %v303_v17, 0.0  ;;  %v2190_v50 = vld [vmem:[%s2463_s4] sm:$0x3] }
 0x13a   :  { %1000 = vmatmul.bf16.vlgmr.msrb.gmra.mxu1 %v2107_v51  ;;  %v464_v25 = vmax.f32 %v392_v18, 0.0  ;;  %v2198_v32 = vperm.slane %v2190_v50, 0 }
 0x13e   :  { %v304_v19 = vpop.f32.mrf.mxu0 }
 0x13f   :  { %v305_v20 = vadd.f32 %v304_v19, %v2097_v30  ;;  %v393_v21 = vpop.f32.mrf.mxu1 }
 0x140   :  { %v394_v22 = vadd.f32 %v393_v21, %v2099_v31 }
 0x141   :  { %v465_v24 = vmax.f32 %v305_v20, 0.0 }
 0x142   :  { %v466_v26 = vmax.f32 %v394_v22, 0.0 }
 0x143   :  { %v2192_v51 = vpack.c.bf16 %v465_v24, %v463_v23 }
 0x144   :  { %v2194_v27 = vpack.c.bf16 %v466_v26, %v464_v25 }
 0x145   :  { %773 = vmatmul.bf16.gmra.mxu2 %v2192_v51 }
 0x146   :  { %862 = vmatmul.bf16.gmra.mxu3 %v2194_v27  ;;  %v307_v33 = vpop.f32.mrf.mxu0 }
 0x147   :  { %v396_v37 = vpop.f32.mrf.mxu1  ;;  %v308_v43 = vadd.f32 %v307_v33, %v2097_v30 }
 0x148   :  { %v734_v38 = vpop.f32.mrf.mxu2  ;;  %v397_v44 = vadd.f32 %v396_v37, %v2099_v31 }
 0x149   :  { %v735_v39 = vadd.f32 %v734_v38, %v2198_v32  ;;  %v823_v40 = vpop.f32.mrf.mxu3  ;;  %916 = vmatmul.bf16.gmra.mxu0 %v2115_v5  ;;  %v467_v54 = vmax.f32 %v308_v43, 0.0 }
 0x14a   :  { %1005 = vmatmul.bf16.gmra.mxu1 %v2117_v6  ;;  %v468_v6 = vmax.f32 %v397_v44, 0.0 }
 0x14b   :  { %v824_v42 = vadd.f32 %v823_v40, %v735_v39  ;;  %v1845_v39 = vld [vmem:[#allocation10 + $0x8] sm:$0xff] }
 0x14c   :  { %1315 = vmatpush.bf16.msrb.mxu2 %v1845_v39 }
 0x14d   :  { %v1081_v63 = vmax.f32 %v824_v42, 0.0 }
 0x14e   :  { %v309_v45 = vpop.f32.mrf.mxu0 }
 0x14f   :  { %v310_v46 = vadd.f32 %v309_v45, %v2097_v30  ;;  %v398_v47 = vpop.f32.mrf.mxu1  ;;  %v1853_v45 = vld [vmem:[#allocation10 + $0x48] sm:$0xff] }
 0x150   :  { %v399_v48 = vadd.f32 %v398_v47, %v2099_v31  ;;  %v736_v53 = vpop.f32.mrf.mxu2  ;;  %1404 = vmatpush.bf16.msrb.mxu3 %v1853_v45  ;;  %v1844_v45 = vld [vmem:[#allocation10] sm:$0xff] }
 0x151   :  { %v469_v55 = vmax.f32 %v310_v46, 0.0  ;;  %v737_v5 = vadd.f32 %v736_v53, %v2198_v32  ;;  %v825_v58 = vpop.f32.mrf.mxu3  ;;  %1316 = vmatpush.bf16.msrb.mxu2 %v1844_v45 }
 0x152   :  { %v470_v59 = vmax.f32 %v399_v48, 0.0 }
 0x153   :  { %v826_v60 = vadd.f32 %v825_v58, %v737_v5  ;;  %v2209_v61 = vpack.c.bf16 %v469_v55, %v467_v54 }
 0x154   :  { %v2211_v62 = vpack.c.bf16 %v470_v59, %v468_v6 }
 0x155   :  { %v1083_v0 = vmax.f32 %v826_v60, 0.0  ;;  %778 = vmatmul.bf16.gmra.mxu2 %v2209_v61 }
 0x156   :  { %867 = vmatmul.bf16.gmra.mxu3 %v2211_v62  ;;  %v312_v1 = vpop.f32.mrf.mxu0 }
 0x157   :  { %v2215_v2 = vpack.c.bf16 %v1083_v0, %v1081_v63  ;;  %v401_v3 = vpop.f32.mrf.mxu1  ;;  %v313_v10 = vadd.f32 %v312_v1, %v2097_v30 }
 0x158   :  { %v739_v4 = vpop.f32.mrf.mxu2  ;;  %v402_v15 = vadd.f32 %v401_v3, %v2099_v31 }
 0x159   :  { %v740_v7 = vadd.f32 %v739_v4, %v2198_v32  ;;  %v828_v8 = vpop.f32.mrf.mxu3  ;;  %921 = vmatmul.bf16.gmra.mxu0 %v2125_v28  ;;  %v471_v21 = vmax.f32 %v313_v10, 0.0 }
 0x15a   :  { %1010 = vmatmul.bf16.gmra.mxu1 %v2127_v29  ;;  %v472_v28 = vmax.f32 %v402_v15, 0.0 }
 0x15b   :  { %v829_v9 = vadd.f32 %v828_v8, %v740_v7 }
 0x15d   :  { %v1085_v34 = vmax.f32 %v829_v9, 0.0 }
 0x15e   :  { %v314_v16 = vpop.f32.mrf.mxu0 }
 0x15f   :  { %v315_v17 = vadd.f32 %v314_v16, %v2097_v30  ;;  %v403_v18 = vpop.f32.mrf.mxu1 }
 0x160   :  { %v404_v19 = vadd.f32 %v403_v18, %v2099_v31  ;;  %v741_v20 = vpop.f32.mrf.mxu2 }
 0x161   :  { %v473_v22 = vmax.f32 %v315_v17, 0.0  ;;  %v742_v23 = vadd.f32 %v741_v20, %v2198_v32  ;;  %v830_v24 = vpop.f32.mrf.mxu3 }
 0x162   :  { %v474_v25 = vmax.f32 %v404_v19, 0.0 }
 0x163   :  { %v831_v29 = vadd.f32 %v830_v24, %v742_v23  ;;  %v2225_v26 = vpack.c.bf16 %v473_v22, %v471_v21 }
 0x164   :  { %v2227_v33 = vpack.c.bf16 %v474_v25, %v472_v28 }
 0x165   :  { %v1087_v37 = vmax.f32 %v831_v29, 0.0  ;;  %783 = vmatmul.bf16.gmra.mxu2 %v2225_v26 }
 0x166   :  { %872 = vmatmul.bf16.gmra.mxu3 %v2227_v33  ;;  %v317_v38 = vpop.f32.mrf.mxu0 }
 0x167   :  { %v406_v40 = vpop.f32.mrf.mxu1  ;;  %v2231_v41 = vpack.c.bf16 %v1087_v37, %v1085_v34  ;;  %v318_v47 = vadd.f32 %v317_v38, %v2097_v30 }
 0x168   :  { %v744_v42 = vpop.f32.mrf.mxu2  ;;  %v407_v48 = vadd.f32 %v406_v40, %v2099_v31 }
 0x169   :  { %v745_v43 = vadd.f32 %v744_v42, %v2198_v32  ;;  %v833_v44 = vpop.f32.mrf.mxu3  ;;  %926 = vmatmul.bf16.gmra.mxu0 %v2135_v49  ;;  %v475_v6 = vmax.f32 %v318_v47, 0.0 }
 0x16a   :  { %1015 = vmatmul.bf16.gmra.mxu1 %v2137_v52  ;;  %v476_v52 = vmax.f32 %v407_v48, 0.0 }
 0x16b   :  { %v834_v46 = vadd.f32 %v833_v44, %v745_v43 }
 0x16d   :  { %v1089_v4 = vmax.f32 %v834_v46, 0.0 }
 0x16e   :  { %v319_v53 = vpop.f32.mrf.mxu0 }
 0x16f   :  { %v320_v54 = vadd.f32 %v319_v53, %v2097_v30  ;;  %v408_v55 = vpop.f32.mrf.mxu1 }
 0x170   :  { %v409_v5 = vadd.f32 %v408_v55, %v2099_v31  ;;  %v746_v58 = vpop.f32.mrf.mxu2  ;;  %v1852_v55 = vld [vmem:[#allocation10 + $0x40] sm:$0xff] }
 0x171   :  { %v477_v59 = vmax.f32 %v320_v54, 0.0  ;;  %v747_v49 = vadd.f32 %v746_v58, %v2198_v32  ;;  %v835_v60 = vpop.f32.mrf.mxu3  ;;  %1405 = vmatpush.bf16.msrb.mxu3 %v1852_v55 }
 0x172   :  { %v478_v63 = vmax.f32 %v409_v5, 0.0 }
 0x173   :  { %v836_v0 = vadd.f32 %v835_v60, %v747_v49  ;;  %v2241_v1 = vpack.c.bf16 %v477_v59, %v475_v6 }
 0x174   :  { %v2243_v3 = vpack.c.bf16 %v478_v63, %v476_v52 }
 0x175   :  { %v1091_v7 = vmax.f32 %v836_v0, 0.0  ;;  %788 = vmatmul.bf16.gmra.mxu2 %v2241_v1 }
 0x176   :  { %877 = vmatmul.bf16.gmra.mxu3 %v2243_v3  ;;  %v322_v8 = vpop.f32.mrf.mxu0 }
 0x177   :  { %v411_v9 = vpop.f32.mrf.mxu1  ;;  %v2247_v10 = vpack.c.bf16 %v1091_v7, %v1089_v4  ;;  %v323_v19 = vadd.f32 %v322_v8, %v2097_v30 }
 0x178   :  { %v749_v15 = vpop.f32.mrf.mxu2  ;;  %v412_v20 = vadd.f32 %v411_v9, %v2099_v31 }
 0x179   :  { %v750_v16 = vadd.f32 %v749_v15, %v2198_v32  ;;  %v838_v17 = vpop.f32.mrf.mxu3  ;;  %931 = vmatmul.bf16.gmra.mxu0 %v2145_v12  ;;  %v479_v25 = vmax.f32 %v323_v19, 0.0 }
 0x17a   :  { %1020 = vmatmul.bf16.gmra.mxu1 %v2147_v13  ;;  %v480_v12 = vmax.f32 %v412_v20, 0.0 }
 0x17b   :  { %v839_v18 = vadd.f32 %v838_v17, %v750_v16 }
 0x17d   :  { %v1093_v42 = vmax.f32 %v839_v18, 0.0 }
 0x17e   :  { %v324_v21 = vpop.f32.mrf.mxu0 }
 0x17f   :  { %v325_v22 = vadd.f32 %v324_v21, %v2097_v30  ;;  %v413_v23 = vpop.f32.mrf.mxu1 }
 0x180   :  { %v414_v24 = vadd.f32 %v413_v23, %v2099_v31  ;;  %v751_v28 = vpop.f32.mrf.mxu2 }
 0x181   :  { %v481_v29 = vmax.f32 %v325_v22, 0.0  ;;  %v752_v34 = vadd.f32 %v751_v28, %v2198_v32  ;;  %v840_v37 = vpop.f32.mrf.mxu3 }
 0x182   :  { %v482_v38 = vmax.f32 %v414_v24, 0.0 }
 0x183   :  { %v841_v13 = vadd.f32 %v840_v37, %v752_v34  ;;  %v2257_v39 = vpack.c.bf16 %v481_v29, %v479_v25 }
 0x184   :  { %v2259_v40 = vpack.c.bf16 %v482_v38, %v480_v12 }
 0x185   :  { %v1095_v43 = vmax.f32 %v841_v13, 0.0  ;;  %793 = vmatmul.bf16.gmra.mxu2 %v2257_v39 }
 0x186   :  { %882 = vmatmul.bf16.gmra.mxu3 %v2259_v40  ;;  %v327_v44 = vpop.f32.mrf.mxu0 }
 0x187   :  { %v416_v46 = vpop.f32.mrf.mxu1  ;;  %v2263_v47 = vpack.c.bf16 %v1095_v43, %v1093_v42  ;;  %v328_v58 = vadd.f32 %v327_v44, %v2097_v30 }
 0x188   :  { %v754_v48 = vpop.f32.mrf.mxu2  ;;  %v417_v6 = vadd.f32 %v416_v46, %v2099_v31 }
 0x189   :  { %v755_v53 = vadd.f32 %v754_v48, %v2198_v32  ;;  %v843_v54 = vpop.f32.mrf.mxu3  ;;  %936 = vmatmul.bf16.gmra.mxu0 %v2155_v35  ;;  %v483_v0 = vmax.f32 %v328_v58, 0.0 }
 0x18a   :  { %1025 = vmatmul.bf16.gmra.mxu1 %v2157_v36  ;;  %v484_v36 = vmax.f32 %v417_v6, 0.0 }
 0x18b   :  { %v844_v5 = vadd.f32 %v843_v54, %v755_v53 }
 0x18d   :  { %v1097_v17 = vmax.f32 %v844_v5, 0.0 }
 0x18e   :  { %v329_v59 = vpop.f32.mrf.mxu0 }
 0x18f   :  { %v330_v49 = vadd.f32 %v329_v59, %v2097_v30  ;;  %v418_v60 = vpop.f32.mrf.mxu1 }
 0x190   :  { %v419_v52 = vadd.f32 %v418_v60, %v2099_v31  ;;  %v756_v63 = vpop.f32.mrf.mxu2 }
 0x191   :  { %v485_v4 = vmax.f32 %v330_v49, 0.0  ;;  %v757_v35 = vadd.f32 %v756_v63, %v2198_v32  ;;  %v845_v7 = vpop.f32.mrf.mxu3 }
 0x192   :  { %v486_v8 = vmax.f32 %v419_v52, 0.0 }
 0x193   :  { %v846_v9 = vadd.f32 %v845_v7, %v757_v35  ;;  %v2273_v15 = vpack.c.bf16 %v485_v4, %v483_v0 }
 0x194   :  { %v2275_v16 = vpack.c.bf16 %v486_v8, %v484_v36 }
 0x195   :  { %v1099_v18 = vmax.f32 %v846_v9, 0.0  ;;  %798 = vmatmul.bf16.gmra.mxu2 %v2273_v15 }
 0x196   :  { %887 = vmatmul.bf16.gmra.mxu3 %v2275_v16  ;;  %v332_v19 = vpop.f32.mrf.mxu0 }
 0x197   :  { %v421_v20 = vpop.f32.mrf.mxu1  ;;  %v2279_v21 = vpack.c.bf16 %v1099_v18, %v1097_v17  ;;  %v333_v25 = vadd.f32 %v332_v19, %v2097_v30 }
 0x198   :  { %v759_v22 = vpop.f32.mrf.mxu2  ;;  %v422_v29 = vadd.f32 %v421_v20, %v2099_v31 }
 0x199   :  { %v760_v23 = vadd.f32 %v759_v22, %v2198_v32  ;;  %v848_v24 = vpop.f32.mrf.mxu3  ;;  %941 = vmatmul.bf16.gmra.mxu0 %v2165_v56  ;;  %v487_v42 = vmax.f32 %v333_v25, 0.0 }
 0x19a   :  { %1030 = vmatmul.bf16.gmra.mxu1 %v2167_v57  ;;  %v488_v56 = vmax.f32 %v422_v29, 0.0 }
 0x19b   :  { %v849_v28 = vadd.f32 %v848_v24, %v760_v23 }
 0x19d   :  { %v1101_v54 = vmax.f32 %v849_v28, 0.0 }
 0x19e   :  { %v334_v34 = vpop.f32.mrf.mxu0 }
 0x19f   :  { %v335_v37 = vadd.f32 %v334_v34, %v2097_v30  ;;  %v423_v12 = vpop.f32.mrf.mxu1 }
 0x1a0   :  { %v424_v38 = vadd.f32 %v423_v12, %v2099_v31  ;;  %v761_v13 = vpop.f32.mrf.mxu2 }
 0x1a1   :  { %v489_v43 = vmax.f32 %v335_v37, 0.0  ;;  %v762_v44 = vadd.f32 %v761_v13, %v2198_v32  ;;  %v850_v45 = vpop.f32.mrf.mxu3 }
 0x1a2   :  { %v490_v46 = vmax.f32 %v424_v38, 0.0 }
 0x1a3   :  { %v851_v57 = vadd.f32 %v850_v45, %v762_v44  ;;  %v2289_v48 = vpack.c.bf16 %v489_v43, %v487_v42 }
 0x1a4   :  { %v2291_v53 = vpack.c.bf16 %v490_v46, %v488_v56 }
 0x1a5   :  { %v1103_v55 = vmax.f32 %v851_v57, 0.0  ;;  %803 = vmatmul.bf16.gmra.mxu2 %v2289_v48 }
 0x1a6   :  { %892 = vmatmul.bf16.gmra.mxu3 %v2291_v53  ;;  %v337_v5 = vpop.f32.mrf.mxu0 }
 0x1a7   :  { %v426_v58 = vpop.f32.mrf.mxu1  ;;  %v2295_v6 = vpack.c.bf16 %v1103_v55, %v1101_v54  ;;  %v338_v63 = vadd.f32 %v337_v5, %v2097_v30 }
 0x1a8   :  { %v764_v59 = vpop.f32.mrf.mxu2  ;;  %v427_v0 = vadd.f32 %v426_v58, %v2099_v31 }
 0x1a9   :  { %v765_v49 = vadd.f32 %v764_v59, %v2198_v32  ;;  %v853_v60 = vpop.f32.mrf.mxu3  ;;  %946 = vmatmul.bf16.gmra.mxu0 %v2175_v11  ;;  %v491_v9 = vmax.f32 %v338_v63, 0.0 }
 0x1aa   :  { %1035 = vmatmul.bf16.gmra.mxu1 %v2177_v14  ;;  %v492_v11 = vmax.f32 %v427_v0, 0.0 }
 0x1ab   :  { %v854_v52 = vadd.f32 %v853_v60, %v765_v49 }
 0x1ad   :  { %v1105_v24 = vmax.f32 %v854_v52, 0.0 }
 0x1ae   :  { %v339_v4 = vpop.f32.mrf.mxu0 }
 0x1af   :  { %v340_v35 = vadd.f32 %v339_v4, %v2097_v30  ;;  %v428_v7 = vpop.f32.mrf.mxu1 }
 0x1b0   :  { %v429_v36 = vadd.f32 %v428_v7, %v2099_v31  ;;  %v766_v8 = vpop.f32.mrf.mxu2  ;;  %v2312_v31 = vperm.slane %v2190_v50, 1 }
 0x1b1   :  { %v493_v17 = vmax.f32 %v340_v35, 0.0  ;;  %v767_v18 = vadd.f32 %v766_v8, %v2198_v32  ;;  %v855_v19 = vpop.f32.mrf.mxu3 }
 0x1b2   :  { %v494_v20 = vmax.f32 %v429_v36, 0.0 }
 0x1b3   :  { %v856_v14 = vadd.f32 %v855_v19, %v767_v18  ;;  %v2305_v22 = vpack.c.bf16 %v493_v17, %v491_v9 }
 0x1b4   :  { %v2307_v23 = vpack.c.bf16 %v494_v20, %v492_v11 }
 0x1b5   :  { %v1107_v28 = vmax.f32 %v856_v14, 0.0  ;;  %808 = vmatmul.bf16.gmra.mxu2 %v2305_v22 }
 0x1b6   :  { %897 = vmatmul.bf16.gmra.mxu3 %v2307_v23  ;;  %v912_v30 = vpop.f32.mrf.mxu0 }
 0x1b7   :  { %v1001_v25 = vpop.f32.mrf.mxu1  ;;  %v2314_v29 = vpack.c.bf16 %v1107_v28, %v1105_v24  ;;  %v913_v38 = vadd.f32 %v912_v30, %v2312_v31 }
 0x1b8   :  { %v769_v34 = vpop.f32.mrf.mxu2 }
 0x1b9   :  { %v770_v37 = vadd.f32 %v769_v34, %v2198_v32  ;;  %v858_v12 = vpop.f32.mrf.mxu3  ;;  %951 = vmatmul.bf16.gmra.mxu0 %v2192_v51  ;;  %v1002_v43 = vadd.f32 %v1001_v25, %v913_v38 }
 0x1ba   :  { %1040 = vmatmul.bf16.gmra.mxu1 %v2194_v27 }
 0x1bb   :  { %v859_v13 = vadd.f32 %v858_v12, %v770_v37  ;;  %v1082_v54 = vmax.f32 %v1002_v43, 0.0 }
 0x1bd   :  { %v1109_v58 = vmax.f32 %v859_v13, 0.0 }
 0x1be   :  { %v914_v42 = vpop.f32.mrf.mxu0 }
 0x1bf   :  { %v915_v44 = vadd.f32 %v914_v42, %v2312_v31  ;;  %v1003_v50 = vpop.f32.mrf.mxu1 }
 0x1c0   :  { %v771_v45 = vpop.f32.mrf.mxu2 }
 0x1c1   :  { %v1004_v56 = vadd.f32 %v1003_v50, %v915_v44  ;;  %v772_v46 = vadd.f32 %v771_v45, %v2198_v32  ;;  %v860_v57 = vpop.f32.mrf.mxu3 }
 0x1c3   :  { %v1084_v55 = vmax.f32 %v1004_v56, 0.0  ;;  %v861_v5 = vadd.f32 %v860_v57, %v772_v46 }
 0x1c5   :  { %v1146_v51 = vpack.c.bf16 %v1084_v55, %v1082_v54  ;;  %v1111_v59 = vmax.f32 %v861_v5, 0.0  ;;  %1317 = vmatmul.bf16.vlgmr.msrb.gmra.mxu2 %v2215_v2 }
 0x1c6   :  { %v917_v27 = vpop.f32.mrf.mxu0 }
 0x1c7   :  { %v1006_v49 = vpop.f32.mrf.mxu1  ;;  %1406 = vmatmul.bf16.vlgmr.msrb.gmra.mxu3 %v1146_v51  ;;  %v2323_v60 = vpack.c.bf16 %v1111_v59, %v1109_v58  ;;  %v918_v4 = vadd.f32 %v917_v27, %v2312_v31 }
 0x1c8   :  { %v774_v52 = vpop.f32.mrf.mxu2 }
 0x1c9   :  { %v775_v63 = vadd.f32 %v774_v52, %v2198_v32  ;;  %v863_v0 = vpop.f32.mrf.mxu3  ;;  %956 = vmatmul.bf16.gmra.mxu0 %v2209_v61  ;;  %v1007_v36 = vadd.f32 %v1006_v49, %v918_v4 }
 0x1ca   :  { %1045 = vmatmul.bf16.gmra.mxu1 %v2211_v62 }
 0x1cb   :  { %v864_v35 = vadd.f32 %v863_v0, %v775_v63  ;;  %v1086_v11 = vmax.f32 %v1007_v36, 0.0 }
 0x1cd   :  { %v1113_v24 = vmax.f32 %v864_v35, 0.0 }
 0x1ce   :  { %v919_v7 = vpop.f32.mrf.mxu0 }
 0x1cf   :  { %v920_v2 = vadd.f32 %v919_v7, %v2312_v31  ;;  %v1008_v8 = vpop.f32.mrf.mxu1 }
 0x1d0   :  { %v776_v9 = vpop.f32.mrf.mxu2 }
 0x1d1   :  { %v1009_v17 = vadd.f32 %v1008_v8, %v920_v2  ;;  %v777_v18 = vadd.f32 %v776_v9, %v2198_v32  ;;  %v865_v19 = vpop.f32.mrf.mxu3 }
 0x1d3   :  { %v1088_v20 = vmax.f32 %v1009_v17, 0.0  ;;  %v866_v14 = vadd.f32 %v865_v19, %v777_v18 }
 0x1d5   :  { %v1115_v61 = vmax.f32 %v866_v14, 0.0  ;;  %1322 = vmatmul.bf16.gmra.mxu2 %v2231_v41  ;;  %v1148_v62 = vpack.c.bf16 %v1088_v20, %v1086_v11 }
 0x1d6   :  { %v922_v28 = vpop.f32.mrf.mxu0 }
 0x1d7   :  { %v1011_v30 = vpop.f32.mrf.mxu1  ;;  %1411 = vmatmul.bf16.gmra.mxu3 %v1148_v62  ;;  %v2332_v25 = vpack.c.bf16 %v1115_v61, %v1113_v24  ;;  %v923_v38 = vadd.f32 %v922_v28, %v2312_v31 }
 0x1d8   :  { %v779_v34 = vpop.f32.mrf.mxu2 }
 0x1d9   :  { %v780_v37 = vadd.f32 %v779_v34, %v2198_v32  ;;  %v868_v12 = vpop.f32.mrf.mxu3  ;;  %961 = vmatmul.bf16.gmra.mxu0 %v2225_v26  ;;  %v1012_v43 = vadd.f32 %v1011_v30, %v923_v38 }
 0x1da   :  { %1050 = vmatmul.bf16.gmra.mxu1 %v2227_v33 }
 0x1db   :  { %v869_v13 = vadd.f32 %v868_v12, %v780_v37  ;;  %v1090_v57 = vmax.f32 %v1012_v43, 0.0 }
 0x1dd   :  { %v1117_v5 = vmax.f32 %v869_v13, 0.0 }
 0x1de   :  { %v924_v42 = vpop.f32.mrf.mxu0 }
 0x1df   :  { %v925_v41 = vadd.f32 %v924_v42, %v2312_v31  ;;  %v1013_v44 = vpop.f32.mrf.mxu1 }
 0x1e0   :  { %v781_v50 = vpop.f32.mrf.mxu2 }
 0x1e1   :  { %v1014_v45 = vadd.f32 %v1013_v44, %v925_v41  ;;  %v782_v56 = vadd.f32 %v781_v50, %v2198_v32  ;;  %v870_v46 = vpop.f32.mrf.mxu3 }
 0x1e3   :  { %v1092_v54 = vmax.f32 %v1014_v45, 0.0  ;;  %v871_v55 = vadd.f32 %v870_v46, %v782_v56 }
 0x1e5   :  { %v1119_v26 = vmax.f32 %v871_v55, 0.0  ;;  %1327 = vmatmul.bf16.gmra.mxu2 %v2247_v10  ;;  %v1150_v33 = vpack.c.bf16 %v1092_v54, %v1090_v57 }
 0x1e6   :  { %v927_v58 = vpop.f32.mrf.mxu0 }
 0x1e7   :  { %v1016_v51 = vpop.f32.mrf.mxu1  ;;  %1416 = vmatmul.bf16.gmra.mxu3 %v1150_v33  ;;  %v2341_v59 = vpack.c.bf16 %v1119_v26, %v1117_v5  ;;  %v928_v63 = vadd.f32 %v927_v58, %v2312_v31 }
 0x1e8   :  { %v784_v27 = vpop.f32.mrf.mxu2 }
 0x1e9   :  { %v785_v49 = vadd.f32 %v784_v27, %v2198_v32  ;;  %v873_v52 = vpop.f32.mrf.mxu3  ;;  %966 = vmatmul.bf16.gmra.mxu0 %v2241_v1  ;;  %v1017_v35 = vadd.f32 %v1016_v51, %v928_v63 }
 0x1ea   :  { %1055 = vmatmul.bf16.gmra.mxu1 %v2243_v3 }
 0x1eb   :  { %v874_v0 = vadd.f32 %v873_v52, %v785_v49  ;;  %v1094_v17 = vmax.f32 %v1017_v35, 0.0 }
 0x1ed   :  { %v1121_v11 = vmax.f32 %v874_v0, 0.0 }
 0x1ee   :  { %v929_v4 = vpop.f32.mrf.mxu0 }
 0x1ef   :  { %v930_v10 = vadd.f32 %v929_v4, %v2312_v31  ;;  %v1018_v7 = vpop.f32.mrf.mxu1 }
 0x1f0   :  { %v786_v36 = vpop.f32.mrf.mxu2 }
 0x1f1   :  { %v1019_v2 = vadd.f32 %v1018_v7, %v930_v10  ;;  %v787_v8 = vadd.f32 %v786_v36, %v2198_v32  ;;  %v875_v9 = vpop.f32.mrf.mxu3 }
 0x1f3   :  { %v1096_v18 = vmax.f32 %v1019_v2, 0.0  ;;  %v876_v19 = vadd.f32 %v875_v9, %v787_v8 }
 0x1f5   :  { %v1123_v1 = vmax.f32 %v876_v19, 0.0  ;;  %1332 = vmatmul.bf16.gmra.mxu2 %v2263_v47  ;;  %v1152_v3 = vpack.c.bf16 %v1096_v18, %v1094_v17 }
 0x1f6   :  { %v932_v20 = vpop.f32.mrf.mxu0 }
 0x1f7   :  { %v1021_v14 = vpop.f32.mrf.mxu1  ;;  %1421 = vmatmul.bf16.gmra.mxu3 %v1152_v3  ;;  %v2350_v24 = vpack.c.bf16 %v1123_v1, %v1121_v11  ;;  %v933_v30 = vadd.f32 %v932_v20, %v2312_v31 }
 0x1f8   :  { %v789_v61 = vpop.f32.mrf.mxu2 }
 0x1f9   :  { %v790_v62 = vadd.f32 %v789_v61, %v2198_v32  ;;  %v878_v28 = vpop.f32.mrf.mxu3  ;;  %971 = vmatmul.bf16.gmra.mxu0 %v2257_v39  ;;  %v1022_v12 = vadd.f32 %v1021_v14, %v933_v30 }
 0x1fa   :  { %1060 = vmatmul.bf16.gmra.mxu1 %v2259_v40 }
 0x1fb   :  { %v879_v34 = vadd.f32 %v878_v28, %v790_v62  ;;  %v1098_v44 = vmax.f32 %v1022_v12, 0.0 }
 0x1fd   :  { %v1125_v56 = vmax.f32 %v879_v34, 0.0 }
 0x1fe   :  { %v934_v37 = vpop.f32.mrf.mxu0 }
 0x1ff   :  { %v935_v47 = vadd.f32 %v934_v37, %v2312_v31  ;;  %v1023_v38 = vpop.f32.mrf.mxu1 }
 0x200   :  { %v791_v13 = vpop.f32.mrf.mxu2 }
 0x201   :  { %v1024_v42 = vadd.f32 %v1023_v38, %v935_v47  ;;  %v792_v43 = vadd.f32 %v791_v13, %v2198_v32  ;;  %v880_v41 = vpop.f32.mrf.mxu3 }
 0x203   :  { %v1100_v50 = vmax.f32 %v1024_v42, 0.0  ;;  %v881_v45 = vadd.f32 %v880_v41, %v792_v43 }
 0x205   :  { %v1154_v39 = vpack.c.bf16 %v1100_v50, %v1098_v44  ;;  %v1127_v46 = vmax.f32 %v881_v45, 0.0  ;;  %1337 = vmatmul.bf16.gmra.mxu2 %v2279_v21 }
 0x206   :  { %v937_v40 = vpop.f32.mrf.mxu0 }
 0x207   :  { %v1026_v57 = vpop.f32.mrf.mxu1  ;;  %1426 = vmatmul.bf16.gmra.mxu3 %v1154_v39  ;;  %v2359_v54 = vpack.c.bf16 %v1127_v46, %v1125_v56  ;;  %v938_v33 = vadd.f32 %v937_v40, %v2312_v31 }
 0x208   :  { %v794_v55 = vpop.f32.mrf.mxu2 }
 0x209   :  { %v795_v5 = vadd.f32 %v794_v55, %v2198_v32  ;;  %v883_v26 = vpop.f32.mrf.mxu3  ;;  %976 = vmatmul.bf16.gmra.mxu0 %v2273_v15  ;;  %v1027_v27 = vadd.f32 %v1026_v57, %v938_v33 }
 0x20a   :  { %1065 = vmatmul.bf16.gmra.mxu1 %v2275_v16 }
 0x20b   :  { %v884_v58 = vadd.f32 %v883_v26, %v795_v5  ;;  %v1102_v35 = vmax.f32 %v1027_v27, 0.0 }
 0x20d   :  { %v1129_v36 = vmax.f32 %v884_v58, 0.0 }
 0x20e   :  { %v939_v51 = vpop.f32.mrf.mxu0 }
 0x20f   :  { %v940_v21 = vadd.f32 %v939_v51, %v2312_v31  ;;  %v1028_v49 = vpop.f32.mrf.mxu1 }
 0x210   :  { %v796_v52 = vpop.f32.mrf.mxu2 }
 0x211   :  { %v1029_v63 = vadd.f32 %v1028_v49, %v940_v21  ;;  %v797_v0 = vadd.f32 %v796_v52, %v2198_v32  ;;  %v885_v4 = vpop.f32.mrf.mxu3 }
 0x213   :  { %v1104_v10 = vmax.f32 %v1029_v63, 0.0  ;;  %v886_v7 = vadd.f32 %v885_v4, %v797_v0 }
 0x215   :  { %v1156_v15 = vpack.c.bf16 %v1104_v10, %v1102_v35  ;;  %v1131_v2 = vmax.f32 %v886_v7, 0.0  ;;  %1342 = vmatmul.bf16.gmra.mxu2 %v2295_v6 }
 0x216   :  { %v942_v16 = vpop.f32.mrf.mxu0 }
 0x217   :  { %v1031_v8 = vpop.f32.mrf.mxu1  ;;  %1431 = vmatmul.bf16.gmra.mxu3 %v1156_v15  ;;  %v2368_v9 = vpack.c.bf16 %v1131_v2, %v1129_v36  ;;  %v943_v11 = vadd.f32 %v942_v16, %v2312_v31 }
 0x218   :  { %v799_v17 = vpop.f32.mrf.mxu2 }
 0x219   :  { %v800_v18 = vadd.f32 %v799_v17, %v2198_v32  ;;  %v888_v19 = vpop.f32.mrf.mxu3  ;;  %981 = vmatmul.bf16.gmra.mxu0 %v2289_v48  ;;  %v1032_v20 = vadd.f32 %v1031_v8, %v943_v11 }
 0x21a   :  { %1070 = vmatmul.bf16.gmra.mxu1 %v2291_v53 }
 0x21b   :  { %v889_v1 = vadd.f32 %v888_v19, %v800_v18  ;;  %v1106_v34 = vmax.f32 %v1032_v20, 0.0  ;;  %v2396_v20 = vld [vmem:[%s2465_s6] ss:$0 sm:$0xff]  ;;  %s2032_s6 = smov [#allocation11]  }
 0x21c   :  { %s1523_s28 = sshll.u32 %s2032_s6, 4  ;;  %s1524_s28 = int_to_ptr.vmem [resolvable:$true] %s1523_s28 }
 0x21d   :  { %v1133_v47 = vmax.f32 %v889_v1, 0.0 }
 0x21e   :  { %v944_v3 = vpop.f32.mrf.mxu0 }
 0x21f   :  { %v945_v6 = vadd.f32 %v944_v3, %v2312_v31  ;;  %v1033_v14 = vpop.f32.mrf.mxu1 }
 0x220   :  { %v801_v61 = vpop.f32.mrf.mxu2 }
 0x221   :  { %v1034_v62 = vadd.f32 %v1033_v14, %v945_v6  ;;  %v802_v28 = vadd.f32 %v801_v61, %v2198_v32  ;;  %v890_v30 = vpop.f32.mrf.mxu3 }
 0x223   :  { %v1108_v37 = vmax.f32 %v1034_v62, 0.0  ;;  %v891_v12 = vadd.f32 %v890_v30, %v802_v28 }
 0x225   :  { %v1158_v48 = vpack.c.bf16 %v1108_v37, %v1106_v34  ;;  %v1135_v38 = vmax.f32 %v891_v12, 0.0  ;;  %1347 = vmatmul.bf16.gmra.mxu2 %v2314_v29 }
 0x226   :  { %v947_v53 = vpop.f32.mrf.mxu0 }
 0x227   :  { %v1036_v13 = vpop.f32.mrf.mxu1  ;;  %1436 = vmatmul.bf16.gmra.mxu3 %v1158_v48  ;;  %v2377_v42 = vpack.c.bf16 %v1135_v38, %v1133_v47  ;;  %v948_v50 = vadd.f32 %v947_v53, %v2312_v31 }
 0x228   :  { %v804_v43 = vpop.f32.mrf.mxu2 }
 0x229   :  { %v805_v41 = vadd.f32 %v804_v43, %v2198_v32  ;;  %v893_v44 = vpop.f32.mrf.mxu3  ;;  %986 = vmatmul.bf16.gmra.mxu0 %v2305_v22  ;;  %v1037_v39 = vadd.f32 %v1036_v13, %v948_v50 }
 0x22a   :  { %1075 = vmatmul.bf16.gmra.mxu1 %v2307_v23 }
 0x22b   :  { %v894_v45 = vadd.f32 %v893_v44, %v805_v41  ;;  %v1110_v26 = vmax.f32 %v1037_v39, 0.0 }
 0x22d   :  { %v1137_v51 = vmax.f32 %v894_v45, 0.0 }
 0x22e   :  { %v949_v56 = vpop.f32.mrf.mxu0 }
 0x22f   :  { %v950_v29 = vadd.f32 %v949_v56, %v2312_v31  ;;  %v1038_v46 = vpop.f32.mrf.mxu1 }
 0x230   :  { %v806_v40 = vpop.f32.mrf.mxu2 }
 0x231   :  { %v1039_v57 = vadd.f32 %v1038_v46, %v950_v29  ;;  %v807_v55 = vadd.f32 %v806_v40, %v2198_v32  ;;  %v895_v5 = vpop.f32.mrf.mxu3 }
 0x233   :  { %v1112_v33 = vmax.f32 %v1039_v57, 0.0  ;;  %v896_v58 = vadd.f32 %v895_v5, %v807_v55 }
 0x235   :  { %v1160_v22 = vpack.c.bf16 %v1112_v33, %v1110_v26  ;;  %v1139_v27 = vmax.f32 %v896_v58, 0.0  ;;  %1352 = vmatmul.bf16.gmra.mxu2 %v2323_v60 }
 0x236   :  { %v952_v23 = vpop.f32.mrf.mxu0 }
 0x237   :  { %v1041_v21 = vpop.f32.mrf.mxu1  ;;  %1441 = vmatmul.bf16.gmra.mxu3 %v1160_v22  ;;  %v2386_v49 = vpack.c.bf16 %v1139_v27, %v1137_v51  ;;  %v953_v4 = vadd.f32 %v952_v23, %v2312_v31 }
 0x238   :  { %v809_v52 = vpop.f32.mrf.mxu2 }
 0x239   :  { %v810_v63 = vadd.f32 %v809_v52, %v2198_v32  ;;  %v898_v0 = vpop.f32.mrf.mxu3  ;;  %v1042_v7 = vadd.f32 %v1041_v21, %v953_v4 }
 0x23b   :  { %v899_v35 = vadd.f32 %v898_v0, %v810_v63  ;;  %v1114_v17 = vmax.f32 %v1042_v7, 0.0 }
 0x23d   :  { %v1141_v11 = vmax.f32 %v899_v35, 0.0 }
 0x23e   :  { %v954_v10 = vpop.f32.mrf.mxu0 }
 0x23f   :  { %v955_v36 = vadd.f32 %v954_v10, %v2312_v31  ;;  %v1043_v15 = vpop.f32.mrf.mxu1 }
 0x240   :  { %v811_v2 = vpop.f32.mrf.mxu2 }
 0x241   :  { %v1044_v16 = vadd.f32 %v1043_v15, %v955_v36  ;;  %v812_v60 = vadd.f32 %v811_v2, %v2198_v32  ;;  %v900_v8 = vpop.f32.mrf.mxu3 }
 0x243   :  { %v1116_v18 = vmax.f32 %v1044_v16, 0.0  ;;  %v901_v19 = vadd.f32 %v900_v8, %v812_v60 }
 0x245   :  { %v1162_v1 = vpack.c.bf16 %v1116_v18, %v1114_v17  ;;  %v1143_v3 = vmax.f32 %v901_v19, 0.0  ;;  %1357 = vmatmul.bf16.gmra.mxu2 %v2332_v25 }
 0x246   :  { %v957_v6 = vpop.f32.mrf.mxu0 }
 0x247   :  { %v1046_v14 = vpop.f32.mrf.mxu1  ;;  %1446 = vmatmul.bf16.gmra.mxu3 %v1162_v1  ;;  %v2398_v61 = vpack.c.bf16 %v1143_v3, %v1141_v11  ;;  %v958_v30 = vadd.f32 %v957_v6, %v2312_v31 }
 0x248   :  { %v1318_v32 = vpop.f32.mrf.mxu2 }
 0x249   :  { %v1319_v62 = vadd.f32 %v2396_v20, %v1318_v32  ;;  %v1047_v25 = vadd.f32 %v1046_v14, %v958_v30 }
 0x24a   :  { %v1407_v28 = vpop.f32.mrf.mxu3 }
 0x24b   :  { %v1408_v34 = vadd.f32 %v1407_v28, %v1319_v62  ;;  %v1118_v43 = vmax.f32 %v1047_v25, 0.0 }
 0x24d   :  { %1487 = vst [vmem:[#allocation11] sm:$0xff] %v1408_v34 }
 0x24e   :  { %v959_v37 = vpop.f32.mrf.mxu0 }
 0x24f   :  { %v960_v12 = vadd.f32 %v959_v37, %v2312_v31  ;;  %v1048_v47 = vpop.f32.mrf.mxu1 }
 0x250   :  { %v1320_v48 = vpop.f32.mrf.mxu2 }
 0x251   :  { %v1049_v38 = vadd.f32 %v1048_v47, %v960_v12  ;;  %v1321_v53 = vadd.f32 %v2396_v20, %v1320_v48 }
 0x252   :  { %v1409_v13 = vpop.f32.mrf.mxu3 }
 0x253   :  { %v1120_v41 = vmax.f32 %v1049_v38, 0.0  ;;  %v1410_v44 = vadd.f32 %v1409_v13, %v1321_v53 }
 0x255   :  { %v1164_v50 = vpack.c.bf16 %v1120_v41, %v1118_v43  ;;  %1488 = vst [vmem:[#allocation11 + $0x8] sm:$0xff] %v1410_v44  ;;  %1362 = vmatmul.bf16.gmra.mxu2 %v2341_v59 }
 0x256   :  { %v962_v45 = vpop.f32.mrf.mxu0 }
 0x257   :  { %v1051_v56 = vpop.f32.mrf.mxu1  ;;  %1451 = vmatmul.bf16.gmra.mxu3 %v1164_v50  ;;  %v963_v40 = vadd.f32 %v962_v45, %v2312_v31 }
 0x258   :  { %v1323_v39 = vpop.f32.mrf.mxu2 }
 0x259   :  { %v1324_v29 = vadd.f32 %v2396_v20, %v1323_v39  ;;  %v1052_v5 = vadd.f32 %v1051_v56, %v963_v40 }
 0x25a   :  { %v1412_v46 = vpop.f32.mrf.mxu3 }
 0x25b   :  { %v1413_v57 = vadd.f32 %v1412_v46, %v1324_v29  ;;  %v1122_v27 = vmax.f32 %v1052_v5, 0.0 }
 0x25d   :  { %1489 = vst [vmem:[#allocation11 + $0x10] sm:$0xff] %v1413_v57 }
 0x25e   :  { %v964_v55 = vpop.f32.mrf.mxu0 }
 0x25f   :  { %v965_v26 = vadd.f32 %v964_v55, %v2312_v31  ;;  %v1053_v33 = vpop.f32.mrf.mxu1 }
 0x260   :  { %v1325_v58 = vpop.f32.mrf.mxu2 }
 0x261   :  { %v1054_v51 = vadd.f32 %v1053_v33, %v965_v26  ;;  %v1326_v59 = vadd.f32 %v2396_v20, %v1325_v58 }
 0x262   :  { %v1414_v22 = vpop.f32.mrf.mxu3 }
 0x263   :  { %v1124_v23 = vmax.f32 %v1054_v51, 0.0  ;;  %v1415_v21 = vadd.f32 %v1414_v22, %v1326_v59 }
 0x265   :  { %v1166_v52 = vpack.c.bf16 %v1124_v23, %v1122_v27  ;;  %1490 = vst [vmem:[#allocation11 + $0x18] sm:$0xff] %v1415_v21  ;;  %1367 = vmatmul.bf16.gmra.mxu2 %v2350_v24 }
 0x266   :  { %v967_v63 = vpop.f32.mrf.mxu0 }
 0x267   :  { %v1056_v0 = vpop.f32.mrf.mxu1  ;;  %1456 = vmatmul.bf16.gmra.mxu3 %v1166_v52  ;;  %v968_v7 = vadd.f32 %v967_v63, %v2312_v31 }
 0x268   :  { %v1328_v4 = vpop.f32.mrf.mxu2 }
 0x269   :  { %v1329_v35 = vadd.f32 %v2396_v20, %v1328_v4  ;;  %v1057_v2 = vadd.f32 %v1056_v0, %v968_v7 }
 0x26a   :  { %v1417_v10 = vpop.f32.mrf.mxu3 }
 0x26b   :  { %v1418_v36 = vadd.f32 %v1417_v10, %v1329_v35  ;;  %v1126_v19 = vmax.f32 %v1057_v2, 0.0 }
 0x26d   :  { %1491 = vst [vmem:[#allocation11 + $0x20] sm:$0xff] %v1418_v36 }
 0x26e   :  { %v969_v15 = vpop.f32.mrf.mxu0 }
 0x26f   :  { %v970_v16 = vadd.f32 %v969_v15, %v2312_v31  ;;  %v1058_v60 = vpop.f32.mrf.mxu1 }
 0x270   :  { %v1330_v8 = vpop.f32.mrf.mxu2 }
 0x271   :  { %v1059_v17 = vadd.f32 %v1058_v60, %v970_v16  ;;  %v1331_v24 = vadd.f32 %v2396_v20, %v1330_v8 }
 0x272   :  { %v1419_v18 = vpop.f32.mrf.mxu3 }
 0x273   :  { %v1128_v11 = vmax.f32 %v1059_v17, 0.0  ;;  %v1420_v1 = vadd.f32 %v1419_v18, %v1331_v24 }
 0x275   :  { %v1168_v3 = vpack.c.bf16 %v1128_v11, %v1126_v19  ;;  %1492 = vst [vmem:[#allocation11 + $0x28] sm:$0xff] %v1420_v1  ;;  %1372 = vmatmul.bf16.gmra.mxu2 %v2359_v54 }
 0x276   :  { %v972_v6 = vpop.f32.mrf.mxu0 }
 0x277   :  { %v1061_v14 = vpop.f32.mrf.mxu1  ;;  %1461 = vmatmul.bf16.gmra.mxu3 %v1168_v3  ;;  %v973_v30 = vadd.f32 %v972_v6, %v2312_v31 }
 0x278   :  { %v1333_v32 = vpop.f32.mrf.mxu2 }
 0x279   :  { %v1334_v62 = vadd.f32 %v2396_v20, %v1333_v32  ;;  %v1062_v25 = vadd.f32 %v1061_v14, %v973_v30 }
 0x27a   :  { %v1422_v28 = vpop.f32.mrf.mxu3 }
 0x27b   :  { %v1423_v34 = vadd.f32 %v1422_v28, %v1334_v62  ;;  %v1130_v13 = vmax.f32 %v1062_v25, 0.0 }
 0x27d   :  { %1493 = vst [vmem:[#allocation11 + $0x30] sm:$0xff] %v1423_v34 }
 0x27e   :  { %v974_v37 = vpop.f32.mrf.mxu0 }
 0x27f   :  { %v975_v12 = vadd.f32 %v974_v37, %v2312_v31  ;;  %v1063_v47 = vpop.f32.mrf.mxu1 }
 0x280   :  { %v1335_v48 = vpop.f32.mrf.mxu2 }
 0x281   :  { %v1064_v38 = vadd.f32 %v1063_v47, %v975_v12  ;;  %v1336_v54 = vadd.f32 %v2396_v20, %v1335_v48 }
 0x282   :  { %v1424_v53 = vpop.f32.mrf.mxu3 }
 0x283   :  { %v1132_v43 = vmax.f32 %v1064_v38, 0.0  ;;  %v1425_v41 = vadd.f32 %v1424_v53, %v1336_v54 }
 0x285   :  { %v1170_v44 = vpack.c.bf16 %v1132_v43, %v1130_v13  ;;  %1494 = vst [vmem:[#allocation11 + $0x38] sm:$0xff] %v1425_v41  ;;  %1377 = vmatmul.bf16.gmra.mxu2 %v2368_v9 }
 0x286   :  { %v977_v50 = vpop.f32.mrf.mxu0 }
 0x287   :  { %v1066_v45 = vpop.f32.mrf.mxu1  ;;  %1466 = vmatmul.bf16.gmra.mxu3 %v1170_v44  ;;  %v978_v46 = vadd.f32 %v977_v50, %v2312_v31 }
 0x288   :  { %v1338_v56 = vpop.f32.mrf.mxu2 }
 0x289   :  { %v1339_v39 = vadd.f32 %v2396_v20, %v1338_v56  ;;  %v1067_v55 = vadd.f32 %v1066_v45, %v978_v46 }
 0x28a   :  { %v1427_v29 = vpop.f32.mrf.mxu3 }
 0x28b   :  { %v1428_v40 = vadd.f32 %v1427_v29, %v1339_v39  ;;  %v1134_v59 = vmax.f32 %v1067_v55, 0.0 }
 0x28d   :  { %1495 = vst [vmem:[#allocation11 + $0x40] sm:$0xff] %v1428_v40 }
 0x28e   :  { %v979_v57 = vpop.f32.mrf.mxu0 }
 0x28f   :  { %v980_v5 = vadd.f32 %v979_v57, %v2312_v31  ;;  %v1068_v26 = vpop.f32.mrf.mxu1 }
 0x290   :  { %v1340_v33 = vpop.f32.mrf.mxu2 }
 0x291   :  { %v1069_v58 = vadd.f32 %v1068_v26, %v980_v5  ;;  %v1341_v9 = vadd.f32 %v2396_v20, %v1340_v33 }
 0x292   :  { %v1429_v51 = vpop.f32.mrf.mxu3 }
 0x293   :  { %v1136_v22 = vmax.f32 %v1069_v58, 0.0  ;;  %v1430_v27 = vadd.f32 %v1429_v51, %v1341_v9 }
 0x295   :  { %v1172_v23 = vpack.c.bf16 %v1136_v22, %v1134_v59  ;;  %1496 = vst [vmem:[#allocation11 + $0x48] sm:$0xff] %v1430_v27  ;;  %1382 = vmatmul.bf16.gmra.mxu2 %v2377_v42 }
 0x296   :  { %v982_v21 = vpop.f32.mrf.mxu0 }
 0x297   :  { %v1071_v52 = vpop.f32.mrf.mxu1  ;;  %1471 = vmatmul.bf16.gmra.mxu3 %v1172_v23  ;;  %v983_v35 = vadd.f32 %v982_v21, %v2312_v31 }
 0x298   :  { %v1343_v63 = vpop.f32.mrf.mxu2 }
 0x299   :  { %v1344_v0 = vadd.f32 %v2396_v20, %v1343_v63  ;;  %v1072_v36 = vadd.f32 %v1071_v52, %v983_v35 }
 0x29a   :  { %v1432_v4 = vpop.f32.mrf.mxu3 }
 0x29b   :  { %v1433_v10 = vadd.f32 %v1432_v4, %v1344_v0  ;;  %v1138_v17 = vmax.f32 %v1072_v36, 0.0 }
 0x29d   :  { %1497 = vst [vmem:[#allocation11 + $0x50] sm:$0xff] %v1433_v10 }
 0x29e   :  { %v984_v7 = vpop.f32.mrf.mxu0 }
 0x29f   :  { %v985_v15 = vadd.f32 %v984_v7, %v2312_v31  ;;  %v1073_v2 = vpop.f32.mrf.mxu1 }
 0x2a0   :  { %v1345_v16 = vpop.f32.mrf.mxu2 }
 0x2a1   :  { %v1074_v60 = vadd.f32 %v1073_v2, %v985_v15  ;;  %v1346_v42 = vadd.f32 %v2396_v20, %v1345_v16 }
 0x2a2   :  { %v1434_v8 = vpop.f32.mrf.mxu3 }
 0x2a3   :  { %v1140_v24 = vmax.f32 %v1074_v60, 0.0  ;;  %v1435_v18 = vadd.f32 %v1434_v8, %v1346_v42 }
 0x2a5   :  { %v1174_v19 = vpack.c.bf16 %v1140_v24, %v1138_v17  ;;  %1498 = vst [vmem:[#allocation11 + $0x58] sm:$0xff] %v1435_v18  ;;  %1387 = vmatmul.bf16.gmra.mxu2 %v2386_v49 }
 0x2a6   :  { %v987_v11 = vpop.f32.mrf.mxu0 }
 0x2a7   :  { %v1076_v1 = vpop.f32.mrf.mxu1  ;;  %1476 = vmatmul.bf16.gmra.mxu3 %v1174_v19  ;;  %v988_v32 = vadd.f32 %v987_v11, %v2312_v31 }
 0x2a8   :  { %v1348_v3 = vpop.f32.mrf.mxu2 }
 0x2a9   :  { %v1349_v6 = vadd.f32 %v2396_v20, %v1348_v3  ;;  %v1077_v30 = vadd.f32 %v1076_v1, %v988_v32 }
 0x2aa   :  { %v1437_v14 = vpop.f32.mrf.mxu3 }
 0x2ab   :  { %v1438_v62 = vadd.f32 %v1437_v14, %v1349_v6  ;;  %v1142_v48 = vmax.f32 %v1077_v30, 0.0 }
 0x2ad   :  { %1499 = vst [vmem:[#allocation11 + $0x60] sm:$0xff] %v1438_v62 }
 0x2ae   :  { %v989_v28 = vpop.f32.mrf.mxu0 }
 0x2af   :  { %v990_v34 = vadd.f32 %v989_v28, %v2312_v31  ;;  %v1078_v37 = vpop.f32.mrf.mxu1 }
 0x2b0   :  { %v1350_v25 = vpop.f32.mrf.mxu2 }
 0x2b1   :  { %v1079_v12 = vadd.f32 %v1078_v37, %v990_v34  ;;  %v1351_v49 = vadd.f32 %v2396_v20, %v1350_v25 }
 0x2b2   :  { %v1439_v47 = vpop.f32.mrf.mxu3 }
 0x2b3   :  { %v1144_v38 = vmax.f32 %v1079_v12, 0.0  ;;  %v1440_v54 = vadd.f32 %v1439_v47, %v1351_v49 }
 0x2b5   :  { %v1176_v53 = vpack.c.bf16 %v1144_v38, %v1142_v48  ;;  %1500 = vst [vmem:[#allocation11 + $0x68] sm:$0xff] %v1440_v54  ;;  %1392 = vmatmul.bf16.gmra.mxu2 %v2398_v61 }
 0x2b7   :  { %1481 = vmatmul.bf16.gmra.mxu3 %v1176_v53 }
 0x2b8   :  { %v1353_v13 = vpop.f32.mrf.mxu2 }
 0x2b9   :  { %v1354_v43 = vadd.f32 %v2396_v20, %v1353_v13 }
 0x2ba   :  { %v1442_v41 = vpop.f32.mrf.mxu3 }
 0x2bb   :  { %v1443_v44 = vadd.f32 %v1442_v41, %v1354_v43 }
 0x2bd   :  { %1501 = vst [vmem:[#allocation11 + $0x70] sm:$0xff] %v1443_v44 }
 0x2c0   :  { %v1355_v31 = vpop.f32.mrf.mxu2 }
 0x2c1   :  { %v1356_v50 = vadd.f32 %v2396_v20, %v1355_v31 }
 0x2c2   :  { %v1444_v45 = vpop.f32.mrf.mxu3 }
 0x2c3   :  { %v1445_v56 = vadd.f32 %v1444_v45, %v1356_v50 }
 0x2c5   :  { %1502 = vst [vmem:[#allocation11 + $0x78] sm:$0xff] %v1445_v56 }
 0x2c8   :  { %v1358_v39 = vpop.f32.mrf.mxu2 }
 0x2c9   :  { %v1359_v29 = vadd.f32 %v2396_v20, %v1358_v39 }
 0x2ca   :  { %v1447_v46 = vpop.f32.mrf.mxu3 }
 0x2cb   :  { %v1448_v40 = vadd.f32 %v1447_v46, %v1359_v29 }
 0x2cd   :  { %1503 = vst [vmem:[#allocation11 + $0x80] sm:$0xff] %v1448_v40 }
 0x2d0   :  { %v1360_v61 = vpop.f32.mrf.mxu2 }
 0x2d1   :  { %v1361_v57 = vadd.f32 %v2396_v20, %v1360_v61 }
 0x2d2   :  { %v1449_v55 = vpop.f32.mrf.mxu3 }
 0x2d3   :  { %v1450_v5 = vadd.f32 %v1449_v55, %v1361_v57 }
 0x2d5   :  { %1504 = vst [vmem:[#allocation11 + $0x88] sm:$0xff] %v1450_v5 }
 0x2d8   :  { %v1363_v26 = vpop.f32.mrf.mxu2 }
 0x2d9   :  { %v1364_v33 = vadd.f32 %v2396_v20, %v1363_v26 }
 0x2da   :  { %v1452_v58 = vpop.f32.mrf.mxu3 }
 0x2db   :  { %v1453_v9 = vadd.f32 %v1452_v58, %v1364_v33 }
 0x2dd   :  { %1505 = vst [vmem:[#allocation11 + $0x90] sm:$0xff] %v1453_v9 }
 0x2e0   :  { %v1365_v51 = vpop.f32.mrf.mxu2 }
 0x2e1   :  { %v1366_v59 = vadd.f32 %v2396_v20, %v1365_v51 }
 0x2e2   :  { %v1454_v22 = vpop.f32.mrf.mxu3 }
 0x2e3   :  { %v1455_v27 = vadd.f32 %v1454_v22, %v1366_v59 }
 0x2e5   :  { %1506 = vst [vmem:[#allocation11 + $0x98] sm:$0xff] %v1455_v27 }
 0x2e8   :  { %v1368_v23 = vpop.f32.mrf.mxu2 }
 0x2e9   :  { %v1369_v21 = vadd.f32 %v2396_v20, %v1368_v23 }
 0x2ea   :  { %v1457_v52 = vpop.f32.mrf.mxu3 }
 0x2eb   :  { %v1458_v63 = vadd.f32 %v1457_v52, %v1369_v21 }
 0x2ed   :  { %1507 = vst [vmem:[#allocation11 + $0xa0] sm:$0xff] %v1458_v63 }
 0x2f0   :  { %v1370_v0 = vpop.f32.mrf.mxu2 }
 0x2f1   :  { %v1371_v4 = vadd.f32 %v2396_v20, %v1370_v0 }
 0x2f2   :  { %v1459_v35 = vpop.f32.mrf.mxu3 }
 0x2f3   :  { %v1460_v10 = vadd.f32 %v1459_v35, %v1371_v4 }
 0x2f5   :  { %1508 = vst [vmem:[#allocation11 + $0xa8] sm:$0xff] %v1460_v10 }
 0x2f8   :  { %v1373_v7 = vpop.f32.mrf.mxu2 }
 0x2f9   :  { %v1374_v36 = vadd.f32 %v2396_v20, %v1373_v7 }
 0x2fa   :  { %v1462_v15 = vpop.f32.mrf.mxu3 }
 0x2fb   :  { %v1463_v2 = vadd.f32 %v1462_v15, %v1374_v36 }
 0x2fd   :  { %1509 = vst [vmem:[#allocation11 + $0xb0] sm:$0xff] %v1463_v2 }
 0x300   :  { %v1375_v16 = vpop.f32.mrf.mxu2 }
 0x301   :  { %v1376_v60 = vadd.f32 %v2396_v20, %v1375_v16 }
 0x302   :  { %v1464_v42 = vpop.f32.mrf.mxu3 }
 0x303   :  { %v1465_v8 = vadd.f32 %v1464_v42, %v1376_v60 }
 0x305   :  { %1510 = vst [vmem:[#allocation11 + $0xb8] sm:$0xff] %v1465_v8 }
 0x308   :  { %v1378_v17 = vpop.f32.mrf.mxu2 }
 0x309   :  { %v1379_v24 = vadd.f32 %v2396_v20, %v1378_v17 }
 0x30a   :  { %v1467_v18 = vpop.f32.mrf.mxu3 }
 0x30b   :  { %v1468_v19 = vadd.f32 %v1467_v18, %v1379_v24 }
 0x30d   :  { %1511 = vst [vmem:[#allocation11 + $0xc0] sm:$0xff] %v1468_v19 }
 0x310   :  { %v1380_v11 = vpop.f32.mrf.mxu2 }
 0x311   :  { %v1381_v1 = vadd.f32 %v2396_v20, %v1380_v11 }
 0x312   :  { %v1469_v3 = vpop.f32.mrf.mxu3 }
 0x313   :  { %v1470_v6 = vadd.f32 %v1469_v3, %v1381_v1 }
 0x315   :  { %1512 = vst [vmem:[#allocation11 + $0xc8] sm:$0xff] %v1470_v6 }
 0x318   :  { %v1383_v14 = vpop.f32.mrf.mxu2 }
 0x319   :  { %v1384_v32 = vadd.f32 %v2396_v20, %v1383_v14 }
 0x31a   :  { %v1472_v62 = vpop.f32.mrf.mxu3 }
 0x31b   :  { %v1473_v28 = vadd.f32 %v1472_v62, %v1384_v32 }
 0x31d   :  { %1513 = vst [vmem:[#allocation11 + $0xd0] sm:$0xff] %v1473_v28 }
 0x320   :  { %v1385_v30 = vpop.f32.mrf.mxu2 }
 0x321   :  { %v1386_v34 = vadd.f32 %v2396_v20, %v1385_v30 }
 0x322   :  { %v1474_v37 = vpop.f32.mrf.mxu3 }
 0x323   :  { %v1475_v25 = vadd.f32 %v1474_v37, %v1386_v34 }
 0x325   :  { %1514 = vst [vmem:[#allocation11 + $0xd8] sm:$0xff] %v1475_v25 }
 0x328   :  { %v1388_v12 = vpop.f32.mrf.mxu2 }
 0x329   :  { %v1389_v49 = vadd.f32 %v2396_v20, %v1388_v12 }
 0x32a   :  { %v1477_v47 = vpop.f32.mrf.mxu3 }
 0x32b   :  { %v1478_v48 = vadd.f32 %v1477_v47, %v1389_v49 }
 0x32d   :  { %1515 = vst [vmem:[#allocation11 + $0xe0] sm:$0xff] %v1478_v48 }
 0x330   :  { %v1390_v38 = vpop.f32.mrf.mxu2 }
 0x331   :  { %v1391_v54 = vadd.f32 %v2396_v20, %v1390_v38 }
 0x332   :  { %v1479_v53 = vpop.f32.mrf.mxu3 }
 0x333   :  { %v1480_v13 = vadd.f32 %v1479_v53, %v1391_v54 }
 0x335   :  { %1516 = vst [vmem:[#allocation11 + $0xe8] sm:$0xff] %v1480_v13 }
 0x338   :  { %v1393_v43 = vpop.f32.mrf.mxu2 }
 0x339   :  { %v1394_v41 = vadd.f32 %v2396_v20, %v1393_v43 }
 0x33a   :  { %v1482_v44 = vpop.f32.mrf.mxu3 }
 0x33b   :  { %v1483_v31 = vadd.f32 %v1482_v44, %v1394_v41 }
 0x33d   :  { %1517 = vst [vmem:[#allocation11 + $0xf0] sm:$0xff] %v1483_v31 }
 0x340   :  { %v1395_v50 = vpop.f32.mrf.mxu2 }
 0x341   :  { %v1396_v45 = vadd.f32 %v2396_v20, %v1395_v50 }
 0x342   :  { %v1484_v56 = vpop.f32.mrf.mxu3 }
 0x343   :  { %v1485_v39 = vadd.f32 %v1484_v56, %v1396_v45 }
 0x345   :  { %1518 = vst [vmem:[#allocation11 + $0xf8] sm:$0xff] %v1485_v39 }
 0x346   :  { %1531 = dma.vmem_to_hbm [thread:$0]  %s1524_s28, 4096, %s1526_s8, [#allocation4], %s2024_s9, %s2024_s9, %s2025_s10  }
 0x347   :  { %2021 = dma.done.wait [#allocation4], 4096  }
 0x348   :  { %2022 = vsyncadd [#allocation4], 4294963200 }
 0x349   :  { %1536 = vsyncpa [#allocation3], 1 }
 0x34a   :  { %1537 = vsyncpa [#allocation6], 1 }
 0x34b   :  { %1538 = vsyncpa [#allocation9], 1 }
 0x34c   :  { %1539 = vsyncpa [#allocation4], 1 }

// kernel: tpu_custom_call.1
= control target key start
LH: loop header
LB: loop body
LE: loop exit
PB: predicated region body
PF: predicated region fallthrough
CT: control target
= control target key end

     0   :  { %12 = vsyncpa [#allocation3], 0  ;;  %s2459_s0 = inlined_call_operand.hbm [shape: f32[256,128], index: 0, kind: input, shape index: {}]   ;;  %s2460_s1 = inlined_call_operand.hbm [shape: bf16[128,256], index: 1, kind: input, shape index: {}]   ;;  %s2461_s2 = inlined_call_operand.hbm [shape: f32[1,256], index: 2, kind: input, shape index: {}]   ;;  %s2462_s3 = inlined_call_operand.hbm [shape: bf16[256,256], index: 3, kind: input, shape index: {}]   ;;  %s2463_s4 = inlined_call_operand.vmem [shape: f32[1,256], index: 4, kind: input, shape index: {}]   ;;  %s2464_s5 = inlined_call_operand.hbm [shape: bf16[256,128], index: 5, kind: input, shape index: {}]   ;;  %s2465_s6 = inlined_call_operand.vmem [shape: f32[1,128], index: 6, kind: input, shape index: {}]   ;;  %s2466_s7 = inlined_call_operand.hbm [shape: f32[256,128], index: 7, kind: output, shape index: {}]  }
   0x1   :  { %13 = vsyncpa [#allocation6], 0 }
   0x2   :  { %14 = vsyncpa [#allocation9], 0 }
   0x3   :  { %15 = vsyncpa [#allocation4], 0  ;;  %s33_s26 = sshll.u32 %s2460_s1, 4  ;;  %s2023_s27 = smov [#allocation5]   ;;  %s34_s26 = int_to_ptr.hbm [resolvable:$true] %s33_s26 }
   0x4   :  { %s35_s28 = sshll.u32 %s2023_s27, 4  ;;  %s57_s8 = sshll.u32 %s2462_s3, 4  ;;  %s36_s28 = int_to_ptr.vmem [resolvable:$true] %s35_s28  ;;  %s58_s8 = int_to_ptr.hbm [resolvable:$true] %s57_s8 }
   0x5   :  { %s2024_s9 = smov 128   ;;  %s2025_s10 = smov 8  }
   0x6   :  { %41 = dma.hbm_to_vmem [thread:$0]  %s34_s26, 2048, %s36_s28, [#allocation6], %s2024_s9, %s2024_s9, %s2025_s10  }
   0x7   :  { %s2026_s11 = smov [#allocation8]   ;;  %s20_s1 = sshll.u32 %s2459_s0, 4  ;;  %s21_s1 = int_to_ptr.hbm [resolvable:$true] %s20_s1 }
   0x8   :  { %s59_s12 = sshll.u32 %s2026_s11, 4  ;;  %s47_s16 = sshll.u32 %s2461_s2, 4  ;;  %s60_s12 = int_to_ptr.vmem [resolvable:$true] %s59_s12  ;;  %s48_s16 = int_to_ptr.hbm [resolvable:$true] %s47_s16 }
   0x9   :  { %65 = dma.hbm_to_vmem [thread:$0]  %s58_s8, 4096, %s60_s12, [#allocation9], %s2024_s9, %s2024_s9, %s2025_s10  }
   0xa   :  { %s2027_s17 = smov [#allocation2]   ;;  %s2028_s19 = smov [#allocation7]  }
   0xb   :  { %s22_s18 = sshll.u32 %s2027_s17, 4  ;;  %s49_s0 = sshll.u32 %s2028_s19, 4  ;;  %s23_s18 = int_to_ptr.vmem [resolvable:$true] %s22_s18  ;;  %s50_s0 = int_to_ptr.vmem [resolvable:$true] %s49_s0 }
   0xc   :  { %28 = dma.hbm_to_vmem [thread:$0]  %s21_s1, 4096, %s23_s18, [#allocation3], %s2024_s9, %s2024_s9, %s2025_s10  }
   0xd   :  { %s72_s22 = sshll.u32 %s2464_s5, 4  ;;  %s2029_s23 = smov [#allocation10]   ;;  %s73_s22 = int_to_ptr.hbm [resolvable:$true] %s72_s22 }
   0xe   :  { %52 = dma.hbm_to_vmem [thread:$0]  %s48_s16, 32, %s50_s0, [#allocation6]  }
   0xf   :  { %s74_s24 = sshll.u32 %s2029_s23, 4  ;;  %s2030_s2 = smov 64   ;;  %s75_s24 = int_to_ptr.vmem [resolvable:$true] %s74_s24 }
  0x10   :  { %s2031_s25 = smov 4  }
  0x11   :  { %80 = dma.hbm_to_vmem [thread:$0]  %s73_s22, 2048, %s75_s24, [#allocation9], %s2030_s2, %s2030_s2, %s2031_s25  }
  0x12   :  { %2015 = dma.done.wait [#allocation3], 4096  }
  0x13   :  { %2016 = vsyncadd [#allocation3], 4294963200 }
  0x14   :  { %2017 = dma.done.wait [#allocation6], 2080  }
  0x15   :  { %2018 = vsyncadd [#allocation6], 4294965216 }
  0x16   :  { %2019 = dma.done.wait [#allocation9], 6144  }
  0x17   :  { %2020 = vsyncadd [#allocation9], 4294961152  ;;  %v1598_v0 = vld [vmem:[#allocation5 + $0x70] sm:$0xf]  ;;  %v1811_v1 = vld [vmem:[#allocation5 + $0x74] sm:$0xf0] }
  0x18   :  { %v1810_v2 = vld [vmem:[#allocation5 + $0x74] sm:$0xf]  ;;  %v1599_v3 = vor.u32 %v1811_v1, %v1598_v0  ;;  %v1600_v4 = vld [vmem:[#allocation5 + $0x78] sm:$0xf0]  ;;  %v1590_v5 = vld [vmem:[#allocation5 + $0x60] sm:$0xf] }
  0x19   :  { %v1809_v6 = vld [vmem:[#allocation5 + $0x64] sm:$0xf0]  ;;  %v1603_v7 = vor.u32 %v1810_v2, %v1600_v4  ;;  %v1808_v8 = vld [vmem:[#allocation5 + $0x64] sm:$0xf]  ;;  %v1592_v9 = vld [vmem:[#allocation5 + $0x68] sm:$0xf0] }
  0x1a   :  { %253 = vmatpush.bf16.msra.mxu0 %v1599_v3  ;;  %v1591_v10 = vor.u32 %v1809_v6, %v1590_v5  ;;  %v1595_v11 = vor.u32 %v1808_v8, %v1592_v9  ;;  %v1582_v12 = vld [vmem:[#allocation5 + $0x50] sm:$0xf]  ;;  %v1807_v13 = vld [vmem:[#allocation5 + $0x54] sm:$0xf0]  ;;  %v1806_v14 = vld [vmem:[#allocation5 + $0x54] sm:$0xf] }
  0x1b   :  { %342 = vmatpush.bf16.msra.mxu1 %v1603_v7  ;;  %v1584_v15 = vld [vmem:[#allocation5 + $0x58] sm:$0xf0]  ;;  %v1583_v16 = vor.u32 %v1807_v13, %v1582_v12  ;;  %v1574_v18 = vld [vmem:[#allocation5 + $0x40] sm:$0xf]  ;;  %v1805_v19 = vld [vmem:[#allocation5 + $0x44] sm:$0xf0] }
  0x1c   :  { %v1587_v17 = vor.u32 %v1806_v14, %v1584_v15  ;;  %v1804_v20 = vld [vmem:[#allocation5 + $0x44] sm:$0xf]  ;;  %v1576_v21 = vld [vmem:[#allocation5 + $0x48] sm:$0xf0]  ;;  %v1575_v22 = vor.u32 %v1805_v19, %v1574_v18  ;;  %v1566_v24 = vld [vmem:[#allocation5 + $0x30] sm:$0xf] }
  0x1d   :  { %v1579_v23 = vor.u32 %v1804_v20, %v1576_v21  ;;  %v1803_v25 = vld [vmem:[#allocation5 + $0x34] sm:$0xf0]  ;;  %v1802_v26 = vld [vmem:[#allocation5 + $0x34] sm:$0xf]  ;;  %v1568_v27 = vld [vmem:[#allocation5 + $0x38] sm:$0xf0] }
  0x1e   :  { %254 = vmatpush.bf16.msra.mxu0 %v1591_v10  ;;  %v1567_v28 = vor.u32 %v1803_v25, %v1566_v24  ;;  %v1571_v29 = vor.u32 %v1802_v26, %v1568_v27  ;;  %v1558_v30 = vld [vmem:[#allocation5 + $0x20] sm:$0xf]  ;;  %v1801_v31 = vld [vmem:[#allocation5 + $0x24] sm:$0xf0]  ;;  %v1800_v32 = vld [vmem:[#allocation5 + $0x24] sm:$0xf] }
  0x1f   :  { %343 = vmatpush.bf16.msra.mxu1 %v1595_v11  ;;  %v1560_v33 = vld [vmem:[#allocation5 + $0x28] sm:$0xf0]  ;;  %v1559_v34 = vor.u32 %v1801_v31, %v1558_v30  ;;  %v1550_v36 = vld [vmem:[#allocation5 + $0x10] sm:$0xf]  ;;  %v1799_v37 = vld [vmem:[#allocation5 + $0x14] sm:$0xf0] }
  0x20   :  { %v1563_v35 = vor.u32 %v1800_v32, %v1560_v33  ;;  %v1798_v38 = vld [vmem:[#allocation5 + $0x14] sm:$0xf]  ;;  %v1552_v39 = vld [vmem:[#allocation5 + $0x18] sm:$0xf0]  ;;  %v1551_v40 = vor.u32 %v1799_v37, %v1550_v36  ;;  %v1542_v42 = vld [vmem:[#allocation5] sm:$0xf] }
  0x21   :  { %v1555_v41 = vor.u32 %v1798_v38, %v1552_v39  ;;  %v1797_v43 = vld [vmem:[#allocation5 + $0x4] sm:$0xf0]  ;;  %v1796_v44 = vld [vmem:[#allocation5 + $0x4] sm:$0xf]  ;;  %v1544_v45 = vld [vmem:[#allocation5 + $0x8] sm:$0xf0] }
  0x22   :  { %255 = vmatpush.bf16.msra.mxu0 %v1583_v16  ;;  %v1826_v46 = vld [vmem:[#allocation8 + $0x74] sm:$0xf]  ;;  %v1664_v47 = vld [vmem:[#allocation8 + $0x78] sm:$0xf0]  ;;  %v1543_v50 = vor.u32 %v1797_v43, %v1542_v42  ;;  %v104_v52 = vld [vmem:[#allocation2 + $0x8] sm:$0xff]  ;;  %v1547_v53 = vor.u32 %v1796_v44, %v1544_v45  ;;  %s1525_s8 = sshll.u32 %s2466_s7, 4  ;;  %s1526_s8 = int_to_ptr.hbm [resolvable:$true] %s1525_s8 }
  0x23   :  { %344 = vmatpush.bf16.msra.mxu1 %v1587_v17  ;;  %v1842_v48 = vld [vmem:[#allocation8 + $0xf4] sm:$0xf]  ;;  %v1728_v49 = vld [vmem:[#allocation8 + $0xf8] sm:$0xf0]  ;;  %v1667_v54 = vor.u32 %v1826_v46, %v1664_v47  ;;  %v1824_v57 = vld [vmem:[#allocation8 + $0x64] sm:$0xf] }
  0x24   :  { %v103_v51 = vld [vmem:[#allocation2] sm:$0xff]  ;;  %v1731_v55 = vor.u32 %v1842_v48, %v1728_v49  ;;  %v1656_v58 = vld [vmem:[#allocation8 + $0x68] sm:$0xf0]  ;;  %v106_v0 = vld [vmem:[#allocation2 + $0x18] sm:$0xff] }
  0x25   :  { %v135_v56 = vpack.c.bf16 %v104_v52, %v103_v51  ;;  %v1840_v59 = vld [vmem:[#allocation8 + $0xe4] sm:$0xf]  ;;  %v1659_v60 = vor.u32 %v1824_v57, %v1656_v58  ;;  %v1720_v61 = vld [vmem:[#allocation8 + $0xe8] sm:$0xf0]  ;;  %v1822_v5 = vld [vmem:[#allocation8 + $0x54] sm:$0xf] }
  0x26   :  { %256 = vmatpush.bf16.msra.mxu0 %v1575_v22  ;;  %v1723_v62 = vor.u32 %v1840_v59, %v1720_v61  ;;  %v105_v63 = vld [vmem:[#allocation2 + $0x10] sm:$0xff]  ;;  %v107_v2 = vld [vmem:[#allocation2 + $0x20] sm:$0xff]  ;;  %v108_v3 = vld [vmem:[#allocation2 + $0x28] sm:$0xff] }
  0x27   :  { %345 = vmatpush.bf16.msra.mxu1 %v1579_v23  ;;  %v136_v1 = vpack.c.bf16 %v106_v0, %v105_v63  ;;  %v137_v4 = vpack.c.bf16 %v108_v3, %v107_v2  ;;  %v1648_v6 = vld [vmem:[#allocation8 + $0x58] sm:$0xf0]  ;;  %v1838_v7 = vld [vmem:[#allocation8 + $0xd4] sm:$0xf]  ;;  %v112_v15 = vld [vmem:[#allocation2 + $0x48] sm:$0xff] }
  0x28   :  { %v1651_v8 = vor.u32 %v1822_v5, %v1648_v6  ;;  %v1712_v9 = vld [vmem:[#allocation8 + $0xd8] sm:$0xf0]  ;;  %v109_v11 = vld [vmem:[#allocation2 + $0x30] sm:$0xff]  ;;  %v1820_v17 = vld [vmem:[#allocation8 + $0x44] sm:$0xf] }
  0x29   :  { %v1715_v10 = vor.u32 %v1838_v7, %v1712_v9  ;;  %v110_v12 = vld [vmem:[#allocation2 + $0x38] sm:$0xff]  ;;  %v111_v14 = vld [vmem:[#allocation2 + $0x40] sm:$0xff]  ;;  %v1640_v18 = vld [vmem:[#allocation8 + $0x48] sm:$0xf0] }
  0x2a   :  { %257 = vmatpush.bf16.msra.mxu0 %v1567_v28  ;;  %v138_v13 = vpack.c.bf16 %v110_v12, %v109_v11  ;;  %v139_v16 = vpack.c.bf16 %v112_v15, %v111_v14  ;;  %v1836_v19 = vld [vmem:[#allocation8 + $0xc4] sm:$0xf]  ;;  %v1643_v20 = vor.u32 %v1820_v17, %v1640_v18  ;;  %v1704_v21 = vld [vmem:[#allocation8 + $0xc8] sm:$0xf0]  ;;  %v1662_v22 = vld [vmem:[#allocation8 + $0x70] sm:$0xf] }
  0x2b   :  { %346 = vmatpush.bf16.msra.mxu1 %v1571_v29  ;;  %v1827_v23 = vld [vmem:[#allocation8 + $0x74] sm:$0xf0]  ;;  %v1707_v24 = vor.u32 %v1836_v19, %v1704_v21  ;;  %v1726_v26 = vld [vmem:[#allocation8 + $0xf0] sm:$0xf]  ;;  %v1654_v32 = vld [vmem:[#allocation8 + $0x60] sm:$0xf] }
  0x2c   :  { %v1663_v25 = vor.u32 %v1827_v23, %v1662_v22  ;;  %v1843_v27 = vld [vmem:[#allocation8 + $0xf4] sm:$0xf0]  ;;  %v113_v29 = vld [vmem:[#allocation2 + $0x50] sm:$0xff]  ;;  %v1825_v33 = vld [vmem:[#allocation8 + $0x64] sm:$0xf0] }
  0x2d   :  { %v1727_v28 = vor.u32 %v1843_v27, %v1726_v26  ;;  %v114_v30 = vld [vmem:[#allocation2 + $0x58] sm:$0xff]  ;;  %v1841_v36 = vld [vmem:[#allocation8 + $0xe4] sm:$0xf0]  ;;  %v1646_v38 = vld [vmem:[#allocation8 + $0x50] sm:$0xf] }
  0x2e   :  { %258 = vmatpush.bf16.msra.mxu0 %v1559_v34  ;;  %725 = vmatpush.bf16.msra.mxu2 %v1663_v25  ;;  %v140_v31 = vpack.c.bf16 %v114_v30, %v113_v29  ;;  %v1718_v34 = vld [vmem:[#allocation8 + $0xe0] sm:$0xf]  ;;  %v1823_v39 = vld [vmem:[#allocation8 + $0x54] sm:$0xf0]  ;;  %v1821_v45 = vld [vmem:[#allocation8 + $0x44] sm:$0xf0] }
  0x2f   :  { %347 = vmatpush.bf16.msra.mxu1 %v1563_v35  ;;  %814 = vmatpush.bf16.msra.mxu3 %v1727_v28  ;;  %v1655_v35 = vor.u32 %v1825_v33, %v1654_v32  ;;  %v1719_v37 = vor.u32 %v1841_v36, %v1718_v34  ;;  %v1839_v42 = vld [vmem:[#allocation8 + $0xd4] sm:$0xf0]  ;;  %v1638_v44 = vld [vmem:[#allocation8 + $0x40] sm:$0xf]  ;;  %v1837_v47 = vld [vmem:[#allocation8 + $0xc4] sm:$0xf0] }
  0x30   :  { %v1702_v46 = vld [vmem:[#allocation8 + $0xc0] sm:$0xf]  ;;  %v1639_v48 = vor.u32 %v1821_v45, %v1638_v44  ;;  %v116_v51 = vld [vmem:[#allocation2 + $0x68] sm:$0xff]  ;;  %v1630_v52 = vld [vmem:[#allocation8 + $0x30] sm:$0xf] }
  0x31   :  { %v1703_v49 = vor.u32 %v1837_v47, %v1702_v46  ;;  %v1835_v57 = vld [vmem:[#allocation8 + $0xb4] sm:$0xf0]  ;;  %v1622_v59 = vld [vmem:[#allocation8 + $0x20] sm:$0xf]  ;;  %v1833_v63 = vld [vmem:[#allocation8 + $0xa4] sm:$0xf0] }
  0x32   :  { %259 = vmatpush.bf16.msra.mxu0 %v1551_v40  ;;  %v1710_v40 = vld [vmem:[#allocation8 + $0xd0] sm:$0xf]  ;;  %726 = vmatpush.bf16.msra.mxu2 %v1655_v35  ;;  %v1818_v0 = vld [vmem:[#allocation8 + $0x34] sm:$0xf]  ;;  %v1696_v5 = vld [vmem:[#allocation8 + $0xb8] sm:$0xf0] }
  0x33   :  { %348 = vmatpush.bf16.msra.mxu1 %v1555_v41  ;;  %v1647_v41 = vor.u32 %v1823_v39, %v1646_v38  ;;  %815 = vmatpush.bf16.msra.mxu3 %v1719_v37  ;;  %v1711_v43 = vor.u32 %v1839_v42, %v1710_v40  ;;  %v1834_v3 = vld [vmem:[#allocation8 + $0xb4] sm:$0xf]  ;;  %v1614_v7 = vld [vmem:[#allocation8 + $0x10] sm:$0xf]  ;;  %v1831_v11 = vld [vmem:[#allocation8 + $0x94] sm:$0xf0] }
  0x34   :  { %v1699_v6 = vor.u32 %v1834_v3, %v1696_v5  ;;  %v1678_v9 = vld [vmem:[#allocation8 + $0x90] sm:$0xf]  ;;  %v1813_v14 = vld [vmem:[#allocation8 + $0x4] sm:$0xf0]  ;;  %v1670_v15 = vld [vmem:[#allocation8 + $0x80] sm:$0xf] }
  0x35   :  { %v1679_v12 = vor.u32 %v1831_v11, %v1678_v9  ;;  %v1829_v17 = vld [vmem:[#allocation8 + $0x84] sm:$0xf0]  ;;  %v117_v18 = vld [vmem:[#allocation2 + $0x70] sm:$0xff]  ;;  %v118_v19 = vld [vmem:[#allocation2 + $0x78] sm:$0xff] }
  0x36   :  { %260 = vmatpush.bf16.msra.mxu0 %v1543_v50  ;;  %727 = vmatpush.bf16.msra.mxu2 %v1647_v41  ;;  %v115_v50 = vld [vmem:[#allocation2 + $0x60] sm:$0xff]  ;;  %v142_v21 = vpack.c.bf16 %v118_v19, %v117_v18  ;;  %v120_v25 = vld [vmem:[#allocation2 + $0x88] sm:$0xff] }
  0x37   :  { %349 = vmatpush.bf16.msra.mxu1 %v1547_v53  ;;  %816 = vmatpush.bf16.msra.mxu3 %v1711_v43  ;;  %v1819_v53 = vld [vmem:[#allocation8 + $0x34] sm:$0xf0]  ;;  %v167_v27 = vld [vmem:[#allocation7] sm:$0x3]  ;;  %v1816_v32 = vld [vmem:[#allocation8 + $0x24] sm:$0xf] }
  0x38   :  { %v1851_v22 = vld [vmem:[#allocation10 + $0x38] sm:$0xff]  ;;  %v2097_v30 = vperm.slane %v167_v27, 0  ;;  %v1624_v33 = vld [vmem:[#allocation8 + $0x28] sm:$0xf0]  ;;  %v1832_v35 = vld [vmem:[#allocation8 + $0xa4] sm:$0xf] }
  0x39   :  { %261 = vmatmul.bf16.vlgmr.msra.gmra.mxu0 %v135_v56  ;;  %v1859_v23 = vld [vmem:[#allocation10 + $0x78] sm:$0xff]  ;;  %v1627_v34 = vor.u32 %v1816_v32, %v1624_v33  ;;  %v1688_v36 = vld [vmem:[#allocation8 + $0xa8] sm:$0xf0] }
  0x3a   :  { %903 = vmatpush.bf16.msrb.mxu0 %v1667_v54  ;;  %350 = vmatmul.bf16.vlgmr.msra.gmra.mxu1 %v135_v56  ;;  %v1694_v54 = vld [vmem:[#allocation8 + $0xb0] sm:$0xf]  ;;  %v1631_v56 = vor.u32 %v1819_v53, %v1630_v52  ;;  %v1691_v37 = vor.u32 %v1832_v35, %v1688_v36  ;;  %v123_v3 = vld [vmem:[#allocation2 + $0xa0] sm:$0xff]  ;;  %v1857_v36 = vld [vmem:[#allocation10 + $0x68] sm:$0xff] }
  0x3b   :  { %992 = vmatpush.bf16.msrb.mxu1 %v1731_v55  ;;  %728 = vmatpush.bf16.msra.mxu2 %v1639_v48  ;;  %v141_v55 = vpack.c.bf16 %v116_v51, %v115_v50  ;;  %v1695_v58 = vor.u32 %v1835_v57, %v1694_v54  ;;  %v121_v48 = vld [vmem:[#allocation2 + $0x90] sm:$0xff]  ;;  %v1616_v11 = vld [vmem:[#allocation8 + $0x18] sm:$0xf0] }
  0x3c   :  { %817 = vmatpush.bf16.msra.mxu3 %v1703_v49  ;;  %v122_v49 = vld [vmem:[#allocation2 + $0x98] sm:$0xff] }
  0x3d   :  { %v144_v52 = vpack.c.bf16 %v122_v49, %v121_v48  ;;  %v1850_v54 = vld [vmem:[#allocation10 + $0x30] sm:$0xff]  ;;  %v128_v48 = vld [vmem:[#allocation2 + $0xc8] sm:$0xff] }
  0x3e   :  { %904 = vmatpush.bf16.msrb.mxu0 %v1659_v60  ;;  %v1817_v60 = vld [vmem:[#allocation8 + $0x24] sm:$0xf0] }
  0x3f   :  { %993 = vmatpush.bf16.msrb.mxu1 %v1723_v62  ;;  %729 = vmatpush.bf16.msra.mxu2 %v1631_v56  ;;  %v1623_v61 = vor.u32 %v1817_v60, %v1622_v59  ;;  %v1686_v62 = vld [vmem:[#allocation8 + $0xa0] sm:$0xf]  ;;  %v1858_v56 = vld [vmem:[#allocation10 + $0x70] sm:$0xff] }
  0x40   :  { %818 = vmatpush.bf16.msra.mxu3 %v1695_v58  ;;  %v1687_v2 = vor.u32 %v1833_v63, %v1686_v62 }
  0x42   :  { %905 = vmatpush.bf16.msrb.mxu0 %v1651_v8  ;;  %v1815_v8 = vld [vmem:[#allocation8 + $0x14] sm:$0xf0] }
  0x43   :  { %994 = vmatpush.bf16.msrb.mxu1 %v1715_v10  ;;  %730 = vmatpush.bf16.msra.mxu2 %v1623_v61  ;;  %v1615_v10 = vor.u32 %v1815_v8, %v1614_v7 }
  0x44   :  { %819 = vmatpush.bf16.msra.mxu3 %v1687_v2 }
  0x46   :  { %906 = vmatpush.bf16.msrb.mxu0 %v1643_v20  ;;  %v1671_v20 = vor.u32 %v1829_v17, %v1670_v15 }
  0x47   :  { %995 = vmatpush.bf16.msrb.mxu1 %v1707_v24  ;;  %731 = vmatpush.bf16.msra.mxu2 %v1615_v10  ;;  %v119_v24 = vld [vmem:[#allocation2 + $0x80] sm:$0xff]  ;;  %v1814_v10 = vld [vmem:[#allocation8 + $0x14] sm:$0xf] }
  0x48   :  { %820 = vmatpush.bf16.msra.mxu3 %v1679_v12  ;;  %v143_v26 = vpack.c.bf16 %v120_v25, %v119_v24  ;;  %v1619_v12 = vor.u32 %v1814_v10, %v1616_v11  ;;  %v129_v10 = vld [vmem:[#allocation2 + $0xd0] sm:$0xff]  ;;  %v130_v11 = vld [vmem:[#allocation2 + $0xd8] sm:$0xff] }
  0x49   :  { %266 = vmatmul.bf16.gmra.mxu0 %v136_v1 }
  0x4a   :  { %355 = vmatmul.bf16.gmra.mxu1 %v136_v1  ;;  %v1632_v1 = vld [vmem:[#allocation8 + $0x38] sm:$0xf0] }
  0x4b   :  { %996 = vmatpush.bf16.msrb.mxu1 %v1699_v6 }
  0x4c   :  { %821 = vmatpush.bf16.msra.mxu3 %v1671_v20 }
  0x4f   :  { %997 = vmatpush.bf16.msrb.mxu1 %v1691_v37 }
  0x50   :  { %1398 = vmatpush.bf16.msrb.mxu3 %v1859_v23 }
  0x54   :  { %1399 = vmatpush.bf16.msrb.mxu3 %v1858_v56  ;;  %v1812_v56 = vld [vmem:[#allocation8 + $0x4] sm:$0xf] }
  0x58   :  { %1400 = vmatpush.bf16.msrb.mxu3 %v1857_v36 }
  0x59   :  { %271 = vmatmul.bf16.gmra.mxu0 %v137_v4 }
  0x5a   :  { %360 = vmatmul.bf16.gmra.mxu1 %v137_v4  ;;  %v1635_v4 = vor.u32 %v1818_v0, %v1632_v1 }
  0x5c   :  { %907 = vmatpush.bf16.msrb.mxu0 %v1635_v4  ;;  %v124_v4 = vld [vmem:[#allocation2 + $0xa8] sm:$0xff] }
  0x5d   :  { %v145_v7 = vpack.c.bf16 %v124_v4, %v123_v3 }
  0x60   :  { %908 = vmatpush.bf16.msrb.mxu0 %v1627_v34  ;;  %v1849_v34 = vld [vmem:[#allocation10 + $0x28] sm:$0xff] }
  0x64   :  { %909 = vmatpush.bf16.msrb.mxu0 %v1619_v12 }
  0x69   :  { %276 = vmatmul.bf16.gmra.mxu0 %v138_v13 }
  0x6a   :  { %365 = vmatmul.bf16.gmra.mxu1 %v138_v13  ;;  %v1606_v13 = vld [vmem:[#allocation8] sm:$0xf] }
  0x79   :  { %281 = vmatmul.bf16.gmra.mxu0 %v139_v16 }
  0x7a   :  { %370 = vmatmul.bf16.gmra.mxu1 %v139_v16  ;;  %v1607_v16 = vor.u32 %v1813_v14, %v1606_v13  ;;  %v1830_v13 = vld [vmem:[#allocation8 + $0x94] sm:$0xf]  ;;  %v1680_v14 = vld [vmem:[#allocation8 + $0x98] sm:$0xf0] }
  0x7b   :  { %v1683_v15 = vor.u32 %v1830_v13, %v1680_v14  ;;  %v148_v14 = vpack.c.bf16 %v130_v11, %v129_v10 }
  0x7c   :  { %732 = vmatpush.bf16.msra.mxu2 %v1607_v16 }
  0x7d   :  { %998 = vmatpush.bf16.msrb.mxu1 %v1683_v15 }
  0x80   :  { %1309 = vmatpush.bf16.msrb.mxu2 %v1851_v22 }
  0x84   :  { %1310 = vmatpush.bf16.msrb.mxu2 %v1850_v54 }
  0x88   :  { %1311 = vmatpush.bf16.msrb.mxu2 %v1849_v34  ;;  %v132_v34 = vld [vmem:[#allocation2 + $0xe8] sm:$0xff] }
  0x89   :  { %286 = vmatmul.bf16.gmra.mxu0 %v140_v31 }
  0x8a   :  { %375 = vmatmul.bf16.gmra.mxu1 %v140_v31  ;;  %v2099_v31 = vperm.slane %v167_v27, 1  ;;  %v126_v27 = vld [vmem:[#allocation2 + $0xb8] sm:$0xff] }
  0x99   :  { %291 = vmatmul.bf16.gmra.mxu0 %v141_v55 }
  0x9a   :  { %380 = vmatmul.bf16.gmra.mxu1 %v141_v55 }
  0xa9   :  { %296 = vmatmul.bf16.gmra.mxu0 %v142_v21 }
  0xaa   :  { %385 = vmatmul.bf16.gmra.mxu1 %v142_v21 }
  0xb6   :  { %v262_v28 = vpop.f32.mrf.mxu0 }
  0xb7   :  { %v351_v29 = vpop.f32.mrf.mxu1  ;;  %v263_v38 = vadd.f32 %v262_v28, %v2097_v30 }
  0xb8   :  { %v352_v39 = vadd.f32 %v351_v29, %v2099_v31 }
  0xb9   :  { %301 = vmatmul.bf16.gmra.mxu0 %v143_v26  ;;  %v431_v44 = vmax.f32 %v263_v38, 0.0 }
  0xba   :  { %390 = vmatmul.bf16.gmra.mxu1 %v143_v26  ;;  %v432_v46 = vmax.f32 %v352_v39, 0.0  ;;  %v125_v26 = vld [vmem:[#allocation2 + $0xb0] sm:$0xff] }
  0xbb   :  { %v146_v32 = vpack.c.bf16 %v126_v27, %v125_v26 }
  0xbe   :  { %v264_v40 = vpop.f32.mrf.mxu0 }
  0xbf   :  { %v265_v41 = vadd.f32 %v264_v40, %v2097_v30  ;;  %v353_v42 = vpop.f32.mrf.mxu1 }
  0xc0   :  { %v354_v43 = vadd.f32 %v353_v42, %v2099_v31 }
  0xc1   :  { %v433_v45 = vmax.f32 %v265_v41, 0.0 }
  0xc2   :  { %v434_v47 = vmax.f32 %v354_v43, 0.0 }
  0xc3   :  { %v2105_v50 = vpack.c.bf16 %v433_v45, %v431_v44 }
  0xc4   :  { %v2107_v51 = vpack.c.bf16 %v434_v47, %v432_v46  ;;  %v127_v47 = vld [vmem:[#allocation2 + $0xc0] sm:$0xff] }
  0xc5   :  { %733 = vmatmul.bf16.vlgmr.msra.gmra.mxu2 %v2105_v50 }
  0xc6   :  { %822 = vmatmul.bf16.vlgmr.msra.gmra.mxu3 %v2107_v51  ;;  %v267_v53 = vpop.f32.mrf.mxu0 }
  0xc7   :  { %v356_v55 = vpop.f32.mrf.mxu1  ;;  %v268_v57 = vadd.f32 %v267_v53, %v2097_v30  ;;  %v147_v53 = vpack.c.bf16 %v128_v48, %v127_v47 }
  0xc8   :  { %v357_v58 = vadd.f32 %v356_v55, %v2099_v31 }
  0xc9   :  { %306 = vmatmul.bf16.gmra.mxu0 %v144_v52  ;;  %v435_v63 = vmax.f32 %v268_v57, 0.0  ;;  %v1608_v57 = vld [vmem:[#allocation8 + $0x8] sm:$0xf0] }
  0xca   :  { %395 = vmatmul.bf16.gmra.mxu1 %v144_v52  ;;  %v436_v1 = vmax.f32 %v357_v58, 0.0  ;;  %v1611_v58 = vor.u32 %v1812_v56, %v1608_v57 }
  0xcc   :  { %910 = vmatpush.bf16.msrb.mxu0 %v1611_v58 }
  0xce   :  { %v269_v59 = vpop.f32.mrf.mxu0 }
  0xcf   :  { %v270_v60 = vadd.f32 %v269_v59, %v2097_v30  ;;  %v358_v61 = vpop.f32.mrf.mxu1  ;;  %v1828_v59 = vld [vmem:[#allocation8 + $0x84] sm:$0xf] }
  0xd0   :  { %v359_v62 = vadd.f32 %v358_v61, %v2099_v31 }
  0xd1   :  { %v437_v0 = vmax.f32 %v270_v60, 0.0  ;;  %v1672_v60 = vld [vmem:[#allocation8 + $0x88] sm:$0xf0] }
  0xd2   :  { %v438_v2 = vmax.f32 %v359_v62, 0.0  ;;  %v1675_v61 = vor.u32 %v1828_v59, %v1672_v60  ;;  %v1847_v60 = vld [vmem:[#allocation10 + $0x18] sm:$0xff] }
  0xd3   :  { %v2115_v5 = vpack.c.bf16 %v437_v0, %v435_v63 }
  0xd4   :  { %v2117_v6 = vpack.c.bf16 %v438_v2, %v436_v1  ;;  %999 = vmatpush.bf16.msrb.mxu1 %v1675_v61 }
  0xd5   :  { %738 = vmatmul.bf16.gmra.mxu2 %v2115_v5 }
  0xd6   :  { %827 = vmatmul.bf16.gmra.mxu3 %v2117_v6  ;;  %v272_v8 = vpop.f32.mrf.mxu0 }
  0xd7   :  { %v361_v9 = vpop.f32.mrf.mxu1  ;;  %v273_v16 = vadd.f32 %v272_v8, %v2097_v30 }
  0xd8   :  { %v362_v17 = vadd.f32 %v361_v9, %v2099_v31 }
  0xd9   :  { %311 = vmatmul.bf16.gmra.mxu0 %v145_v7  ;;  %v439_v22 = vmax.f32 %v273_v16, 0.0  ;;  %v1848_v16 = vld [vmem:[#allocation10 + $0x20] sm:$0xff] }
  0xda   :  { %400 = vmatmul.bf16.gmra.mxu1 %v145_v7  ;;  %v440_v24 = vmax.f32 %v362_v17, 0.0  ;;  %1312 = vmatpush.bf16.msrb.mxu2 %v1848_v16 }
  0xde   :  { %v274_v18 = vpop.f32.mrf.mxu0  ;;  %1313 = vmatpush.bf16.msrb.mxu2 %v1847_v60 }
  0xdf   :  { %v275_v19 = vadd.f32 %v274_v18, %v2097_v30  ;;  %v363_v20 = vpop.f32.mrf.mxu1  ;;  %v1856_v18 = vld [vmem:[#allocation10 + $0x60] sm:$0xff] }
  0xe0   :  { %v364_v21 = vadd.f32 %v363_v20, %v2099_v31  ;;  %1401 = vmatpush.bf16.msrb.mxu3 %v1856_v18 }
  0xe1   :  { %v441_v23 = vmax.f32 %v275_v19, 0.0 }
  0xe2   :  { %v442_v25 = vmax.f32 %v364_v21, 0.0 }
  0xe3   :  { %v2125_v28 = vpack.c.bf16 %v441_v23, %v439_v22 }
  0xe4   :  { %v2127_v29 = vpack.c.bf16 %v442_v25, %v440_v24 }
  0xe5   :  { %743 = vmatmul.bf16.gmra.mxu2 %v2125_v28 }
  0xe6   :  { %832 = vmatmul.bf16.gmra.mxu3 %v2127_v29  ;;  %v277_v33 = vpop.f32.mrf.mxu0 }
  0xe7   :  { %v366_v35 = vpop.f32.mrf.mxu1  ;;  %v278_v37 = vadd.f32 %v277_v33, %v2097_v30  ;;  %v131_v33 = vld [vmem:[#allocation2 + $0xe0] sm:$0xff] }
  0xe8   :  { %v367_v38 = vadd.f32 %v366_v35, %v2099_v31 }
  0xe9   :  { %316 = vmatmul.bf16.gmra.mxu0 %v146_v32  ;;  %v443_v43 = vmax.f32 %v278_v37, 0.0  ;;  %v149_v37 = vpack.c.bf16 %v132_v34, %v131_v33  ;;  %v1846_v34 = vld [vmem:[#allocation10 + $0x10] sm:$0xff] }
  0xea   :  { %405 = vmatmul.bf16.gmra.mxu1 %v146_v32  ;;  %v444_v45 = vmax.f32 %v367_v38, 0.0  ;;  %1314 = vmatpush.bf16.msrb.mxu2 %v1846_v34 }
  0xee   :  { %v279_v39 = vpop.f32.mrf.mxu0 }
  0xef   :  { %v280_v40 = vadd.f32 %v279_v39, %v2097_v30  ;;  %v368_v41 = vpop.f32.mrf.mxu1 }
  0xf0   :  { %v369_v42 = vadd.f32 %v368_v41, %v2099_v31 }
  0xf1   :  { %v445_v44 = vmax.f32 %v280_v40, 0.0 }
  0xf2   :  { %v446_v46 = vmax.f32 %v369_v42, 0.0 }
  0xf3   :  { %v2135_v49 = vpack.c.bf16 %v445_v44, %v443_v43 }
  0xf4   :  { %v2137_v52 = vpack.c.bf16 %v446_v46, %v444_v45 }
  0xf5   :  { %748 = vmatmul.bf16.gmra.mxu2 %v2135_v49 }
  0xf6   :  { %837 = vmatmul.bf16.gmra.mxu3 %v2137_v52  ;;  %v282_v54 = vpop.f32.mrf.mxu0 }
  0xf7   :  { %v371_v55 = vpop.f32.mrf.mxu1  ;;  %v283_v62 = vadd.f32 %v282_v54, %v2097_v30  ;;  %v133_v54 = vld [vmem:[#allocation2 + $0xf0] sm:$0xff] }
  0xf8   :  { %v372_v63 = vadd.f32 %v371_v55, %v2099_v31  ;;  %v134_v55 = vld [vmem:[#allocation2 + $0xf8] sm:$0xff] }
  0xf9   :  { %321 = vmatmul.bf16.gmra.mxu0 %v147_v53  ;;  %v447_v4 = vmax.f32 %v283_v62, 0.0  ;;  %v150_v58 = vpack.c.bf16 %v134_v55, %v133_v54  ;;  %v1855_v62 = vld [vmem:[#allocation10 + $0x58] sm:$0xff] }
  0xfa   :  { %410 = vmatmul.bf16.gmra.mxu1 %v147_v53  ;;  %v448_v8 = vmax.f32 %v372_v63, 0.0  ;;  %1402 = vmatpush.bf16.msrb.mxu3 %v1855_v62 }
  0xfe   :  { %v284_v0 = vpop.f32.mrf.mxu0 }
  0xff   :  { %v285_v1 = vadd.f32 %v284_v0, %v2097_v30  ;;  %v373_v2 = vpop.f32.mrf.mxu1 }
 0x100   :  { %v374_v3 = vadd.f32 %v373_v2, %v2099_v31 }
 0x101   :  { %v449_v7 = vmax.f32 %v285_v1, 0.0 }
 0x102   :  { %v450_v9 = vmax.f32 %v374_v3, 0.0 }
 0x103   :  { %v2145_v12 = vpack.c.bf16 %v449_v7, %v447_v4 }
 0x104   :  { %v2147_v13 = vpack.c.bf16 %v450_v9, %v448_v8 }
 0x105   :  { %753 = vmatmul.bf16.gmra.mxu2 %v2145_v12 }
 0x106   :  { %842 = vmatmul.bf16.gmra.mxu3 %v2147_v13  ;;  %v287_v15 = vpop.f32.mrf.mxu0 }
 0x107   :  { %v376_v17 = vpop.f32.mrf.mxu1  ;;  %v288_v19 = vadd.f32 %v287_v15, %v2097_v30 }
 0x108   :  { %v377_v20 = vadd.f32 %v376_v17, %v2099_v31 }
 0x109   :  { %326 = vmatmul.bf16.gmra.mxu0 %v148_v14  ;;  %v451_v25 = vmax.f32 %v288_v19, 0.0 }
 0x10a   :  { %415 = vmatmul.bf16.gmra.mxu1 %v148_v14  ;;  %v452_v27 = vmax.f32 %v377_v20, 0.0 }
 0x10e   :  { %v289_v21 = vpop.f32.mrf.mxu0 }
 0x10f   :  { %v290_v22 = vadd.f32 %v289_v21, %v2097_v30  ;;  %v378_v23 = vpop.f32.mrf.mxu1 }
 0x110   :  { %v379_v24 = vadd.f32 %v378_v23, %v2099_v31 }
 0x111   :  { %v453_v26 = vmax.f32 %v290_v22, 0.0 }
 0x112   :  { %v454_v32 = vmax.f32 %v379_v24, 0.0 }
 0x113   :  { %v2155_v35 = vpack.c.bf16 %v453_v26, %v451_v25 }
 0x114   :  { %v2157_v36 = vpack.c.bf16 %v454_v32, %v452_v27 }
 0x115   :  { %758 = vmatmul.bf16.gmra.mxu2 %v2155_v35 }
 0x116   :  { %847 = vmatmul.bf16.gmra.mxu3 %v2157_v36  ;;  %v292_v38 = vpop.f32.mrf.mxu0 }
 0x117   :  { %v381_v39 = vpop.f32.mrf.mxu1  ;;  %v293_v40 = vadd.f32 %v292_v38, %v2097_v30 }
 0x118   :  { %v382_v41 = vadd.f32 %v381_v39, %v2099_v31 }
 0x119   :  { %331 = vmatmul.bf16.gmra.mxu0 %v149_v37  ;;  %v455_v46 = vmax.f32 %v293_v40, 0.0 }
 0x11a   :  { %420 = vmatmul.bf16.gmra.mxu1 %v149_v37  ;;  %v456_v48 = vmax.f32 %v382_v41, 0.0  ;;  %v1854_v41 = vld [vmem:[#allocation10 + $0x50] sm:$0xff] }
 0x11b   :  { %1403 = vmatpush.bf16.msrb.mxu3 %v1854_v41 }
 0x11e   :  { %v294_v42 = vpop.f32.mrf.mxu0 }
 0x11f   :  { %v295_v43 = vadd.f32 %v294_v42, %v2097_v30  ;;  %v383_v44 = vpop.f32.mrf.mxu1 }
 0x120   :  { %v384_v45 = vadd.f32 %v383_v44, %v2099_v31 }
 0x121   :  { %v457_v47 = vmax.f32 %v295_v43, 0.0 }
 0x122   :  { %v458_v53 = vmax.f32 %v384_v45, 0.0 }
 0x123   :  { %v2165_v56 = vpack.c.bf16 %v457_v47, %v455_v46 }
 0x124   :  { %v2167_v57 = vpack.c.bf16 %v458_v53, %v456_v48 }
 0x125   :  { %763 = vmatmul.bf16.gmra.mxu2 %v2165_v56 }
 0x126   :  { %852 = vmatmul.bf16.gmra.mxu3 %v2167_v57  ;;  %v297_v59 = vpop.f32.mrf.mxu0 }
 0x127   :  { %v386_v61 = vpop.f32.mrf.mxu1  ;;  %v298_v63 = vadd.f32 %v297_v59, %v2097_v30 }
 0x128   :  { %v387_v0 = vadd.f32 %v386_v61, %v2099_v31 }
 0x129   :  { %336 = vmatmul.bf16.gmra.mxu0 %v150_v58  ;;  %v459_v7 = vmax.f32 %v298_v63, 0.0 }
 0x12a   :  { %425 = vmatmul.bf16.gmra.mxu1 %v150_v58  ;;  %v460_v9 = vmax.f32 %v387_v0, 0.0 }
 0x12e   :  { %v299_v1 = vpop.f32.mrf.mxu0 }
 0x12f   :  { %v300_v2 = vadd.f32 %v299_v1, %v2097_v30  ;;  %v388_v3 = vpop.f32.mrf.mxu1 }
 0x130   :  { %v389_v4 = vadd.f32 %v388_v3, %v2099_v31 }
 0x131   :  { %v461_v8 = vmax.f32 %v300_v2, 0.0 }
 0x132   :  { %v462_v10 = vmax.f32 %v389_v4, 0.0 }
 0x133   :  { %v2175_v11 = vpack.c.bf16 %v461_v8, %v459_v7 }
 0x134   :  { %v2177_v14 = vpack.c.bf16 %v462_v10, %v460_v9 }
 0x135   :  { %768 = vmatmul.bf16.gmra.mxu2 %v2175_v11 }
 0x136   :  { %857 = vmatmul.bf16.gmra.mxu3 %v2177_v14  ;;  %v302_v15 = vpop.f32.mrf.mxu0 }
 0x137   :  { %v391_v16 = vpop.f32.mrf.mxu1  ;;  %v303_v17 = vadd.f32 %v302_v15, %v2097_v30 }
 0x138   :  { %v392_v18 = vadd.f32 %v391_v16, %v2099_v31 }
 0x139   :  { %911 = vmatmul.bf16.vlgmr.msrb.gmra.mxu0 %v2105_v50  ;;  %v463_v23 = vmax.f32 %v303_v17, 0.0  ;;  %v2190_v50 = vld [vmem:[%s2463_s4] sm:$0x3] }
 0x13a   :  { %1000 = vmatmul.bf16.vlgmr.msrb.gmra.mxu1 %v2107_v51  ;;  %v464_v25 = vmax.f32 %v392_v18, 0.0  ;;  %v2198_v32 = vperm.slane %v2190_v50, 0 }
 0x13e   :  { %v304_v19 = vpop.f32.mrf.mxu0 }
 0x13f   :  { %v305_v20 = vadd.f32 %v304_v19, %v2097_v30  ;;  %v393_v21 = vpop.f32.mrf.mxu1 }
 0x140   :  { %v394_v22 = vadd.f32 %v393_v21, %v2099_v31 }
 0x141   :  { %v465_v24 = vmax.f32 %v305_v20, 0.0 }
 0x142   :  { %v466_v26 = vmax.f32 %v394_v22, 0.0 }
 0x143   :  { %v2192_v51 = vpack.c.bf16 %v465_v24, %v463_v23 }
 0x144   :  { %v2194_v27 = vpack.c.bf16 %v466_v26, %v464_v25 }
 0x145   :  { %773 = vmatmul.bf16.gmra.mxu2 %v2192_v51 }
 0x146   :  { %862 = vmatmul.bf16.gmra.mxu3 %v2194_v27  ;;  %v307_v33 = vpop.f32.mrf.mxu0 }
 0x147   :  { %v396_v37 = vpop.f32.mrf.mxu1  ;;  %v308_v43 = vadd.f32 %v307_v33, %v2097_v30 }
 0x148   :  { %v734_v38 = vpop.f32.mrf.mxu2  ;;  %v397_v44 = vadd.f32 %v396_v37, %v2099_v31 }
 0x149   :  { %v735_v39 = vadd.f32 %v734_v38, %v2198_v32  ;;  %v823_v40 = vpop.f32.mrf.mxu3  ;;  %916 = vmatmul.bf16.gmra.mxu0 %v2115_v5  ;;  %v467_v54 = vmax.f32 %v308_v43, 0.0 }
 0x14a   :  { %1005 = vmatmul.bf16.gmra.mxu1 %v2117_v6  ;;  %v468_v6 = vmax.f32 %v397_v44, 0.0 }
 0x14b   :  { %v824_v42 = vadd.f32 %v823_v40, %v735_v39  ;;  %v1845_v39 = vld [vmem:[#allocation10 + $0x8] sm:$0xff] }
 0x14c   :  { %1315 = vmatpush.bf16.msrb.mxu2 %v1845_v39 }
 0x14d   :  { %v1081_v63 = vmax.f32 %v824_v42, 0.0 }
 0x14e   :  { %v309_v45 = vpop.f32.mrf.mxu0 }
 0x14f   :  { %v310_v46 = vadd.f32 %v309_v45, %v2097_v30  ;;  %v398_v47 = vpop.f32.mrf.mxu1  ;;  %v1853_v45 = vld [vmem:[#allocation10 + $0x48] sm:$0xff] }
 0x150   :  { %v399_v48 = vadd.f32 %v398_v47, %v2099_v31  ;;  %v736_v53 = vpop.f32.mrf.mxu2  ;;  %1404 = vmatpush.bf16.msrb.mxu3 %v1853_v45  ;;  %v1844_v45 = vld [vmem:[#allocation10] sm:$0xff] }
 0x151   :  { %v469_v55 = vmax.f32 %v310_v46, 0.0  ;;  %v737_v5 = vadd.f32 %v736_v53, %v2198_v32  ;;  %v825_v58 = vpop.f32.mrf.mxu3  ;;  %1316 = vmatpush.bf16.msrb.mxu2 %v1844_v45 }
 0x152   :  { %v470_v59 = vmax.f32 %v399_v48, 0.0 }
 0x153   :  { %v826_v60 = vadd.f32 %v825_v58, %v737_v5  ;;  %v2209_v61 = vpack.c.bf16 %v469_v55, %v467_v54 }
 0x154   :  { %v2211_v62 = vpack.c.bf16 %v470_v59, %v468_v6 }
 0x155   :  { %v1083_v0 = vmax.f32 %v826_v60, 0.0  ;;  %778 = vmatmul.bf16.gmra.mxu2 %v2209_v61 }
 0x156   :  { %867 = vmatmul.bf16.gmra.mxu3 %v2211_v62  ;;  %v312_v1 = vpop.f32.mrf.mxu0 }
 0x157   :  { %v2215_v2 = vpack.c.bf16 %v1083_v0, %v1081_v63  ;;  %v401_v3 = vpop.f32.mrf.mxu1  ;;  %v313_v10 = vadd.f32 %v312_v1, %v2097_v30 }
 0x158   :  { %v739_v4 = vpop.f32.mrf.mxu2  ;;  %v402_v15 = vadd.f32 %v401_v3, %v2099_v31 }
 0x159   :  { %v740_v7 = vadd.f32 %v739_v4, %v2198_v32  ;;  %v828_v8 = vpop.f32.mrf.mxu3  ;;  %921 = vmatmul.bf16.gmra.mxu0 %v2125_v28  ;;  %v471_v21 = vmax.f32 %v313_v10, 0.0 }
 0x15a   :  { %1010 = vmatmul.bf16.gmra.mxu1 %v2127_v29  ;;  %v472_v28 = vmax.f32 %v402_v15, 0.0 }
 0x15b   :  { %v829_v9 = vadd.f32 %v828_v8, %v740_v7 }
 0x15d   :  { %v1085_v34 = vmax.f32 %v829_v9, 0.0 }
 0x15e   :  { %v314_v16 = vpop.f32.mrf.mxu0 }
 0x15f   :  { %v315_v17 = vadd.f32 %v314_v16, %v2097_v30  ;;  %v403_v18 = vpop.f32.mrf.mxu1 }
 0x160   :  { %v404_v19 = vadd.f32 %v403_v18, %v2099_v31  ;;  %v741_v20 = vpop.f32.mrf.mxu2 }
 0x161   :  { %v473_v22 = vmax.f32 %v315_v17, 0.0  ;;  %v742_v23 = vadd.f32 %v741_v20, %v2198_v32  ;;  %v830_v24 = vpop.f32.mrf.mxu3 }
 0x162   :  { %v474_v25 = vmax.f32 %v404_v19, 0.0 }
 0x163   :  { %v831_v29 = vadd.f32 %v830_v24, %v742_v23  ;;  %v2225_v26 = vpack.c.bf16 %v473_v22, %v471_v21 }
 0x164   :  { %v2227_v33 = vpack.c.bf16 %v474_v25, %v472_v28 }
 0x165   :  { %v1087_v37 = vmax.f32 %v831_v29, 0.0  ;;  %783 = vmatmul.bf16.gmra.mxu2 %v2225_v26 }
 0x166   :  { %872 = vmatmul.bf16.gmra.mxu3 %v2227_v33  ;;  %v317_v38 = vpop.f32.mrf.mxu0 }
 0x167   :  { %v406_v40 = vpop.f32.mrf.mxu1  ;;  %v2231_v41 = vpack.c.bf16 %v1087_v37, %v1085_v34  ;;  %v318_v47 = vadd.f32 %v317_v38, %v2097_v30 }
 0x168   :  { %v744_v42 = vpop.f32.mrf.mxu2  ;;  %v407_v48 = vadd.f32 %v406_v40, %v2099_v31 }
 0x169   :  { %v745_v43 = vadd.f32 %v744_v42, %v2198_v32  ;;  %v833_v44 = vpop.f32.mrf.mxu3  ;;  %926 = vmatmul.bf16.gmra.mxu0 %v2135_v49  ;;  %v475_v6 = vmax.f32 %v318_v47, 0.0 }
 0x16a   :  { %1015 = vmatmul.bf16.gmra.mxu1 %v2137_v52  ;;  %v476_v52 = vmax.f32 %v407_v48, 0.0 }
 0x16b   :  { %v834_v46 = vadd.f32 %v833_v44, %v745_v43 }
 0x16d   :  { %v1089_v4 = vmax.f32 %v834_v46, 0.0 }
 0x16e   :  { %v319_v53 = vpop.f32.mrf.mxu0 }
 0x16f   :  { %v320_v54 = vadd.f32 %v319_v53, %v2097_v30  ;;  %v408_v55 = vpop.f32.mrf.mxu1 }
 0x170   :  { %v409_v5 = vadd.f32 %v408_v55, %v2099_v31  ;;  %v746_v58 = vpop.f32.mrf.mxu2  ;;  %v1852_v55 = vld [vmem:[#allocation10 + $0x40] sm:$0xff] }
 0x171   :  { %v477_v59 = vmax.f32 %v320_v54, 0.0  ;;  %v747_v49 = vadd.f32 %v746_v58, %v2198_v32  ;;  %v835_v60 = vpop.f32.mrf.mxu3  ;;  %1405 = vmatpush.bf16.msrb.mxu3 %v1852_v55 }
 0x172   :  { %v478_v63 = vmax.f32 %v409_v5, 0.0 }
 0x173   :  { %v836_v0 = vadd.f32 %v835_v60, %v747_v49  ;;  %v2241_v1 = vpack.c.bf16 %v477_v59, %v475_v6 }
 0x174   :  { %v2243_v3 = vpack.c.bf16 %v478_v63, %v476_v52 }
 0x175   :  { %v1091_v7 = vmax.f32 %v836_v0, 0.0  ;;  %788 = vmatmul.bf16.gmra.mxu2 %v2241_v1 }
 0x176   :  { %877 = vmatmul.bf16.gmra.mxu3 %v2243_v3  ;;  %v322_v8 = vpop.f32.mrf.mxu0 }
 0x177   :  { %v411_v9 = vpop.f32.mrf.mxu1  ;;  %v2247_v10 = vpack.c.bf16 %v1091_v7, %v1089_v4  ;;  %v323_v19 = vadd.f32 %v322_v8, %v2097_v30 }
 0x178   :  { %v749_v15 = vpop.f32.mrf.mxu2  ;;  %v412_v20 = vadd.f32 %v411_v9, %v2099_v31 }
 0x179   :  { %v750_v16 = vadd.f32 %v749_v15, %v2198_v32  ;;  %v838_v17 = vpop.f32.mrf.mxu3  ;;  %931 = vmatmul.bf16.gmra.mxu0 %v2145_v12  ;;  %v479_v25 = vmax.f32 %v323_v19, 0.0 }
 0x17a   :  { %1020 = vmatmul.bf16.gmra.mxu1 %v2147_v13  ;;  %v480_v12 = vmax.f32 %v412_v20, 0.0 }
 0x17b   :  { %v839_v18 = vadd.f32 %v838_v17, %v750_v16 }
 0x17d   :  { %v1093_v42 = vmax.f32 %v839_v18, 0.0 }
 0x17e   :  { %v324_v21 = vpop.f32.mrf.mxu0 }
 0x17f   :  { %v325_v22 = vadd.f32 %v324_v21, %v2097_v30  ;;  %v413_v23 = vpop.f32.mrf.mxu1 }
 0x180   :  { %v414_v24 = vadd.f32 %v413_v23, %v2099_v31  ;;  %v751_v28 = vpop.f32.mrf.mxu2 }
 0x181   :  { %v481_v29 = vmax.f32 %v325_v22, 0.0  ;;  %v752_v34 = vadd.f32 %v751_v28, %v2198_v32  ;;  %v840_v37 = vpop.f32.mrf.mxu3 }
 0x182   :  { %v482_v38 = vmax.f32 %v414_v24, 0.0 }
 0x183   :  { %v841_v13 = vadd.f32 %v840_v37, %v752_v34  ;;  %v2257_v39 = vpack.c.bf16 %v481_v29, %v479_v25 }
 0x184   :  { %v2259_v40 = vpack.c.bf16 %v482_v38, %v480_v12 }
 0x185   :  { %v1095_v43 = vmax.f32 %v841_v13, 0.0  ;;  %793 = vmatmul.bf16.gmra.mxu2 %v2257_v39 }
 0x186   :  { %882 = vmatmul.bf16.gmra.mxu3 %v2259_v40  ;;  %v327_v44 = vpop.f32.mrf.mxu0 }
 0x187   :  { %v416_v46 = vpop.f32.mrf.mxu1  ;;  %v2263_v47 = vpack.c.bf16 %v1095_v43, %v1093_v42  ;;  %v328_v58 = vadd.f32 %v327_v44, %v2097_v30 }
 0x188   :  { %v754_v48 = vpop.f32.mrf.mxu2  ;;  %v417_v6 = vadd.f32 %v416_v46, %v2099_v31 }
 0x189   :  { %v755_v53 = vadd.f32 %v754_v48, %v2198_v32  ;;  %v843_v54 = vpop.f32.mrf.mxu3  ;;  %936 = vmatmul.bf16.gmra.mxu0 %v2155_v35  ;;  %v483_v0 = vmax.f32 %v328_v58, 0.0 }
 0x18a   :  { %1025 = vmatmul.bf16.gmra.mxu1 %v2157_v36  ;;  %v484_v36 = vmax.f32 %v417_v6, 0.0 }
 0x18b   :  { %v844_v5 = vadd.f32 %v843_v54, %v755_v53 }
 0x18d   :  { %v1097_v17 = vmax.f32 %v844_v5, 0.0 }
 0x18e   :  { %v329_v59 = vpop.f32.mrf.mxu0 }
 0x18f   :  { %v330_v49 = vadd.f32 %v329_v59, %v2097_v30  ;;  %v418_v60 = vpop.f32.mrf.mxu1 }
 0x190   :  { %v419_v52 = vadd.f32 %v418_v60, %v2099_v31  ;;  %v756_v63 = vpop.f32.mrf.mxu2 }
 0x191   :  { %v485_v4 = vmax.f32 %v330_v49, 0.0  ;;  %v757_v35 = vadd.f32 %v756_v63, %v2198_v32  ;;  %v845_v7 = vpop.f32.mrf.mxu3 }
 0x192   :  { %v486_v8 = vmax.f32 %v419_v52, 0.0 }
 0x193   :  { %v846_v9 = vadd.f32 %v845_v7, %v757_v35  ;;  %v2273_v15 = vpack.c.bf16 %v485_v4, %v483_v0 }
 0x194   :  { %v2275_v16 = vpack.c.bf16 %v486_v8, %v484_v36 }
 0x195   :  { %v1099_v18 = vmax.f32 %v846_v9, 0.0  ;;  %798 = vmatmul.bf16.gmra.mxu2 %v2273_v15 }
 0x196   :  { %887 = vmatmul.bf16.gmra.mxu3 %v2275_v16  ;;  %v332_v19 = vpop.f32.mrf.mxu0 }
 0x197   :  { %v421_v20 = vpop.f32.mrf.mxu1  ;;  %v2279_v21 = vpack.c.bf16 %v1099_v18, %v1097_v17  ;;  %v333_v25 = vadd.f32 %v332_v19, %v2097_v30 }
 0x198   :  { %v759_v22 = vpop.f32.mrf.mxu2  ;;  %v422_v29 = vadd.f32 %v421_v20, %v2099_v31 }
 0x199   :  { %v760_v23 = vadd.f32 %v759_v22, %v2198_v32  ;;  %v848_v24 = vpop.f32.mrf.mxu3  ;;  %941 = vmatmul.bf16.gmra.mxu0 %v2165_v56  ;;  %v487_v42 = vmax.f32 %v333_v25, 0.0 }
 0x19a   :  { %1030 = vmatmul.bf16.gmra.mxu1 %v2167_v57  ;;  %v488_v56 = vmax.f32 %v422_v29, 0.0 }
 0x19b   :  { %v849_v28 = vadd.f32 %v848_v24, %v760_v23 }
 0x19d   :  { %v1101_v54 = vmax.f32 %v849_v28, 0.0 }
 0x19e   :  { %v334_v34 = vpop.f32.mrf.mxu0 }
 0x19f   :  { %v335_v37 = vadd.f32 %v334_v34, %v2097_v30  ;;  %v423_v12 = vpop.f32.mrf.mxu1 }
 0x1a0   :  { %v424_v38 = vadd.f32 %v423_v12, %v2099_v31  ;;  %v761_v13 = vpop.f32.mrf.mxu2 }
 0x1a1   :  { %v489_v43 = vmax.f32 %v335_v37, 0.0  ;;  %v762_v44 = vadd.f32 %v761_v13, %v2198_v32  ;;  %v850_v45 = vpop.f32.mrf.mxu3 }
 0x1a2   :  { %v490_v46 = vmax.f32 %v424_v38, 0.0 }
 0x1a3   :  { %v851_v57 = vadd.f32 %v850_v45, %v762_v44  ;;  %v2289_v48 = vpack.c.bf16 %v489_v43, %v487_v42 }
 0x1a4   :  { %v2291_v53 = vpack.c.bf16 %v490_v46, %v488_v56 }
 0x1a5   :  { %v1103_v55 = vmax.f32 %v851_v57, 0.0  ;;  %803 = vmatmul.bf16.gmra.mxu2 %v2289_v48 }
 0x1a6   :  { %892 = vmatmul.bf16.gmra.mxu3 %v2291_v53  ;;  %v337_v5 = vpop.f32.mrf.mxu0 }
 0x1a7   :  { %v426_v58 = vpop.f32.mrf.mxu1  ;;  %v2295_v6 = vpack.c.bf16 %v1103_v55, %v1101_v54  ;;  %v338_v63 = vadd.f32 %v337_v5, %v2097_v30 }
 0x1a8   :  { %v764_v59 = vpop.f32.mrf.mxu2  ;;  %v427_v0 = vadd.f32 %v426_v58, %v2099_v31 }
 0x1a9   :  { %v765_v49 = vadd.f32 %v764_v59, %v2198_v32  ;;  %v853_v60 = vpop.f32.mrf.mxu3  ;;  %946 = vmatmul.bf16.gmra.mxu0 %v2175_v11  ;;  %v491_v9 = vmax.f32 %v338_v63, 0.0 }
 0x1aa   :  { %1035 = vmatmul.bf16.gmra.mxu1 %v2177_v14  ;;  %v492_v11 = vmax.f32 %v427_v0, 0.0 }
 0x1ab   :  { %v854_v52 = vadd.f32 %v853_v60, %v765_v49 }
 0x1ad   :  { %v1105_v24 = vmax.f32 %v854_v52, 0.0 }
 0x1ae   :  { %v339_v4 = vpop.f32.mrf.mxu0 }
 0x1af   :  { %v340_v35 = vadd.f32 %v339_v4, %v2097_v30  ;;  %v428_v7 = vpop.f32.mrf.mxu1 }
 0x1b0   :  { %v429_v36 = vadd.f32 %v428_v7, %v2099_v31  ;;  %v766_v8 = vpop.f32.mrf.mxu2  ;;  %v2312_v31 = vperm.slane %v2190_v50, 1 }
 0x1b1   :  { %v493_v17 = vmax.f32 %v340_v35, 0.0  ;;  %v767_v18 = vadd.f32 %v766_v8, %v2198_v32  ;;  %v855_v19 = vpop.f32.mrf.mxu3 }
 0x1b2   :  { %v494_v20 = vmax.f32 %v429_v36, 0.0 }
 0x1b3   :  { %v856_v14 = vadd.f32 %v855_v19, %v767_v18  ;;  %v2305_v22 = vpack.c.bf16 %v493_v17, %v491_v9 }
 0x1b4   :  { %v2307_v23 = vpack.c.bf16 %v494_v20, %v492_v11 }
 0x1b5   :  { %v1107_v28 = vmax.f32 %v856_v14, 0.0  ;;  %808 = vmatmul.bf16.gmra.mxu2 %v2305_v22 }
 0x1b6   :  { %897 = vmatmul.bf16.gmra.mxu3 %v2307_v23  ;;  %v912_v30 = vpop.f32.mrf.mxu0 }
 0x1b7   :  { %v1001_v25 = vpop.f32.mrf.mxu1  ;;  %v2314_v29 = vpack.c.bf16 %v1107_v28, %v1105_v24  ;;  %v913_v38 = vadd.f32 %v912_v30, %v2312_v31 }
 0x1b8   :  { %v769_v34 = vpop.f32.mrf.mxu2 }
 0x1b9   :  { %v770_v37 = vadd.f32 %v769_v34, %v2198_v32  ;;  %v858_v12 = vpop.f32.mrf.mxu3  ;;  %951 = vmatmul.bf16.gmra.mxu0 %v2192_v51  ;;  %v1002_v43 = vadd.f32 %v1001_v25, %v913_v38 }
 0x1ba   :  { %1040 = vmatmul.bf16.gmra.mxu1 %v2194_v27 }
 0x1bb   :  { %v859_v13 = vadd.f32 %v858_v12, %v770_v37  ;;  %v1082_v54 = vmax.f32 %v1002_v43, 0.0 }
 0x1bd   :  { %v1109_v58 = vmax.f32 %v859_v13, 0.0 }
 0x1be   :  { %v914_v42 = vpop.f32.mrf.mxu0 }
 0x1bf   :  { %v915_v44 = vadd.f32 %v914_v42, %v2312_v31  ;;  %v1003_v50 = vpop.f32.mrf.mxu1 }
 0x1c0   :  { %v771_v45 = vpop.f32.mrf.mxu2 }
 0x1c1   :  { %v1004_v56 = vadd.f32 %v1003_v50, %v915_v44  ;;  %v772_v46 = vadd.f32 %v771_v45, %v2198_v32  ;;  %v860_v57 = vpop.f32.mrf.mxu3 }
 0x1c3   :  { %v1084_v55 = vmax.f32 %v1004_v56, 0.0  ;;  %v861_v5 = vadd.f32 %v860_v57, %v772_v46 }
 0x1c5   :  { %v1146_v51 = vpack.c.bf16 %v1084_v55, %v1082_v54  ;;  %v1111_v59 = vmax.f32 %v861_v5, 0.0  ;;  %1317 = vmatmul.bf16.vlgmr.msrb.gmra.mxu2 %v2215_v2 }
 0x1c6   :  { %v917_v27 = vpop.f32.mrf.mxu0 }
 0x1c7   :  { %v1006_v49 = vpop.f32.mrf.mxu1  ;;  %1406 = vmatmul.bf16.vlgmr.msrb.gmra.mxu3 %v1146_v51  ;;  %v2323_v60 = vpack.c.bf16 %v1111_v59, %v1109_v58  ;;  %v918_v4 = vadd.f32 %v917_v27, %v2312_v31 }
 0x1c8   :  { %v774_v52 = vpop.f32.mrf.mxu2 }
 0x1c9   :  { %v775_v63 = vadd.f32 %v774_v52, %v2198_v32  ;;  %v863_v0 = vpop.f32.mrf.mxu3  ;;  %956 = vmatmul.bf16.gmra.mxu0 %v2209_v61  ;;  %v1007_v36 = vadd.f32 %v1006_v49, %v918_v4 }
 0x1ca   :  { %1045 = vmatmul.bf16.gmra.mxu1 %v2211_v62 }
 0x1cb   :  { %v864_v35 = vadd.f32 %v863_v0, %v775_v63  ;;  %v1086_v11 = vmax.f32 %v1007_v36, 0.0 }
 0x1cd   :  { %v1113_v24 = vmax.f32 %v864_v35, 0.0 }
 0x1ce   :  { %v919_v7 = vpop.f32.mrf.mxu0 }
 0x1cf   :  { %v920_v2 = vadd.f32 %v919_v7, %v2312_v31  ;;  %v1008_v8 = vpop.f32.mrf.mxu1 }
 0x1d0   :  { %v776_v9 = vpop.f32.mrf.mxu2 }
 0x1d1   :  { %v1009_v17 = vadd.f32 %v1008_v8, %v920_v2  ;;  %v777_v18 = vadd.f32 %v776_v9, %v2198_v32  ;;  %v865_v19 = vpop.f32.mrf.mxu3 }
 0x1d3   :  { %v1088_v20 = vmax.f32 %v1009_v17, 0.0  ;;  %v866_v14 = vadd.f32 %v865_v19, %v777_v18 }
 0x1d5   :  { %v1115_v61 = vmax.f32 %v866_v14, 0.0  ;;  %1322 = vmatmul.bf16.gmra.mxu2 %v2231_v41  ;;  %v1148_v62 = vpack.c.bf16 %v1088_v20, %v1086_v11 }
 0x1d6   :  { %v922_v28 = vpop.f32.mrf.mxu0 }
 0x1d7   :  { %v1011_v30 = vpop.f32.mrf.mxu1  ;;  %1411 = vmatmul.bf16.gmra.mxu3 %v1148_v62  ;;  %v2332_v25 = vpack.c.bf16 %v1115_v61, %v1113_v24  ;;  %v923_v38 = vadd.f32 %v922_v28, %v2312_v31 }
 0x1d8   :  { %v779_v34 = vpop.f32.mrf.mxu2 }
 0x1d9   :  { %v780_v37 = vadd.f32 %v779_v34, %v2198_v32  ;;  %v868_v12 = vpop.f32.mrf.mxu3  ;;  %961 = vmatmul.bf16.gmra.mxu0 %v2225_v26  ;;  %v1012_v43 = vadd.f32 %v1011_v30, %v923_v38 }
 0x1da   :  { %1050 = vmatmul.bf16.gmra.mxu1 %v2227_v33 }
 0x1db   :  { %v869_v13 = vadd.f32 %v868_v12, %v780_v37  ;;  %v1090_v57 = vmax.f32 %v1012_v43, 0.0 }
 0x1dd   :  { %v1117_v5 = vmax.f32 %v869_v13, 0.0 }
 0x1de   :  { %v924_v42 = vpop.f32.mrf.mxu0 }
 0x1df   :  { %v925_v41 = vadd.f32 %v924_v42, %v2312_v31  ;;  %v1013_v44 = vpop.f32.mrf.mxu1 }
 0x1e0   :  { %v781_v50 = vpop.f32.mrf.mxu2 }
 0x1e1   :  { %v1014_v45 = vadd.f32 %v1013_v44, %v925_v41  ;;  %v782_v56 = vadd.f32 %v781_v50, %v2198_v32  ;;  %v870_v46 = vpop.f32.mrf.mxu3 }
 0x1e3   :  { %v1092_v54 = vmax.f32 %v1014_v45, 0.0  ;;  %v871_v55 = vadd.f32 %v870_v46, %v782_v56 }
 0x1e5   :  { %v1119_v26 = vmax.f32 %v871_v55, 0.0  ;;  %1327 = vmatmul.bf16.gmra.mxu2 %v2247_v10  ;;  %v1150_v33 = vpack.c.bf16 %v1092_v54, %v1090_v57 }
 0x1e6   :  { %v927_v58 = vpop.f32.mrf.mxu0 }
 0x1e7   :  { %v1016_v51 = vpop.f32.mrf.mxu1  ;;  %1416 = vmatmul.bf16.gmra.mxu3 %v1150_v33  ;;  %v2341_v59 = vpack.c.bf16 %v1119_v26, %v1117_v5  ;;  %v928_v63 = vadd.f32 %v927_v58, %v2312_v31 }
 0x1e8   :  { %v784_v27 = vpop.f32.mrf.mxu2 }
 0x1e9   :  { %v785_v49 = vadd.f32 %v784_v27, %v2198_v32  ;;  %v873_v52 = vpop.f32.mrf.mxu3  ;;  %966 = vmatmul.bf16.gmra.mxu0 %v2241_v1  ;;  %v1017_v35 = vadd.f32 %v1016_v51, %v928_v63 }
 0x1ea   :  { %1055 = vmatmul.bf16.gmra.mxu1 %v2243_v3 }
 0x1eb   :  { %v874_v0 = vadd.f32 %v873_v52, %v785_v49  ;;  %v1094_v17 = vmax.f32 %v1017_v35, 0.0 }
 0x1ed   :  { %v1121_v11 = vmax.f32 %v874_v0, 0.0 }
 0x1ee   :  { %v929_v4 = vpop.f32.mrf.mxu0 }
 0x1ef   :  { %v930_v10 = vadd.f32 %v929_v4, %v2312_v31  ;;  %v1018_v7 = vpop.f32.mrf.mxu1 }
 0x1f0   :  { %v786_v36 = vpop.f32.mrf.mxu2 }
 0x1f1   :  { %v1019_v2 = vadd.f32 %v1018_v7, %v930_v10  ;;  %v787_v8 = vadd.f32 %v786_v36, %v2198_v32  ;;  %v875_v9 = vpop.f32.mrf.mxu3 }
 0x1f3   :  { %v1096_v18 = vmax.f32 %v1019_v2, 0.0  ;;  %v876_v19 = vadd.f32 %v875_v9, %v787_v8 }
 0x1f5   :  { %v1123_v1 = vmax.f32 %v876_v19, 0.0  ;;  %1332 = vmatmul.bf16.gmra.mxu2 %v2263_v47  ;;  %v1152_v3 = vpack.c.bf16 %v1096_v18, %v1094_v17 }
 0x1f6   :  { %v932_v20 = vpop.f32.mrf.mxu0 }
 0x1f7   :  { %v1021_v14 = vpop.f32.mrf.mxu1  ;;  %1421 = vmatmul.bf16.gmra.mxu3 %v1152_v3  ;;  %v2350_v24 = vpack.c.bf16 %v1123_v1, %v1121_v11  ;;  %v933_v30 = vadd.f32 %v932_v20, %v2312_v31 }
 0x1f8   :  { %v789_v61 = vpop.f32.mrf.mxu2 }
 0x1f9   :  { %v790_v62 = vadd.f32 %v789_v61, %v2198_v32  ;;  %v878_v28 = vpop.f32.mrf.mxu3  ;;  %971 = vmatmul.bf16.gmra.mxu0 %v2257_v39  ;;  %v1022_v12 = vadd.f32 %v1021_v14, %v933_v30 }
 0x1fa   :  { %1060 = vmatmul.bf16.gmra.mxu1 %v2259_v40 }
 0x1fb   :  { %v879_v34 = vadd.f32 %v878_v28, %v790_v62  ;;  %v1098_v44 = vmax.f32 %v1022_v12, 0.0 }
 0x1fd   :  { %v1125_v56 = vmax.f32 %v879_v34, 0.0 }
 0x1fe   :  { %v934_v37 = vpop.f32.mrf.mxu0 }
 0x1ff   :  { %v935_v47 = vadd.f32 %v934_v37, %v2312_v31  ;;  %v1023_v38 = vpop.f32.mrf.mxu1 }
 0x200   :  { %v791_v13 = vpop.f32.mrf.mxu2 }
 0x201   :  { %v1024_v42 = vadd.f32 %v1023_v38, %v935_v47  ;;  %v792_v43 = vadd.f32 %v791_v13, %v2198_v32  ;;  %v880_v41 = vpop.f32.mrf.mxu3 }
 0x203   :  { %v1100_v50 = vmax.f32 %v1024_v42, 0.0  ;;  %v881_v45 = vadd.f32 %v880_v41, %v792_v43 }
 0x205   :  { %v1154_v39 = vpack.c.bf16 %v1100_v50, %v1098_v44  ;;  %v1127_v46 = vmax.f32 %v881_v45, 0.0  ;;  %1337 = vmatmul.bf16.gmra.mxu2 %v2279_v21 }
 0x206   :  { %v937_v40 = vpop.f32.mrf.mxu0 }
 0x207   :  { %v1026_v57 = vpop.f32.mrf.mxu1  ;;  %1426 = vmatmul.bf16.gmra.mxu3 %v1154_v39  ;;  %v2359_v54 = vpack.c.bf16 %v1127_v46, %v1125_v56  ;;  %v938_v33 = vadd.f32 %v937_v40, %v2312_v31 }
 0x208   :  { %v794_v55 = vpop.f32.mrf.mxu2 }
 0x209   :  { %v795_v5 = vadd.f32 %v794_v55, %v2198_v32  ;;  %v883_v26 = vpop.f32.mrf.mxu3  ;;  %976 = vmatmul.bf16.gmra.mxu0 %v2273_v15  ;;  %v1027_v27 = vadd.f32 %v1026_v57, %v938_v33 }
 0x20a   :  { %1065 = vmatmul.bf16.gmra.mxu1 %v2275_v16 }
 0x20b   :  { %v884_v58 = vadd.f32 %v883_v26, %v795_v5  ;;  %v1102_v35 = vmax.f32 %v1027_v27, 0.0 }
 0x20d   :  { %v1129_v36 = vmax.f32 %v884_v58, 0.0 }
 0x20e   :  { %v939_v51 = vpop.f32.mrf.mxu0 }
 0x20f   :  { %v940_v21 = vadd.f32 %v939_v51, %v2312_v31  ;;  %v1028_v49 = vpop.f32.mrf.mxu1 }
 0x210   :  { %v796_v52 = vpop.f32.mrf.mxu2 }
 0x211   :  { %v1029_v63 = vadd.f32 %v1028_v49, %v940_v21  ;;  %v797_v0 = vadd.f32 %v796_v52, %v2198_v32  ;;  %v885_v4 = vpop.f32.mrf.mxu3 }
 0x213   :  { %v1104_v10 = vmax.f32 %v1029_v63, 0.0  ;;  %v886_v7 = vadd.f32 %v885_v4, %v797_v0 }
 0x215   :  { %v1156_v15 = vpack.c.bf16 %v1104_v10, %v1102_v35  ;;  %v1131_v2 = vmax.f32 %v886_v7, 0.0  ;;  %1342 = vmatmul.bf16.gmra.mxu2 %v2295_v6 }
 0x216   :  { %v942_v16 = vpop.f32.mrf.mxu0 }
 0x217   :  { %v1031_v8 = vpop.f32.mrf.mxu1  ;;  %1431 = vmatmul.bf16.gmra.mxu3 %v1156_v15  ;;  %v2368_v9 = vpack.c.bf16 %v1131_v2, %v1129_v36  ;;  %v943_v11 = vadd.f32 %v942_v16, %v2312_v31 }
 0x218   :  { %v799_v17 = vpop.f32.mrf.mxu2 }
 0x219   :  { %v800_v18 = vadd.f32 %v799_v17, %v2198_v32  ;;  %v888_v19 = vpop.f32.mrf.mxu3  ;;  %981 = vmatmul.bf16.gmra.mxu0 %v2289_v48  ;;  %v1032_v20 = vadd.f32 %v1031_v8, %v943_v11 }
 0x21a   :  { %1070 = vmatmul.bf16.gmra.mxu1 %v2291_v53 }
 0x21b   :  { %v889_v1 = vadd.f32 %v888_v19, %v800_v18  ;;  %v1106_v34 = vmax.f32 %v1032_v20, 0.0  ;;  %v2396_v20 = vld [vmem:[%s2465_s6] ss:$0 sm:$0xff]  ;;  %s2032_s6 = smov [#allocation11]  }
 0x21c   :  { %s1523_s28 = sshll.u32 %s2032_s6, 4  ;;  %s1524_s28 = int_to_ptr.vmem [resolvable:$true] %s1523_s28 }
 0x21d   :  { %v1133_v47 = vmax.f32 %v889_v1, 0.0 }
 0x21e   :  { %v944_v3 = vpop.f32.mrf.mxu0 }
 0x21f   :  { %v945_v6 = vadd.f32 %v944_v3, %v2312_v31  ;;  %v1033_v14 = vpop.f32.mrf.mxu1 }
 0x220   :  { %v801_v61 = vpop.f32.mrf.mxu2 }
 0x221   :  { %v1034_v62 = vadd.f32 %v1033_v14, %v945_v6  ;;  %v802_v28 = vadd.f32 %v801_v61, %v2198_v32  ;;  %v890_v30 = vpop.f32.mrf.mxu3 }
 0x223   :  { %v1108_v37 = vmax.f32 %v1034_v62, 0.0  ;;  %v891_v12 = vadd.f32 %v890_v30, %v802_v28 }
 0x225   :  { %v1158_v48 = vpack.c.bf16 %v1108_v37, %v1106_v34  ;;  %v1135_v38 = vmax.f32 %v891_v12, 0.0  ;;  %1347 = vmatmul.bf16.gmra.mxu2 %v2314_v29 }
 0x226   :  { %v947_v53 = vpop.f32.mrf.mxu0 }
 0x227   :  { %v1036_v13 = vpop.f32.mrf.mxu1  ;;  %1436 = vmatmul.bf16.gmra.mxu3 %v1158_v48  ;;  %v2377_v42 = vpack.c.bf16 %v1135_v38, %v1133_v47  ;;  %v948_v50 = vadd.f32 %v947_v53, %v2312_v31 }
 0x228   :  { %v804_v43 = vpop.f32.mrf.mxu2 }
 0x229   :  { %v805_v41 = vadd.f32 %v804_v43, %v2198_v32  ;;  %v893_v44 = vpop.f32.mrf.mxu3  ;;  %986 = vmatmul.bf16.gmra.mxu0 %v2305_v22  ;;  %v1037_v39 = vadd.f32 %v1036_v13, %v948_v50 }
 0x22a   :  { %1075 = vmatmul.bf16.gmra.mxu1 %v2307_v23 }
 0x22b   :  { %v894_v45 = vadd.f32 %v893_v44, %v805_v41  ;;  %v1110_v26 = vmax.f32 %v1037_v39, 0.0 }
 0x22d   :  { %v1137_v51 = vmax.f32 %v894_v45, 0.0 }
 0x22e   :  { %v949_v56 = vpop.f32.mrf.mxu0 }
 0x22f   :  { %v950_v29 = vadd.f32 %v949_v56, %v2312_v31  ;;  %v1038_v46 = vpop.f32.mrf.mxu1 }
 0x230   :  { %v806_v40 = vpop.f32.mrf.mxu2 }
 0x231   :  { %v1039_v57 = vadd.f32 %v1038_v46, %v950_v29  ;;  %v807_v55 = vadd.f32 %v806_v40, %v2198_v32  ;;  %v895_v5 = vpop.f32.mrf.mxu3 }
 0x233   :  { %v1112_v33 = vmax.f32 %v1039_v57, 0.0  ;;  %v896_v58 = vadd.f32 %v895_v5, %v807_v55 }
 0x235   :  { %v1160_v22 = vpack.c.bf16 %v1112_v33, %v1110_v26  ;;  %v1139_v27 = vmax.f32 %v896_v58, 0.0  ;;  %1352 = vmatmul.bf16.gmra.mxu2 %v2323_v60 }
 0x236   :  { %v952_v23 = vpop.f32.mrf.mxu0 }
 0x237   :  { %v1041_v21 = vpop.f32.mrf.mxu1  ;;  %1441 = vmatmul.bf16.gmra.mxu3 %v1160_v22  ;;  %v2386_v49 = vpack.c.bf16 %v1139_v27, %v1137_v51  ;;  %v953_v4 = vadd.f32 %v952_v23, %v2312_v31 }
 0x238   :  { %v809_v52 = vpop.f32.mrf.mxu2 }
 0x239   :  { %v810_v63 = vadd.f32 %v809_v52, %v2198_v32  ;;  %v898_v0 = vpop.f32.mrf.mxu3  ;;  %v1042_v7 = vadd.f32 %v1041_v21, %v953_v4 }
 0x23b   :  { %v899_v35 = vadd.f32 %v898_v0, %v810_v63  ;;  %v1114_v17 = vmax.f32 %v1042_v7, 0.0 }
 0x23d   :  { %v1141_v11 = vmax.f32 %v899_v35, 0.0 }
 0x23e   :  { %v954_v10 = vpop.f32.mrf.mxu0 }
 0x23f   :  { %v955_v36 = vadd.f32 %v954_v10, %v2312_v31  ;;  %v1043_v15 = vpop.f32.mrf.mxu1 }
 0x240   :  { %v811_v2 = vpop.f32.mrf.mxu2 }
 0x241   :  { %v1044_v16 = vadd.f32 %v1043_v15, %v955_v36  ;;  %v812_v60 = vadd.f32 %v811_v2, %v2198_v32  ;;  %v900_v8 = vpop.f32.mrf.mxu3 }
 0x243   :  { %v1116_v18 = vmax.f32 %v1044_v16, 0.0  ;;  %v901_v19 = vadd.f32 %v900_v8, %v812_v60 }
 0x245   :  { %v1162_v1 = vpack.c.bf16 %v1116_v18, %v1114_v17  ;;  %v1143_v3 = vmax.f32 %v901_v19, 0.0  ;;  %1357 = vmatmul.bf16.gmra.mxu2 %v2332_v25 }
 0x246   :  { %v957_v6 = vpop.f32.mrf.mxu0 }
 0x247   :  { %v1046_v14 = vpop.f32.mrf.mxu1  ;;  %1446 = vmatmul.bf16.gmra.mxu3 %v1162_v1  ;;  %v2398_v61 = vpack.c.bf16 %v1143_v3, %v1141_v11  ;;  %v958_v30 = vadd.f32 %v957_v6, %v2312_v31 }
 0x248   :  { %v1318_v32 = vpop.f32.mrf.mxu2 }
 0x249   :  { %v1319_v62 = vadd.f32 %v2396_v20, %v1318_v32  ;;  %v1047_v25 = vadd.f32 %v1046_v14, %v958_v30 }
 0x24a   :  { %v1407_v28 = vpop.f32.mrf.mxu3 }
 0x24b   :  { %v1408_v34 = vadd.f32 %v1407_v28, %v1319_v62  ;;  %v1118_v43 = vmax.f32 %v1047_v25, 0.0 }
 0x24d   :  { %1487 = vst [vmem:[#allocation11] sm:$0xff] %v1408_v34 }
 0x24e   :  { %v959_v37 = vpop.f32.mrf.mxu0 }
 0x24f   :  { %v960_v12 = vadd.f32 %v959_v37, %v2312_v31  ;;  %v1048_v47 = vpop.f32.mrf.mxu1 }
 0x250   :  { %v1320_v48 = vpop.f32.mrf.mxu2 }
 0x251   :  { %v1049_v38 = vadd.f32 %v1048_v47, %v960_v12  ;;  %v1321_v53 = vadd.f32 %v2396_v20, %v1320_v48 }
 0x252   :  { %v1409_v13 = vpop.f32.mrf.mxu3 }
 0x253   :  { %v1120_v41 = vmax.f32 %v1049_v38, 0.0  ;;  %v1410_v44 = vadd.f32 %v1409_v13, %v1321_v53 }
 0x255   :  { %v1164_v50 = vpack.c.bf16 %v1120_v41, %v1118_v43  ;;  %1488 = vst [vmem:[#allocation11 + $0x8] sm:$0xff] %v1410_v44  ;;  %1362 = vmatmul.bf16.gmra.mxu2 %v2341_v59 }
 0x256   :  { %v962_v45 = vpop.f32.mrf.mxu0 }
 0x257   :  { %v1051_v56 = vpop.f32.mrf.mxu1  ;;  %1451 = vmatmul.bf16.gmra.mxu3 %v1164_v50  ;;  %v963_v40 = vadd.f32 %v962_v45, %v2312_v31 }
 0x258   :  { %v1323_v39 = vpop.f32.mrf.mxu2 }
 0x259   :  { %v1324_v29 = vadd.f32 %v2396_v20, %v1323_v39  ;;  %v1052_v5 = vadd.f32 %v1051_v56, %v963_v40 }
 0x25a   :  { %v1412_v46 = vpop.f32.mrf.mxu3 }
 0x25b   :  { %v1413_v57 = vadd.f32 %v1412_v46, %v1324_v29  ;;  %v1122_v27 = vmax.f32 %v1052_v5, 0.0 }
 0x25d   :  { %1489 = vst [vmem:[#allocation11 + $0x10] sm:$0xff] %v1413_v57 }
 0x25e   :  { %v964_v55 = vpop.f32.mrf.mxu0 }
 0x25f   :  { %v965_v26 = vadd.f32 %v964_v55, %v2312_v31  ;;  %v1053_v33 = vpop.f32.mrf.mxu1 }
 0x260   :  { %v1325_v58 = vpop.f32.mrf.mxu2 }
 0x261   :  { %v1054_v51 = vadd.f32 %v1053_v33, %v965_v26  ;;  %v1326_v59 = vadd.f32 %v2396_v20, %v1325_v58 }
 0x262   :  { %v1414_v22 = vpop.f32.mrf.mxu3 }
 0x263   :  { %v1124_v23 = vmax.f32 %v1054_v51, 0.0  ;;  %v1415_v21 = vadd.f32 %v1414_v22, %v1326_v59 }
 0x265   :  { %v1166_v52 = vpack.c.bf16 %v1124_v23, %v1122_v27  ;;  %1490 = vst [vmem:[#allocation11 + $0x18] sm:$0xff] %v1415_v21  ;;  %1367 = vmatmul.bf16.gmra.mxu2 %v2350_v24 }
 0x266   :  { %v967_v63 = vpop.f32.mrf.mxu0 }
 0x267   :  { %v1056_v0 = vpop.f32.mrf.mxu1  ;;  %1456 = vmatmul.bf16.gmra.mxu3 %v1166_v52  ;;  %v968_v7 = vadd.f32 %v967_v63, %v2312_v31 }
 0x268   :  { %v1328_v4 = vpop.f32.mrf.mxu2 }
 0x269   :  { %v1329_v35 = vadd.f32 %v2396_v20, %v1328_v4  ;;  %v1057_v2 = vadd.f32 %v1056_v0, %v968_v7 }
 0x26a   :  { %v1417_v10 = vpop.f32.mrf.mxu3 }
 0x26b   :  { %v1418_v36 = vadd.f32 %v1417_v10, %v1329_v35  ;;  %v1126_v19 = vmax.f32 %v1057_v2, 0.0 }
 0x26d   :  { %1491 = vst [vmem:[#allocation11 + $0x20] sm:$0xff] %v1418_v36 }
 0x26e   :  { %v969_v15 = vpop.f32.mrf.mxu0 }
 0x26f   :  { %v970_v16 = vadd.f32 %v969_v15, %v2312_v31  ;;  %v1058_v60 = vpop.f32.mrf.mxu1 }
 0x270   :  { %v1330_v8 = vpop.f32.mrf.mxu2 }
 0x271   :  { %v1059_v17 = vadd.f32 %v1058_v60, %v970_v16  ;;  %v1331_v24 = vadd.f32 %v2396_v20, %v1330_v8 }
 0x272   :  { %v1419_v18 = vpop.f32.mrf.mxu3 }
 0x273   :  { %v1128_v11 = vmax.f32 %v1059_v17, 0.0  ;;  %v1420_v1 = vadd.f32 %v1419_v18, %v1331_v24 }
 0x275   :  { %v1168_v3 = vpack.c.bf16 %v1128_v11, %v1126_v19  ;;  %1492 = vst [vmem:[#allocation11 + $0x28] sm:$0xff] %v1420_v1  ;;  %1372 = vmatmul.bf16.gmra.mxu2 %v2359_v54 }
 0x276   :  { %v972_v6 = vpop.f32.mrf.mxu0 }
 0x277   :  { %v1061_v14 = vpop.f32.mrf.mxu1  ;;  %1461 = vmatmul.bf16.gmra.mxu3 %v1168_v3  ;;  %v973_v30 = vadd.f32 %v972_v6, %v2312_v31 }
 0x278   :  { %v1333_v32 = vpop.f32.mrf.mxu2 }
 0x279   :  { %v1334_v62 = vadd.f32 %v2396_v20, %v1333_v32  ;;  %v1062_v25 = vadd.f32 %v1061_v14, %v973_v30 }
 0x27a   :  { %v1422_v28 = vpop.f32.mrf.mxu3 }
 0x27b   :  { %v1423_v34 = vadd.f32 %v1422_v28, %v1334_v62  ;;  %v1130_v13 = vmax.f32 %v1062_v25, 0.0 }
 0x27d   :  { %1493 = vst [vmem:[#allocation11 + $0x30] sm:$0xff] %v1423_v34 }
 0x27e   :  { %v974_v37 = vpop.f32.mrf.mxu0 }
 0x27f   :  { %v975_v12 = vadd.f32 %v974_v37, %v2312_v31  ;;  %v1063_v47 = vpop.f32.mrf.mxu1 }
 0x280   :  { %v1335_v48 = vpop.f32.mrf.mxu2 }
 0x281   :  { %v1064_v38 = vadd.f32 %v1063_v47, %v975_v12  ;;  %v1336_v54 = vadd.f32 %v2396_v20, %v1335_v48 }
 0x282   :  { %v1424_v53 = vpop.f32.mrf.mxu3 }
 0x283   :  { %v1132_v43 = vmax.f32 %v1064_v38, 0.0  ;;  %v1425_v41 = vadd.f32 %v1424_v53, %v1336_v54 }
 0x285   :  { %v1170_v44 = vpack.c.bf16 %v1132_v43, %v1130_v13  ;;  %1494 = vst [vmem:[#allocation11 + $0x38] sm:$0xff] %v1425_v41  ;;  %1377 = vmatmul.bf16.gmra.mxu2 %v2368_v9 }
 0x286   :  { %v977_v50 = vpop.f32.mrf.mxu0 }
 0x287   :  { %v1066_v45 = vpop.f32.mrf.mxu1  ;;  %1466 = vmatmul.bf16.gmra.mxu3 %v1170_v44  ;;  %v978_v46 = vadd.f32 %v977_v50, %v2312_v31 }
 0x288   :  { %v1338_v56 = vpop.f32.mrf.mxu2 }
 0x289   :  { %v1339_v39 = vadd.f32 %v2396_v20, %v1338_v56  ;;  %v1067_v55 = vadd.f32 %v1066_v45, %v978_v46 }
 0x28a   :  { %v1427_v29 = vpop.f32.mrf.mxu3 }
 0x28b   :  { %v1428_v40 = vadd.f32 %v1427_v29, %v1339_v39  ;;  %v1134_v59 = vmax.f32 %v1067_v55, 0.0 }
 0x28d   :  { %1495 = vst [vmem:[#allocation11 + $0x40] sm:$0xff] %v1428_v40 }
 0x28e   :  { %v979_v57 = vpop.f32.mrf.mxu0 }
 0x28f   :  { %v980_v5 = vadd.f32 %v979_v57, %v2312_v31  ;;  %v1068_v26 = vpop.f32.mrf.mxu1 }
 0x290   :  { %v1340_v33 = vpop.f32.mrf.mxu2 }
 0x291   :  { %v1069_v58 = vadd.f32 %v1068_v26, %v980_v5  ;;  %v1341_v9 = vadd.f32 %v2396_v20, %v1340_v33 }
 0x292   :  { %v1429_v51 = vpop.f32.mrf.mxu3 }
 0x293   :  { %v1136_v22 = vmax.f32 %v1069_v58, 0.0  ;;  %v1430_v27 = vadd.f32 %v1429_v51, %v1341_v9 }
 0x295   :  { %v1172_v23 = vpack.c.bf16 %v1136_v22, %v1134_v59  ;;  %1496 = vst [vmem:[#allocation11 + $0x48] sm:$0xff] %v1430_v27  ;;  %1382 = vmatmul.bf16.gmra.mxu2 %v2377_v42 }
 0x296   :  { %v982_v21 = vpop.f32.mrf.mxu0 }
 0x297   :  { %v1071_v52 = vpop.f32.mrf.mxu1  ;;  %1471 = vmatmul.bf16.gmra.mxu3 %v1172_v23  ;;  %v983_v35 = vadd.f32 %v982_v21, %v2312_v31 }
 0x298   :  { %v1343_v63 = vpop.f32.mrf.mxu2 }
 0x299   :  { %v1344_v0 = vadd.f32 %v2396_v20, %v1343_v63  ;;  %v1072_v36 = vadd.f32 %v1071_v52, %v983_v35 }
 0x29a   :  { %v1432_v4 = vpop.f32.mrf.mxu3 }
 0x29b   :  { %v1433_v10 = vadd.f32 %v1432_v4, %v1344_v0  ;;  %v1138_v17 = vmax.f32 %v1072_v36, 0.0 }
 0x29d   :  { %1497 = vst [vmem:[#allocation11 + $0x50] sm:$0xff] %v1433_v10 }
 0x29e   :  { %v984_v7 = vpop.f32.mrf.mxu0 }
 0x29f   :  { %v985_v15 = vadd.f32 %v984_v7, %v2312_v31  ;;  %v1073_v2 = vpop.f32.mrf.mxu1 }
 0x2a0   :  { %v1345_v16 = vpop.f32.mrf.mxu2 }
 0x2a1   :  { %v1074_v60 = vadd.f32 %v1073_v2, %v985_v15  ;;  %v1346_v42 = vadd.f32 %v2396_v20, %v1345_v16 }
 0x2a2   :  { %v1434_v8 = vpop.f32.mrf.mxu3 }
 0x2a3   :  { %v1140_v24 = vmax.f32 %v1074_v60, 0.0  ;;  %v1435_v18 = vadd.f32 %v1434_v8, %v1346_v42 }
 0x2a5   :  { %v1174_v19 = vpack.c.bf16 %v1140_v24, %v1138_v17  ;;  %1498 = vst [vmem:[#allocation11 + $0x58] sm:$0xff] %v1435_v18  ;;  %1387 = vmatmul.bf16.gmra.mxu2 %v2386_v49 }
 0x2a6   :  { %v987_v11 = vpop.f32.mrf.mxu0 }
 0x2a7   :  { %v1076_v1 = vpop.f32.mrf.mxu1  ;;  %1476 = vmatmul.bf16.gmra.mxu3 %v1174_v19  ;;  %v988_v32 = vadd.f32 %v987_v11, %v2312_v31 }
 0x2a8   :  { %v1348_v3 = vpop.f32.mrf.mxu2 }
 0x2a9   :  { %v1349_v6 = vadd.f32 %v2396_v20, %v1348_v3  ;;  %v1077_v30 = vadd.f32 %v1076_v1, %v988_v32 }
 0x2aa   :  { %v1437_v14 = vpop.f32.mrf.mxu3 }
 0x2ab   :  { %v1438_v62 = vadd.f32 %v1437_v14, %v1349_v6  ;;  %v1142_v48 = vmax.f32 %v1077_v30, 0.0 }
 0x2ad   :  { %1499 = vst [vmem:[#allocation11 + $0x60] sm:$0xff] %v1438_v62 }
 0x2ae   :  { %v989_v28 = vpop.f32.mrf.mxu0 }
 0x2af   :  { %v990_v34 = vadd.f32 %v989_v28, %v2312_v31  ;;  %v1078_v37 = vpop.f32.mrf.mxu1 }
 0x2b0   :  { %v1350_v25 = vpop.f32.mrf.mxu2 }
 0x2b1   :  { %v1079_v12 = vadd.f32 %v1078_v37, %v990_v34  ;;  %v1351_v49 = vadd.f32 %v2396_v20, %v1350_v25 }
 0x2b2   :  { %v1439_v47 = vpop.f32.mrf.mxu3 }
 0x2b3   :  { %v1144_v38 = vmax.f32 %v1079_v12, 0.0  ;;  %v1440_v54 = vadd.f32 %v1439_v47, %v1351_v49 }
 0x2b5   :  { %v1176_v53 = vpack.c.bf16 %v1144_v38, %v1142_v48  ;;  %1500 = vst [vmem:[#allocation11 + $0x68] sm:$0xff] %v1440_v54  ;;  %1392 = vmatmul.bf16.gmra.mxu2 %v2398_v61 }
 0x2b7   :  { %1481 = vmatmul.bf16.gmra.mxu3 %v1176_v53 }
 0x2b8   :  { %v1353_v13 = vpop.f32.mrf.mxu2 }
 0x2b9   :  { %v1354_v43 = vadd.f32 %v2396_v20, %v1353_v13 }
 0x2ba   :  { %v1442_v41 = vpop.f32.mrf.mxu3 }
 0x2bb   :  { %v1443_v44 = vadd.f32 %v1442_v41, %v1354_v43 }
 0x2bd   :  { %1501 = vst [vmem:[#allocation11 + $0x70] sm:$0xff] %v1443_v44 }
 0x2c0   :  { %v1355_v31 = vpop.f32.mrf.mxu2 }
 0x2c1   :  { %v1356_v50 = vadd.f32 %v2396_v20, %v1355_v31 }
 0x2c2   :  { %v1444_v45 = vpop.f32.mrf.mxu3 }
 0x2c3   :  { %v1445_v56 = vadd.f32 %v1444_v45, %v1356_v50 }
 0x2c5   :  { %1502 = vst [vmem:[#allocation11 + $0x78] sm:$0xff] %v1445_v56 }
 0x2c8   :  { %v1358_v39 = vpop.f32.mrf.mxu2 }
 0x2c9   :  { %v1359_v29 = vadd.f32 %v2396_v20, %v1358_v39 }
 0x2ca   :  { %v1447_v46 = vpop.f32.mrf.mxu3 }
 0x2cb   :  { %v1448_v40 = vadd.f32 %v1447_v46, %v1359_v29 }
 0x2cd   :  { %1503 = vst [vmem:[#allocation11 + $0x80] sm:$0xff] %v1448_v40 }
 0x2d0   :  { %v1360_v61 = vpop.f32.mrf.mxu2 }
 0x2d1   :  { %v1361_v57 = vadd.f32 %v2396_v20, %v1360_v61 }
 0x2d2   :  { %v1449_v55 = vpop.f32.mrf.mxu3 }
 0x2d3   :  { %v1450_v5 = vadd.f32 %v1449_v55, %v1361_v57 }
 0x2d5   :  { %1504 = vst [vmem:[#allocation11 + $0x88] sm:$0xff] %v1450_v5 }
 0x2d8   :  { %v1363_v26 = vpop.f32.mrf.mxu2 }
 0x2d9   :  { %v1364_v33 = vadd.f32 %v2396_v20, %v1363_v26 }
 0x2da   :  { %v1452_v58 = vpop.f32.mrf.mxu3 }
 0x2db   :  { %v1453_v9 = vadd.f32 %v1452_v58, %v1364_v33 }
 0x2dd   :  { %1505 = vst [vmem:[#allocation11 + $0x90] sm:$0xff] %v1453_v9 }
 0x2e0   :  { %v1365_v51 = vpop.f32.mrf.mxu2 }
 0x2e1   :  { %v1366_v59 = vadd.f32 %v2396_v20, %v1365_v51 }
 0x2e2   :  { %v1454_v22 = vpop.f32.mrf.mxu3 }
 0x2e3   :  { %v1455_v27 = vadd.f32 %v1454_v22, %v1366_v59 }
 0x2e5   :  { %1506 = vst [vmem:[#allocation11 + $0x98] sm:$0xff] %v1455_v27 }
 0x2e8   :  { %v1368_v23 = vpop.f32.mrf.mxu2 }
 0x2e9   :  { %v1369_v21 = vadd.f32 %v2396_v20, %v1368_v23 }
 0x2ea   :  { %v1457_v52 = vpop.f32.mrf.mxu3 }
 0x2eb   :  { %v1458_v63 = vadd.f32 %v1457_v52, %v1369_v21 }
 0x2ed   :  { %1507 = vst [vmem:[#allocation11 + $0xa0] sm:$0xff] %v1458_v63 }
 0x2f0   :  { %v1370_v0 = vpop.f32.mrf.mxu2 }
 0x2f1   :  { %v1371_v4 = vadd.f32 %v2396_v20, %v1370_v0 }
 0x2f2   :  { %v1459_v35 = vpop.f32.mrf.mxu3 }
 0x2f3   :  { %v1460_v10 = vadd.f32 %v1459_v35, %v1371_v4 }
 0x2f5   :  { %1508 = vst [vmem:[#allocation11 + $0xa8] sm:$0xff] %v1460_v10 }
 0x2f8   :  { %v1373_v7 = vpop.f32.mrf.mxu2 }
 0x2f9   :  { %v1374_v36 = vadd.f32 %v2396_v20, %v1373_v7 }
 0x2fa   :  { %v1462_v15 = vpop.f32.mrf.mxu3 }
 0x2fb   :  { %v1463_v2 = vadd.f32 %v1462_v15, %v1374_v36 }
 0x2fd   :  { %1509 = vst [vmem:[#allocation11 + $0xb0] sm:$0xff] %v1463_v2 }
 0x300   :  { %v1375_v16 = vpop.f32.mrf.mxu2 }
 0x301   :  { %v1376_v60 = vadd.f32 %v2396_v20, %v1375_v16 }
 0x302   :  { %v1464_v42 = vpop.f32.mrf.mxu3 }
 0x303   :  { %v1465_v8 = vadd.f32 %v1464_v42, %v1376_v60 }
 0x305   :  { %1510 = vst [vmem:[#allocation11 + $0xb8] sm:$0xff] %v1465_v8 }
 0x308   :  { %v1378_v17 = vpop.f32.mrf.mxu2 }
 0x309   :  { %v1379_v24 = vadd.f32 %v2396_v20, %v1378_v17 }
 0x30a   :  { %v1467_v18 = vpop.f32.mrf.mxu3 }
 0x30b   :  { %v1468_v19 = vadd.f32 %v1467_v18, %v1379_v24 }
 0x30d   :  { %1511 = vst [vmem:[#allocation11 + $0xc0] sm:$0xff] %v1468_v19 }
 0x310   :  { %v1380_v11 = vpop.f32.mrf.mxu2 }
 0x311   :  { %v1381_v1 = vadd.f32 %v2396_v20, %v1380_v11 }
 0x312   :  { %v1469_v3 = vpop.f32.mrf.mxu3 }
 0x313   :  { %v1470_v6 = vadd.f32 %v1469_v3, %v1381_v1 }
 0x315   :  { %1512 = vst [vmem:[#allocation11 + $0xc8] sm:$0xff] %v1470_v6 }
 0x318   :  { %v1383_v14 = vpop.f32.mrf.mxu2 }
 0x319   :  { %v1384_v32 = vadd.f32 %v2396_v20, %v1383_v14 }
 0x31a   :  { %v1472_v62 = vpop.f32.mrf.mxu3 }
 0x31b   :  { %v1473_v28 = vadd.f32 %v1472_v62, %v1384_v32 }
 0x31d   :  { %1513 = vst [vmem:[#allocation11 + $0xd0] sm:$0xff] %v1473_v28 }
 0x320   :  { %v1385_v30 = vpop.f32.mrf.mxu2 }
 0x321   :  { %v1386_v34 = vadd.f32 %v2396_v20, %v1385_v30 }
 0x322   :  { %v1474_v37 = vpop.f32.mrf.mxu3 }
 0x323   :  { %v1475_v25 = vadd.f32 %v1474_v37, %v1386_v34 }
 0x325   :  { %1514 = vst [vmem:[#allocation11 + $0xd8] sm:$0xff] %v1475_v25 }
 0x328   :  { %v1388_v12 = vpop.f32.mrf.mxu2 }
 0x329   :  { %v1389_v49 = vadd.f32 %v2396_v20, %v1388_v12 }
 0x32a   :  { %v1477_v47 = vpop.f32.mrf.mxu3 }
 0x32b   :  { %v1478_v48 = vadd.f32 %v1477_v47, %v1389_v49 }
 0x32d   :  { %1515 = vst [vmem:[#allocation11 + $0xe0] sm:$0xff] %v1478_v48 }
 0x330   :  { %v1390_v38 = vpop.f32.mrf.mxu2 }
 0x331   :  { %v1391_v54 = vadd.f32 %v2396_v20, %v1390_v38 }
 0x332   :  { %v1479_v53 = vpop.f32.mrf.mxu3 }
 0x333   :  { %v1480_v13 = vadd.f32 %v1479_v53, %v1391_v54 }
 0x335   :  { %1516 = vst [vmem:[#allocation11 + $0xe8] sm:$0xff] %v1480_v13 }
 0x338   :  { %v1393_v43 = vpop.f32.mrf.mxu2 }
 0x339   :  { %v1394_v41 = vadd.f32 %v2396_v20, %v1393_v43 }
 0x33a   :  { %v1482_v44 = vpop.f32.mrf.mxu3 }
 0x33b   :  { %v1483_v31 = vadd.f32 %v1482_v44, %v1394_v41 }
 0x33d   :  { %1517 = vst [vmem:[#allocation11 + $0xf0] sm:$0xff] %v1483_v31 }
 0x340   :  { %v1395_v50 = vpop.f32.mrf.mxu2 }
 0x341   :  { %v1396_v45 = vadd.f32 %v2396_v20, %v1395_v50 }
 0x342   :  { %v1484_v56 = vpop.f32.mrf.mxu3 }
 0x343   :  { %v1485_v39 = vadd.f32 %v1484_v56, %v1396_v45 }
 0x345   :  { %1518 = vst [vmem:[#allocation11 + $0xf8] sm:$0xff] %v1485_v39 }
 0x346   :  { %1531 = dma.vmem_to_hbm [thread:$0]  %s1524_s28, 4096, %s1526_s8, [#allocation4], %s2024_s9, %s2024_s9, %s2025_s10  }
 0x347   :  { %2021 = dma.done.wait [#allocation4], 4096  }
 0x348   :  { %2022 = vsyncadd [#allocation4], 4294963200 }
 0x349   :  { %1536 = vsyncpa [#allocation3], 1 }
 0x34a   :  { %1537 = vsyncpa [#allocation6], 1 }
 0x34b   :  { %1538 = vsyncpa [#allocation9], 1 }
 0x34c   :  { %1539 = vsyncpa [#allocation4], 1 }

</bundles_post_ra>
